<compile_context>
chip_gen: v5e
topology: v5e:2x2
jax: 0.10.0
libtpu: 0.0.40
codegen_flags: <defaults>
</compile_context>

<pallas_src>
import functools
from typing import NamedTuple

import jax
import jax.numpy as jnp
from jax.experimental import pallas as pl
from jax.experimental.pallas import tpu as pltpu

EPS = 1e-5

_BUFFERED = getattr(pl, "Buffered", None)   # single-buffer support for constant blocks
_CONST_SINGLE_BUFFER_OK = None              # decided on first call (fallback if unsupported)
_VMEM_LIMIT = None


def _round_up(a, b):
    return (a + b - 1) // b * b


def _vmem_limit_bytes():
    """~3/4 of physical VMEM: ~96 MiB on v5e/v6e, ~48 MiB on v7x."""
    global _VMEM_LIMIT
    if _VMEM_LIMIT is None:
        try:
            cap = int(pltpu.get_tpu_info().vmem_capacity_bytes)
        except Exception:
            cap = 64 * 1024 * 1024
        _VMEM_LIMIT = min(cap * 3 // 4, 100 * 1024 * 1024)
    return _VMEM_LIMIT


def _choose_tile_m(n_tokens, tile_m):
    """Token-tile height: multiple of 16 (bf16 packing); >=2 tiles when possible (v7x 2 TCs)."""
    tm = min(tile_m, _round_up(n_tokens, 16))
    if _round_up(n_tokens, tm) // tm < 2 and tm > 16:
        tm = _round_up((tm + 1) // 2, 16)
    return tm


class PreparedParams(NamedTuple):
    gamma: jax.Array   # [1, S] f32
    ws: jax.Array      # [S, C] bf16
    bs: jax.Array      # [1, C] f32
    wb: jax.Array      # [S, C] bf16
    w1a: jax.Array     # [C, I_pad] bf16
    w1b: jax.Array     # [C, I_pad] bf16
    w2: jax.Array      # [I_pad, C] bf16
    wz: jax.Array      # [S, C] bf16
    bz: jax.Array      # [1, C] f32
    num_k: int         # number of I-chunks (1 => fully resident weights)


def prepare_transition_params(params, *, tile_i=512,
                              resident_budget_bytes=24 * 1024 * 1024):
    """One-time, host-side weight prep (split / cast / pad).  Do NOT call per-forward."""
    C = params["w1"].shape[0]
    num_inter = params["w2"].shape[0]
    S = params["w_scale"].shape[0]

    gamma = jnp.asarray(params["gamma_sc"], jnp.float32).reshape(1, S)
    ws = jnp.asarray(params["w_scale"], jnp.bfloat16)
    bs = jnp.asarray(params["b_scale"], jnp.float32).reshape(1, C)
    wb = jnp.asarray(params["w_bias"], jnp.bfloat16)
    wz = jnp.asarray(params["w_zero"], jnp.bfloat16)
    bz = jnp.asarray(params["b_zero"], jnp.float32).reshape(1, C)

    w1 = jnp.asarray(params["w1"], jnp.bfloat16)
    w1a = w1[:, :num_inter]                    # [C, I]
    w1b = w1[:, num_inter:]                    # [C, I]
    w2 = jnp.asarray(params["w2"], jnp.bfloat16)  # [I, C]

    weight_bytes = 6 * C * num_inter           # w1a + w1b + w2 in bf16
    if num_inter <= tile_i or weight_bytes <= resident_budget_bytes:
        num_k = 1                              # fully VMEM-resident weights
    else:
        ti = max(128, _round_up(min(tile_i, num_inter), 128))
        i_pad = _round_up(num_inter, ti)
        if i_pad != num_inter:
            # Zero-padded I columns/rows provably contribute 0 to the output.
            w1a = jnp.pad(w1a, ((0, 0), (0, i_pad - num_inter)))
            w1b = jnp.pad(w1b, ((0, 0), (0, i_pad - num_inter)))
            w2 = jnp.pad(w2, ((0, i_pad - num_inter), (0, 0)))
        num_k = i_pad // ti

    return PreparedParams(gamma, ws, bs, wb, w1a, w1b, w2, wz, bz, num_k)


# --------------------------------------------------------------------------- #
# Kernels
# --------------------------------------------------------------------------- #
def _transition_kernel_resident(
    x_ref, sc_ref,                        # per-token-tile inputs
    gamma_ref, ws_ref, bs_ref, wb_ref,    # adaptive layernorm params
    w1a_ref, w1b_ref, w2_ref,             # ffw weights (fully resident)
    wz_ref, bz_ref,                       # adaptive zero-init params
    o_ref,                                # output tile
):
    """Single-pass kernel: all weights resident, no scratch, no accumulator."""
    x = x_ref[...].astype(jnp.float32)
    sc = sc_ref[...].astype(jnp.float32)

    # LayerNorm(x): create_scale=False, create_offset=False, exact variance
    mu = jnp.mean(x, axis=-1, keepdims=True)
    xc = x - mu
    var = jnp.mean(xc * xc, axis=-1, keepdims=True)
    xn = xc * jax.lax.rsqrt(var + EPS)

    # LayerNorm(single_cond): create_scale=True, create_offset=False
    mu_s = jnp.mean(sc, axis=-1, keepdims=True)
    scc = sc - mu_s
    var_s = jnp.mean(scc * scc, axis=-1, keepdims=True)
    scn = scc * jax.lax.rsqrt(var_s + EPS) * gamma_ref[...]
    scn_b = scn.astype(jnp.bfloat16)

    scale = jnp.dot(scn_b, ws_ref[...], preferred_element_type=jnp.float32) + bs_ref[...]
    bias = jnp.dot(scn_b, wb_ref[...], preferred_element_type=jnp.float32)
    xa = (jax.nn.sigmoid(scale) * xn + bias).astype(jnp.bfloat16)

    # Zero-init gate uses RAW single_cond; computed up-front (off the MXU tail).
    cond = jnp.dot(sc.astype(jnp.bfloat16), wz_ref[...],
                   preferred_element_type=jnp.float32) + bz_ref[...]
    gate = jax.nn.sigmoid(cond)

    # GLU + transition2, all in one pass.
    a = jnp.dot(xa, w1a_ref[...], preferred_element_type=jnp.float32)
    b = jnp.dot(xa, w1b_ref[...], preferred_element_type=jnp.float32)
    c = (jax.nn.silu(a) * b).astype(jnp.bfloat16)
    out = jnp.dot(c, w2_ref[...], preferred_element_type=jnp.float32)

    o_ref[...] = (gate * out).astype(o_ref.dtype)


def _transition_kernel_chunked(
    x_ref, sc_ref,
    gamma_ref, ws_ref, bs_ref, wb_ref,
    w1a_ref, w1b_ref, w2_ref,             # per-I-chunk ffw weights
    wz_ref, bz_ref,
    o_ref,
    xa_ref, gate_ref, acc_ref,            # scratch: bf16 x', f32 gate, f32 accumulator
):
    """Large-I fallback: stream w1/w2 in chunks over an 'arbitrary' k axis."""
    k = pl.program_id(1)
    num_k = pl.num_programs(1)

    # --- once per token tile: layernorms, adaptive scale/bias, zero-gate -----
    @pl.when(k == 0)
    def _():
        x = x_ref[...].astype(jnp.float32)
        sc = sc_ref[...].astype(jnp.float32)

        mu = jnp.mean(x, axis=-1, keepdims=True)
        xc = x - mu
        var = jnp.mean(xc * xc, axis=-1, keepdims=True)
        xn = xc * jax.lax.rsqrt(var + EPS)

        mu_s = jnp.mean(sc, axis=-1, keepdims=True)
        scc = sc - mu_s
        var_s = jnp.mean(scc * scc, axis=-1, keepdims=True)
        scn = scc * jax.lax.rsqrt(var_s + EPS) * gamma_ref[...]
        scn_b = scn.astype(jnp.bfloat16)

        scale = jnp.dot(scn_b, ws_ref[...], preferred_element_type=jnp.float32) + bs_ref[...]
        bias = jnp.dot(scn_b, wb_ref[...], preferred_element_type=jnp.float32)
        xa_ref[...] = (jax.nn.sigmoid(scale) * xn + bias).astype(jnp.bfloat16)

        # Zero-init gate hoisted off the pipeline tail and cached.
        cond = jnp.dot(sc.astype(jnp.bfloat16), wz_ref[...],
                       preferred_element_type=jnp.float32) + bz_ref[...]
        gate_ref[...] = jax.nn.sigmoid(cond)
        acc_ref[...] = jnp.zeros_like(acc_ref)

    # --- every I-chunk: GLU + transition2 partial product ---------------------
    xa_b = xa_ref[...]
    a = jnp.dot(xa_b, w1a_ref[...], preferred_element_type=jnp.float32)
    b = jnp.dot(xa_b, w1b_ref[...], preferred_element_type=jnp.float32)
    c = (jax.nn.silu(a) * b).astype(jnp.bfloat16)
    partial = jnp.dot(c, w2_ref[...], preferred_element_type=jnp.float32)

    @pl.when(k < num_k - 1)
    def _():
        acc_ref[...] += partial

    # --- last chunk: fuse final accumulate into the gated output store -------
    @pl.when(k == num_k - 1)
    def _():
        o_ref[...] = (gate_ref[...] * (acc_ref[...] + partial)).astype(o_ref.dtype)


# --------------------------------------------------------------------------- #
# Wrapper
# --------------------------------------------------------------------------- #
@functools.partial(jax.jit, static_argnames=("tile_m", "num_k", "single_buffer_consts"))
def _transition_block_impl(x, single_cond, gamma, ws, bs, wb, w1a, w1b, w2, wz, bz,
                           *, tile_m, num_k, single_buffer_consts):
    orig_shape = x.shape
    C = x.shape[-1]
    S = single_cond.shape[-1]
    x2 = x.reshape(-1, C)
    sc2 = single_cond.reshape(-1, S)
    N = x2.shape[0]

    tm = _choose_tile_m(N, tile_m)
    n_pad = _round_up(N, tm)
    if n_pad != N:
        # Zero-padded token rows produce exactly-zero outputs (eps keeps rsqrt finite).
        x2 = jnp.pad(x2, ((0, n_pad - N), (0, 0)))
        sc2 = jnp.pad(sc2, ((0, n_pad - N), (0, 0)))
    num_m = n_pad // tm

    i_pad = w1a.shape[1]
    ti = i_pad // num_k

    def const(shape):
        # Grid-constant block: single-buffer it when supported (frees VMEM, esp. v7x).
        if single_buffer_consts and _BUFFERED is not None:
            return pl.BlockSpec(shape, lambda *_: (0, 0), pipeline_mode=_BUFFERED(1))
        return pl.BlockSpec(shape, lambda *_: (0, 0))

    if num_k == 1:
        grid = (num_m,)
        in_specs = [
            pl.BlockSpec((tm, C), lambda i: (i, 0)),   # x tile
            pl.BlockSpec((tm, S), lambda i: (i, 0)),   # single_cond tile
            const((1, S)),                             # gamma_sc
            const((S, C)),                             # w_scale (bf16)
            const((1, C)),                             # b_scale
            const((S, C)),                             # w_bias (bf16)
            const((C, ti)),                            # w1a (resident, bf16)
            const((C, ti)),                            # w1b (resident, bf16)
            const((ti, C)),                            # w2  (resident, bf16)
            const((S, C)),                             # w_zero (bf16)
            const((1, C)),                             # b_zero
        ]
        out_specs = pl.BlockSpec((tm, C), lambda i: (i, 0))
        scratch_shapes = []
        kernel = _transition_kernel_resident
        dim_sem = ("parallel",)
    else:
        grid = (num_m, num_k)
        in_specs = [
            pl.BlockSpec((tm, C), lambda i, k: (i, 0)),
            pl.BlockSpec((tm, S), lambda i, k: (i, 0)),
            const((1, S)),
            const((S, C)),
            const((1, C)),
            const((S, C)),
            pl.BlockSpec((C, ti), lambda i, k: (0, k)),   # w1a chunk
            pl.BlockSpec((C, ti), lambda i, k: (0, k)),   # w1b chunk
            pl.BlockSpec((ti, C), lambda i, k: (k, 0)),   # w2 chunk
            const((S, C)),
            const((1, C)),
        ]
        out_specs = pl.BlockSpec((tm, C), lambda i, k: (i, 0))
        scratch_shapes = [
            pltpu.VMEM((tm, C), jnp.bfloat16),   # cached x' (bf16 MXU operand)
            pltpu.VMEM((tm, C), jnp.float32),    # cached zero-init gate
            pltpu.VMEM((tm, C), jnp.float32),    # f32 partial-sum accumulator
        ]
        kernel = _transition_kernel_chunked
        dim_sem = ("parallel", "arbitrary")

    out = pl.pallas_call(
        kernel,
        out_shape=jax.ShapeDtypeStruct((n_pad, C), x.dtype),
        grid_spec=pltpu.PrefetchScalarGridSpec(
            num_scalar_prefetch=0,
            grid=grid,
            in_specs=in_specs,
            out_specs=out_specs,
            scratch_shapes=scratch_shapes,
        ),
        compiler_params=pltpu.CompilerParams(
            dimension_semantics=dim_sem,
            vmem_limit_bytes=_vmem_limit_bytes(),
        ),
    )(x2, sc2, gamma, ws, bs, wb, w1a, w1b, w2, wz, bz)

    return out[:N].reshape(orig_shape)


def transition_block(x, single_cond, prep: PreparedParams, tile_m=512):
    """x: [..., C], single_cond: [..., S] (same leading dims). Returns [..., C]."""
    global _CONST_SINGLE_BUFFER_OK
    args = (x, single_cond, prep.gamma, prep.ws, prep.bs, prep.wb,
            prep.w1a, prep.w1b, prep.w2, prep.wz, prep.bz)
    if _CONST_SINGLE_BUFFER_OK is None and _BUFFERED is not None:
        try:
            out = _transition_block_impl(*args, tile_m=tile_m, num_k=prep.num_k,
                                         single_buffer_consts=True)
            _CONST_SINGLE_BUFFER_OK = True
            return out
        except Exception:
            _CONST_SINGLE_BUFFER_OK = False   # this Pallas build rejects Buffered(1)
    elif _CONST_SINGLE_BUFFER_OK is None:
        _CONST_SINGLE_BUFFER_OK = False
    return _transition_block_impl(*args, tile_m=tile_m, num_k=prep.num_k,
                                  single_buffer_consts=_CONST_SINGLE_BUFFER_OK)


# --------------------------------------------------------------------------- #
# Test harness
# --------------------------------------------------------------------------- #
def init_params(key, num_channels, single_channels, num_intermediate_factor):
    """Deterministic synthetic parameters, shapes matching the PyTorch module."""
    num_inter = num_intermediate_factor * num_channels
    ks = jax.random.split(key, 8)
    s = 0.05
    return {
        "gamma_sc": (1.0 + s * jax.random.normal(ks[0], (1, single_channels))).astype(jnp.float32),
        "w_scale": (s * jax.random.normal(ks[1], (single_channels, num_channels))).astype(jnp.float32),
        "b_scale": (s * jax.random.normal(ks[2], (1, num_channels))).astype(jnp.float32),
        "w_bias": (s * jax.random.normal(ks[3], (single_channels, num_channels))).astype(jnp.float32),
        "w1": (s * jax.random.normal(ks[4], (num_channels, 2 * num_inter))).astype(jnp.float32),
        "w2": (s * jax.random.normal(ks[5], (num_inter, num_channels))).astype(jnp.float32),
        "w_zero": (s * jax.random.normal(ks[6], (single_channels, num_channels))).astype(jnp.float32),
        "b_zero": (s * jax.random.normal(ks[7], (1, num_channels))).astype(jnp.float32),
    }


def _reference(x, single_cond, p):
    """Pure-JAX f32 reference mirroring the PyTorch forward."""
    def ln(v, gamma=None):
        mu = jnp.mean(v, -1, keepdims=True)
        vc = v - mu
        var = jnp.mean(vc * vc, -1, keepdims=True)
        out = vc * jax.lax.rsqrt(var + EPS)
        return out * gamma if gamma is not None else out

    xn = ln(x)
    scn = ln(single_cond, p["gamma_sc"][0])
    scale = scn @ p["w_scale"] + p["b_scale"][0]
    bias = scn @ p["w_bias"]
    xa = jax.nn.sigmoid(scale) * xn + bias
    h = xa @ p["w1"]
    num_inter = p["w2"].shape[0]
    c = jax.nn.silu(h[..., :num_inter]) * h[..., num_inter:]
    out = c @ p["w2"]
    cond = single_cond @ p["w_zero"] + p["b_zero"][0]
    return jax.nn.sigmoid(cond) * out


if __name__ == "__main__":
    num_channels = 32
    single_channels = 32
    batch, seq = 2, 64

    key = jax.random.PRNGKey(0)
    kx, ks, kp1, kp2 = jax.random.split(key, 4)
    x = jax.random.normal(kx, (batch, seq, num_channels), dtype=jnp.float32)
    single_cond = jax.random.normal(ks, (batch, seq, single_channels), dtype=jnp.float32)

    # --- Test 1: resident-weight single-pass path (the common case) ----------
    params1 = init_params(kp1, num_channels, single_channels, 2)
    prep1 = prepare_transition_params(params1)            # weights prepped once
    out1 = jax.block_until_ready(transition_block(x, single_cond, prep1))
    ref1 = _reference(x, single_cond, params1)
    assert out1.shape == x.shape
    assert bool(jnp.all(jnp.isfinite(out1)))
    err1 = float(jnp.max(jnp.abs(out1 - ref1)))
    assert err1 < 2e-2, err1

    # --- Test 2: chunked (I-tiled) fallback path ------------------------------
    params2 = init_params(kp2, num_channels, single_channels, 8)   # I = 256
    prep2 = prepare_transition_params(params2, tile_i=128, resident_budget_bytes=0)
    assert prep2.num_k > 1
    out2 = jax.block_until_ready(transition_block(x, single_cond, prep2))
    ref2 = _reference(x, single_cond, params2)
    assert out2.shape == x.shape
    assert bool(jnp.all(jnp.isfinite(out2)))
    err2 = float(jnp.max(jnp.abs(out2 - ref2)))
    assert err2 < 2e-2, err2

    print("KERNEL_OK")
</pallas_src>

<mosaic_0001>
module attributes {stable_mosaic.version = 11 : i64} {
  func.func @_transition_kernel_resident(%arg0: i32, %arg1: memref<64x32xf32, #tpu.memory_space<vmem>>, %arg2: memref<64x32xf32, #tpu.memory_space<vmem>>, %arg3: memref<1x32xf32, #tpu.memory_space<vmem>>, %arg4: memref<32x32xbf16, #tpu.memory_space<vmem>>, %arg5: memref<1x32xf32, #tpu.memory_space<vmem>>, %arg6: memref<32x32xbf16, #tpu.memory_space<vmem>>, %arg7: memref<32x64xbf16, #tpu.memory_space<vmem>>, %arg8: memref<32x64xbf16, #tpu.memory_space<vmem>>, %arg9: memref<64x32xbf16, #tpu.memory_space<vmem>>, %arg10: memref<32x32xbf16, #tpu.memory_space<vmem>>, %arg11: memref<1x32xf32, #tpu.memory_space<vmem>>, %arg12: memref<64x32xf32, #tpu.memory_space<vmem>>) attributes {dimension_semantics = [#tpu.dimension_semantics<parallel>], iteration_bounds = array<i64: 2>, scalar_prefetch = 0 : i64, scratch_operands = 0 : i64, tpu.core_type = #tpu.core_type<tc>, window_params = [{transform_indices = @transform_0, window_bounds = array<i64: 64, 32>}, {transform_indices = @transform_1, window_bounds = array<i64: 64, 32>}, {pipeline_mode = #tpu.pipeline_mode<synchronous>, transform_indices = @transform_2, window_bounds = array<i64: 1, 32>}, {pipeline_mode = #tpu.pipeline_mode<synchronous>, transform_indices = @transform_3, window_bounds = array<i64: 32, 32>}, {pipeline_mode = #tpu.pipeline_mode<synchronous>, transform_indices = @transform_4, window_bounds = array<i64: 1, 32>}, {pipeline_mode = #tpu.pipeline_mode<synchronous>, transform_indices = @transform_5, window_bounds = array<i64: 32, 32>}, {pipeline_mode = #tpu.pipeline_mode<synchronous>, transform_indices = @transform_6, window_bounds = array<i64: 32, 64>}, {pipeline_mode = #tpu.pipeline_mode<synchronous>, transform_indices = @transform_7, window_bounds = array<i64: 32, 64>}, {pipeline_mode = #tpu.pipeline_mode<synchronous>, transform_indices = @transform_8, window_bounds = array<i64: 64, 32>}, {pipeline_mode = #tpu.pipeline_mode<synchronous>, transform_indices = @transform_9, window_bounds = array<i64: 32, 32>}, {pipeline_mode = #tpu.pipeline_mode<synchronous>, transform_indices = @transform_10, window_bounds = array<i64: 1, 32>}, {transform_indices = @transform_11, window_bounds = array<i64: 64, 32>}]} {
    %c0 = arith.constant 0 : index
    %c0_0 = arith.constant 0 : index
    %0 = vector.load %arg1[%c0, %c0_0] : memref<64x32xf32, #tpu.memory_space<vmem>>, vector<64x32xf32>
    %c0_1 = arith.constant 0 : index
    %c0_2 = arith.constant 0 : index
    %1 = vector.load %arg2[%c0_1, %c0_2] : memref<64x32xf32, #tpu.memory_space<vmem>>, vector<64x32xf32>
    %cst = arith.constant dense<0.000000e+00> : vector<64xf32>
    %2 = vector.multi_reduction <add>, %0, %cst [1] : vector<64x32xf32> to vector<64xf32>
    %3 = vector.shape_cast %2 : vector<64xf32> to vector<64x1xf32>
    %cst_3 = arith.constant 3.200000e+01 : f32
    %4 = vector.broadcast %cst_3 : f32 to vector<64x1xf32>
    %5 = arith.divf %3, %4 : vector<64x1xf32>
    %6 = vector.broadcast %5 : vector<64x1xf32> to vector<64x32xf32>
    %7 = arith.subf %0, %6 : vector<64x32xf32>
    %8 = arith.mulf %7, %7 : vector<64x32xf32>
    %cst_4 = arith.constant dense<0.000000e+00> : vector<64xf32>
    %9 = vector.multi_reduction <add>, %8, %cst_4 [1] : vector<64x32xf32> to vector<64xf32>
    %10 = vector.shape_cast %9 : vector<64xf32> to vector<64x1xf32>
    %cst_5 = arith.constant 3.200000e+01 : f32
    %11 = vector.broadcast %cst_5 : f32 to vector<64x1xf32>
    %12 = arith.divf %10, %11 : vector<64x1xf32>
    %cst_6 = arith.constant 9.99999974E-6 : f32
    %13 = vector.broadcast %cst_6 : f32 to vector<64x1xf32>
    %14 = arith.addf %12, %13 : vector<64x1xf32>
    %15 = math.rsqrt %14 : vector<64x1xf32>
    %16 = vector.broadcast %15 : vector<64x1xf32> to vector<64x32xf32>
    %17 = arith.mulf %7, %16 : vector<64x32xf32>
    %cst_7 = arith.constant dense<0.000000e+00> : vector<64xf32>
    %18 = vector.multi_reduction <add>, %1, %cst_7 [1] : vector<64x32xf32> to vector<64xf32>
    %19 = vector.shape_cast %18 : vector<64xf32> to vector<64x1xf32>
    %cst_8 = arith.constant 3.200000e+01 : f32
    %20 = vector.broadcast %cst_8 : f32 to vector<64x1xf32>
    %21 = arith.divf %19, %20 : vector<64x1xf32>
    %22 = vector.broadcast %21 : vector<64x1xf32> to vector<64x32xf32>
    %23 = arith.subf %1, %22 : vector<64x32xf32>
    %24 = arith.mulf %23, %23 : vector<64x32xf32>
    %cst_9 = arith.constant dense<0.000000e+00> : vector<64xf32>
    %25 = vector.multi_reduction <add>, %24, %cst_9 [1] : vector<64x32xf32> to vector<64xf32>
    %26 = vector.shape_cast %25 : vector<64xf32> to vector<64x1xf32>
    %cst_10 = arith.constant 3.200000e+01 : f32
    %27 = vector.broadcast %cst_10 : f32 to vector<64x1xf32>
    %28 = arith.divf %26, %27 : vector<64x1xf32>
    %cst_11 = arith.constant 9.99999974E-6 : f32
    %29 = vector.broadcast %cst_11 : f32 to vector<64x1xf32>
    %30 = arith.addf %28, %29 : vector<64x1xf32>
    %31 = math.rsqrt %30 : vector<64x1xf32>
    %32 = vector.broadcast %31 : vector<64x1xf32> to vector<64x32xf32>
    %33 = arith.mulf %23, %32 : vector<64x32xf32>
    %c0_12 = arith.constant 0 : index
    %c0_13 = arith.constant 0 : index
    %34 = vector.load %arg3[%c0_12, %c0_13] : memref<1x32xf32, #tpu.memory_space<vmem>>, vector<1x32xf32>
    %35 = vector.broadcast %34 : vector<1x32xf32> to vector<64x32xf32>
    %36 = arith.mulf %33, %35 : vector<64x32xf32>
    %37 = arith.truncf %36 : vector<64x32xf32> to vector<64x32xbf16>
    %c0_14 = arith.constant 0 : index
    %c0_15 = arith.constant 0 : index
    %38 = vector.load %arg4[%c0_14, %c0_15] : memref<32x32xbf16, #tpu.memory_space<vmem>>, vector<32x32xbf16>
    %cst_16 = arith.constant dense<0.000000e+00> : vector<64x32xf32>
    %39 = tpu.matmul %37, %38, %cst_16 {dimension_numbers = #tpu.dot_dimension_numbers<[1], [0], [0], [1], [0, 0, 1, 1], [], []>} : vector<64x32xbf16>, vector<32x32xbf16>, vector<64x32xf32> -> vector<64x32xf32>
    %c0_17 = arith.constant 0 : index
    %c0_18 = arith.constant 0 : index
    %40 = vector.load %arg5[%c0_17, %c0_18] : memref<1x32xf32, #tpu.memory_space<vmem>>, vector<1x32xf32>
    %41 = vector.broadcast %40 : vector<1x32xf32> to vector<64x32xf32>
    %42 = arith.addf %39, %41 : vector<64x32xf32>
    %c0_19 = arith.constant 0 : index
    %c0_20 = arith.constant 0 : index
    %43 = vector.load %arg6[%c0_19, %c0_20] : memref<32x32xbf16, #tpu.memory_space<vmem>>, vector<32x32xbf16>
    %cst_21 = arith.constant dense<0.000000e+00> : vector<64x32xf32>
    %44 = tpu.matmul %37, %43, %cst_21 {dimension_numbers = #tpu.dot_dimension_numbers<[1], [0], [0], [1], [0, 0, 1, 1], [], []>} : vector<64x32xbf16>, vector<32x32xbf16>, vector<64x32xf32> -> vector<64x32xf32>
    %45 = arith.negf %42 : vector<64x32xf32>
    %46 = math.exp %45 : vector<64x32xf32>
    %cst_22 = arith.constant 1.000000e+00 : f32
    %47 = vector.broadcast %cst_22 : f32 to vector<64x32xf32>
    %48 = arith.addf %47, %46 : vector<64x32xf32>
    %49 = arith.divf %47, %48 : vector<64x32xf32>
    %50 = arith.mulf %49, %17 : vector<64x32xf32>
    %51 = arith.addf %50, %44 : vector<64x32xf32>
    %52 = arith.truncf %51 : vector<64x32xf32> to vector<64x32xbf16>
    %53 = arith.truncf %1 : vector<64x32xf32> to vector<64x32xbf16>
    %c0_23 = arith.constant 0 : index
    %c0_24 = arith.constant 0 : index
    %54 = vector.load %arg10[%c0_23, %c0_24] : memref<32x32xbf16, #tpu.memory_space<vmem>>, vector<32x32xbf16>
    %cst_25 = arith.constant dense<0.000000e+00> : vector<64x32xf32>
    %55 = tpu.matmul %53, %54, %cst_25 {dimension_numbers = #tpu.dot_dimension_numbers<[1], [0], [0], [1], [0, 0, 1, 1], [], []>} : vector<64x32xbf16>, vector<32x32xbf16>, vector<64x32xf32> -> vector<64x32xf32>
    %c0_26 = arith.constant 0 : index
    %c0_27 = arith.constant 0 : index
    %56 = vector.load %arg11[%c0_26, %c0_27] : memref<1x32xf32, #tpu.memory_space<vmem>>, vector<1x32xf32>
    %57 = vector.broadcast %56 : vector<1x32xf32> to vector<64x32xf32>
    %58 = arith.addf %55, %57 : vector<64x32xf32>
    %59 = arith.negf %58 : vector<64x32xf32>
    %60 = math.exp %59 : vector<64x32xf32>
    %cst_28 = arith.constant 1.000000e+00 : f32
    %61 = vector.broadcast %cst_28 : f32 to vector<64x32xf32>
    %62 = arith.addf %61, %60 : vector<64x32xf32>
    %63 = arith.divf %61, %62 : vector<64x32xf32>
    %c0_29 = arith.constant 0 : index
    %c0_30 = arith.constant 0 : index
    %64 = vector.load %arg7[%c0_29, %c0_30] : memref<32x64xbf16, #tpu.memory_space<vmem>>, vector<32x64xbf16>
    %cst_31 = arith.constant dense<0.000000e+00> : vector<64x64xf32>
    %65 = tpu.matmul %52, %64, %cst_31 {dimension_numbers = #tpu.dot_dimension_numbers<[1], [0], [0], [1], [0, 0, 1, 1], [], []>} : vector<64x32xbf16>, vector<32x64xbf16>, vector<64x64xf32> -> vector<64x64xf32>
    %c0_32 = arith.constant 0 : index
    %c0_33 = arith.constant 0 : index
    %66 = vector.load %arg8[%c0_32, %c0_33] : memref<32x64xbf16, #tpu.memory_space<vmem>>, vector<32x64xbf16>
    %cst_34 = arith.constant dense<0.000000e+00> : vector<64x64xf32>
    %67 = tpu.matmul %52, %66, %cst_34 {dimension_numbers = #tpu.dot_dimension_numbers<[1], [0], [0], [1], [0, 0, 1, 1], [], []>} : vector<64x32xbf16>, vector<32x64xbf16>, vector<64x64xf32> -> vector<64x64xf32>
    %68 = arith.negf %65 : vector<64x64xf32>
    %69 = math.exp %68 : vector<64x64xf32>
    %cst_35 = arith.constant 1.000000e+00 : f32
    %70 = vector.broadcast %cst_35 : f32 to vector<64x64xf32>
    %71 = arith.addf %70, %69 : vector<64x64xf32>
    %72 = arith.divf %70, %71 : vector<64x64xf32>
    %73 = arith.mulf %65, %72 : vector<64x64xf32>
    %74 = arith.mulf %73, %67 : vector<64x64xf32>
    %75 = arith.truncf %74 : vector<64x64xf32> to vector<64x64xbf16>
    %c0_36 = arith.constant 0 : index
    %c0_37 = arith.constant 0 : index
    %76 = vector.load %arg9[%c0_36, %c0_37] : memref<64x32xbf16, #tpu.memory_space<vmem>>, vector<64x32xbf16>
    %cst_38 = arith.constant dense<0.000000e+00> : vector<64x32xf32>
    %77 = tpu.matmul %75, %76, %cst_38 {dimension_numbers = #tpu.dot_dimension_numbers<[1], [0], [0], [1], [0, 0, 1, 1], [], []>} : vector<64x64xbf16>, vector<64x32xbf16>, vector<64x32xf32> -> vector<64x32xf32>
    %78 = arith.mulf %63, %77 : vector<64x32xf32>
    %c0_39 = arith.constant 0 : index
    %c0_40 = arith.constant 0 : index
    %79 = vector.load %arg12[%c0_39, %c0_40] : memref<64x32xf32, #tpu.memory_space<vmem>>, vector<64x32xf32>
    tpu.vector_store %arg12[%c0_39, %c0_40], %78 {strides = array<i32>} : memref<64x32xf32, #tpu.memory_space<vmem>>, vector<64x32xf32>,
    return
  }
  func.func @transform_0(%arg0: i32) -> (i32, i32) {
    %c0_i32 = arith.constant 0 : i32
    %c0_i32_0 = arith.constant 0 : i32
    return %arg0, %c0_i32 : i32, i32
  }
  func.func @transform_1(%arg0: i32) -> (i32, i32) {
    %c0_i32 = arith.constant 0 : i32
    %c0_i32_0 = arith.constant 0 : i32
    return %arg0, %c0_i32 : i32, i32
  }
  func.func @transform_2(%arg0: i32) -> (i32, i32) {
    %c0_i32 = arith.constant 0 : i32
    %c0_i32_0 = arith.constant 0 : i32
    %c0_i32_1 = arith.constant 0 : i32
    return %c0_i32, %c0_i32_0 : i32, i32
  }
  func.func @transform_3(%arg0: i32) -> (i32, i32) {
    %c0_i32 = arith.constant 0 : i32
    %c0_i32_0 = arith.constant 0 : i32
    %c0_i32_1 = arith.constant 0 : i32
    return %c0_i32, %c0_i32_0 : i32, i32
  }
  func.func @transform_4(%arg0: i32) -> (i32, i32) {
    %c0_i32 = arith.constant 0 : i32
    %c0_i32_0 = arith.constant 0 : i32
    %c0_i32_1 = arith.constant 0 : i32
    return %c0_i32, %c0_i32_0 : i32, i32
  }
  func.func @transform_5(%arg0: i32) -> (i32, i32) {
    %c0_i32 = arith.constant 0 : i32
    %c0_i32_0 = arith.constant 0 : i32
    %c0_i32_1 = arith.constant 0 : i32
    return %c0_i32, %c0_i32_0 : i32, i32
  }
  func.func @transform_6(%arg0: i32) -> (i32, i32) {
    %c0_i32 = arith.constant 0 : i32
    %c0_i32_0 = arith.constant 0 : i32
    %c0_i32_1 = arith.constant 0 : i32
    return %c0_i32, %c0_i32_0 : i32, i32
  }
  func.func @transform_7(%arg0: i32) -> (i32, i32) {
    %c0_i32 = arith.constant 0 : i32
    %c0_i32_0 = arith.constant 0 : i32
    %c0_i32_1 = arith.constant 0 : i32
    return %c0_i32, %c0_i32_0 : i32, i32
  }
  func.func @transform_8(%arg0: i32) -> (i32, i32) {
    %c0_i32 = arith.constant 0 : i32
    %c0_i32_0 = arith.constant 0 : i32
    %c0_i32_1 = arith.constant 0 : i32
    return %c0_i32, %c0_i32_0 : i32, i32
  }
  func.func @transform_9(%arg0: i32) -> (i32, i32) {
    %c0_i32 = arith.constant 0 : i32
    %c0_i32_0 = arith.constant 0 : i32
    %c0_i32_1 = arith.constant 0 : i32
    return %c0_i32, %c0_i32_0 : i32, i32
  }
  func.func @transform_10(%arg0: i32) -> (i32, i32) {
    %c0_i32 = arith.constant 0 : i32
    %c0_i32_0 = arith.constant 0 : i32
    %c0_i32_1 = arith.constant 0 : i32
    return %c0_i32, %c0_i32_0 : i32, i32
  }
  func.func @transform_11(%arg0: i32) -> (i32, i32) {
    %c0_i32 = arith.constant 0 : i32
    %c0_i32_0 = arith.constant 0 : i32
    return %arg0, %c0_i32 : i32, i32
  }
}

module attributes {stable_mosaic.version = 11 : i64} {
  func.func @_transition_kernel_resident(%arg0: i32, %arg1: memref<64x32xf32, #tpu.memory_space<vmem>>, %arg2: memref<64x32xf32, #tpu.memory_space<vmem>>, %arg3: memref<1x32xf32, #tpu.memory_space<vmem>>, %arg4: memref<32x32xbf16, #tpu.memory_space<vmem>>, %arg5: memref<1x32xf32, #tpu.memory_space<vmem>>, %arg6: memref<32x32xbf16, #tpu.memory_space<vmem>>, %arg7: memref<32x64xbf16, #tpu.memory_space<vmem>>, %arg8: memref<32x64xbf16, #tpu.memory_space<vmem>>, %arg9: memref<64x32xbf16, #tpu.memory_space<vmem>>, %arg10: memref<32x32xbf16, #tpu.memory_space<vmem>>, %arg11: memref<1x32xf32, #tpu.memory_space<vmem>>, %arg12: memref<64x32xf32, #tpu.memory_space<vmem>>) attributes {dimension_semantics = [#tpu.dimension_semantics<parallel>], iteration_bounds = array<i64: 2>, scalar_prefetch = 0 : i64, scratch_operands = 0 : i64, tpu.core_type = #tpu.core_type<tc>, window_params = [{transform_indices = @transform_0, window_bounds = array<i64: 64, 32>}, {transform_indices = @transform_1, window_bounds = array<i64: 64, 32>}, {pipeline_mode = #tpu.pipeline_mode<synchronous>, transform_indices = @transform_2, window_bounds = array<i64: 1, 32>}, {pipeline_mode = #tpu.pipeline_mode<synchronous>, transform_indices = @transform_3, window_bounds = array<i64: 32, 32>}, {pipeline_mode = #tpu.pipeline_mode<synchronous>, transform_indices = @transform_4, window_bounds = array<i64: 1, 32>}, {pipeline_mode = #tpu.pipeline_mode<synchronous>, transform_indices = @transform_5, window_bounds = array<i64: 32, 32>}, {pipeline_mode = #tpu.pipeline_mode<synchronous>, transform_indices = @transform_6, window_bounds = array<i64: 32, 64>}, {pipeline_mode = #tpu.pipeline_mode<synchronous>, transform_indices = @transform_7, window_bounds = array<i64: 32, 64>}, {pipeline_mode = #tpu.pipeline_mode<synchronous>, transform_indices = @transform_8, window_bounds = array<i64: 64, 32>}, {pipeline_mode = #tpu.pipeline_mode<synchronous>, transform_indices = @transform_9, window_bounds = array<i64: 32, 32>}, {pipeline_mode = #tpu.pipeline_mode<synchronous>, transform_indices = @transform_10, window_bounds = array<i64: 1, 32>}, {transform_indices = @transform_11, window_bounds = array<i64: 64, 32>}]} {
    %c0 = arith.constant 0 : index
    %c0_0 = arith.constant 0 : index
    %0 = vector.load %arg1[%c0, %c0_0] : memref<64x32xf32, #tpu.memory_space<vmem>>, vector<64x32xf32>
    %c0_1 = arith.constant 0 : index
    %c0_2 = arith.constant 0 : index
    %1 = vector.load %arg2[%c0_1, %c0_2] : memref<64x32xf32, #tpu.memory_space<vmem>>, vector<64x32xf32>
    %cst = arith.constant dense<0.000000e+00> : vector<64xf32>
    %2 = vector.multi_reduction <add>, %0, %cst [1] : vector<64x32xf32> to vector<64xf32>
    %3 = vector.shape_cast %2 : vector<64xf32> to vector<64x1xf32>
    %cst_3 = arith.constant 3.200000e+01 : f32
    %4 = vector.broadcast %cst_3 : f32 to vector<64x1xf32>
    %5 = arith.divf %3, %4 : vector<64x1xf32>
    %6 = vector.broadcast %5 : vector<64x1xf32> to vector<64x32xf32>
    %7 = arith.subf %0, %6 : vector<64x32xf32>
    %8 = arith.mulf %7, %7 : vector<64x32xf32>
    %cst_4 = arith.constant dense<0.000000e+00> : vector<64xf32>
    %9 = vector.multi_reduction <add>, %8, %cst_4 [1] : vector<64x32xf32> to vector<64xf32>
    %10 = vector.shape_cast %9 : vector<64xf32> to vector<64x1xf32>
    %cst_5 = arith.constant 3.200000e+01 : f32
    %11 = vector.broadcast %cst_5 : f32 to vector<64x1xf32>
    %12 = arith.divf %10, %11 : vector<64x1xf32>
    %cst_6 = arith.constant 9.99999974E-6 : f32
    %13 = vector.broadcast %cst_6 : f32 to vector<64x1xf32>
    %14 = arith.addf %12, %13 : vector<64x1xf32>
    %15 = math.rsqrt %14 : vector<64x1xf32>
    %16 = vector.broadcast %15 : vector<64x1xf32> to vector<64x32xf32>
    %17 = arith.mulf %7, %16 : vector<64x32xf32>
    %cst_7 = arith.constant dense<0.000000e+00> : vector<64xf32>
    %18 = vector.multi_reduction <add>, %1, %cst_7 [1] : vector<64x32xf32> to vector<64xf32>
    %19 = vector.shape_cast %18 : vector<64xf32> to vector<64x1xf32>
    %cst_8 = arith.constant 3.200000e+01 : f32
    %20 = vector.broadcast %cst_8 : f32 to vector<64x1xf32>
    %21 = arith.divf %19, %20 : vector<64x1xf32>
    %22 = vector.broadcast %21 : vector<64x1xf32> to vector<64x32xf32>
    %23 = arith.subf %1, %22 : vector<64x32xf32>
    %24 = arith.mulf %23, %23 : vector<64x32xf32>
    %cst_9 = arith.constant dense<0.000000e+00> : vector<64xf32>
    %25 = vector.multi_reduction <add>, %24, %cst_9 [1] : vector<64x32xf32> to vector<64xf32>
    %26 = vector.shape_cast %25 : vector<64xf32> to vector<64x1xf32>
    %cst_10 = arith.constant 3.200000e+01 : f32
    %27 = vector.broadcast %cst_10 : f32 to vector<64x1xf32>
    %28 = arith.divf %26, %27 : vector<64x1xf32>
    %cst_11 = arith.constant 9.99999974E-6 : f32
    %29 = vector.broadcast %cst_11 : f32 to vector<64x1xf32>
    %30 = arith.addf %28, %29 : vector<64x1xf32>
    %31 = math.rsqrt %30 : vector<64x1xf32>
    %32 = vector.broadcast %31 : vector<64x1xf32> to vector<64x32xf32>
    %33 = arith.mulf %23, %32 : vector<64x32xf32>
    %c0_12 = arith.constant 0 : index
    %c0_13 = arith.constant 0 : index
    %34 = vector.load %arg3[%c0_12, %c0_13] : memref<1x32xf32, #tpu.memory_space<vmem>>, vector<1x32xf32>
    %35 = vector.broadcast %34 : vector<1x32xf32> to vector<64x32xf32>
    %36 = arith.mulf %33, %35 : vector<64x32xf32>
    %37 = arith.truncf %36 : vector<64x32xf32> to vector<64x32xbf16>
    %c0_14 = arith.constant 0 : index
    %c0_15 = arith.constant 0 : index
    %38 = vector.load %arg4[%c0_14, %c0_15] : memref<32x32xbf16, #tpu.memory_space<vmem>>, vector<32x32xbf16>
    %cst_16 = arith.constant dense<0.000000e+00> : vector<64x32xf32>
    %39 = tpu.matmul %37, %38, %cst_16 {dimension_numbers = #tpu.dot_dimension_numbers<[1], [0], [0], [1], [0, 0, 1, 1], [], []>} : vector<64x32xbf16>, vector<32x32xbf16>, vector<64x32xf32> -> vector<64x32xf32>
    %c0_17 = arith.constant 0 : index
    %c0_18 = arith.constant 0 : index
    %40 = vector.load %arg5[%c0_17, %c0_18] : memref<1x32xf32, #tpu.memory_space<vmem>>, vector<1x32xf32>
    %41 = vector.broadcast %40 : vector<1x32xf32> to vector<64x32xf32>
    %42 = arith.addf %39, %41 : vector<64x32xf32>
    %c0_19 = arith.constant 0 : index
    %c0_20 = arith.constant 0 : index
    %43 = vector.load %arg6[%c0_19, %c0_20] : memref<32x32xbf16, #tpu.memory_space<vmem>>, vector<32x32xbf16>
    %cst_21 = arith.constant dense<0.000000e+00> : vector<64x32xf32>
    %44 = tpu.matmul %37, %43, %cst_21 {dimension_numbers = #tpu.dot_dimension_numbers<[1], [0], [0], [1], [0, 0, 1, 1], [], []>} : vector<64x32xbf16>, vector<32x32xbf16>, vector<64x32xf32> -> vector<64x32xf32>
    %45 = arith.negf %42 : vector<64x32xf32>
    %46 = math.exp %45 : vector<64x32xf32>
    %cst_22 = arith.constant 1.000000e+00 : f32
    %47 = vector.broadcast %cst_22 : f32 to vector<64x32xf32>
    %48 = arith.addf %47, %46 : vector<64x32xf32>
    %49 = arith.divf %47, %48 : vector<64x32xf32>
    %50 = arith.mulf %49, %17 : vector<64x32xf32>
    %51 = arith.addf %50, %44 : vector<64x32xf32>
    %52 = arith.truncf %51 : vector<64x32xf32> to vector<64x32xbf16>
    %53 = arith.truncf %1 : vector<64x32xf32> to vector<64x32xbf16>
    %c0_23 = arith.constant 0 : index
    %c0_24 = arith.constant 0 : index
    %54 = vector.load %arg10[%c0_23, %c0_24] : memref<32x32xbf16, #tpu.memory_space<vmem>>, vector<32x32xbf16>
    %cst_25 = arith.constant dense<0.000000e+00> : vector<64x32xf32>
    %55 = tpu.matmul %53, %54, %cst_25 {dimension_numbers = #tpu.dot_dimension_numbers<[1], [0], [0], [1], [0, 0, 1, 1], [], []>} : vector<64x32xbf16>, vector<32x32xbf16>, vector<64x32xf32> -> vector<64x32xf32>
    %c0_26 = arith.constant 0 : index
    %c0_27 = arith.constant 0 : index
    %56 = vector.load %arg11[%c0_26, %c0_27] : memref<1x32xf32, #tpu.memory_space<vmem>>, vector<1x32xf32>
    %57 = vector.broadcast %56 : vector<1x32xf32> to vector<64x32xf32>
    %58 = arith.addf %55, %57 : vector<64x32xf32>
    %59 = arith.negf %58 : vector<64x32xf32>
    %60 = math.exp %59 : vector<64x32xf32>
    %cst_28 = arith.constant 1.000000e+00 : f32
    %61 = vector.broadcast %cst_28 : f32 to vector<64x32xf32>
    %62 = arith.addf %61, %60 : vector<64x32xf32>
    %63 = arith.divf %61, %62 : vector<64x32xf32>
    %c0_29 = arith.constant 0 : index
    %c0_30 = arith.constant 0 : index
    %64 = vector.load %arg7[%c0_29, %c0_30] : memref<32x64xbf16, #tpu.memory_space<vmem>>, vector<32x64xbf16>
    %cst_31 = arith.constant dense<0.000000e+00> : vector<64x64xf32>
    %65 = tpu.matmul %52, %64, %cst_31 {dimension_numbers = #tpu.dot_dimension_numbers<[1], [0], [0], [1], [0, 0, 1, 1], [], []>} : vector<64x32xbf16>, vector<32x64xbf16>, vector<64x64xf32> -> vector<64x64xf32>
    %c0_32 = arith.constant 0 : index
    %c0_33 = arith.constant 0 : index
    %66 = vector.load %arg8[%c0_32, %c0_33] : memref<32x64xbf16, #tpu.memory_space<vmem>>, vector<32x64xbf16>
    %cst_34 = arith.constant dense<0.000000e+00> : vector<64x64xf32>
    %67 = tpu.matmul %52, %66, %cst_34 {dimension_numbers = #tpu.dot_dimension_numbers<[1], [0], [0], [1], [0, 0, 1, 1], [], []>} : vector<64x32xbf16>, vector<32x64xbf16>, vector<64x64xf32> -> vector<64x64xf32>
    %68 = arith.negf %65 : vector<64x64xf32>
    %69 = math.exp %68 : vector<64x64xf32>
    %cst_35 = arith.constant 1.000000e+00 : f32
    %70 = vector.broadcast %cst_35 : f32 to vector<64x64xf32>
    %71 = arith.addf %70, %69 : vector<64x64xf32>
    %72 = arith.divf %70, %71 : vector<64x64xf32>
    %73 = arith.mulf %65, %72 : vector<64x64xf32>
    %74 = arith.mulf %73, %67 : vector<64x64xf32>
    %75 = arith.truncf %74 : vector<64x64xf32> to vector<64x64xbf16>
    %c0_36 = arith.constant 0 : index
    %c0_37 = arith.constant 0 : index
    %76 = vector.load %arg9[%c0_36, %c0_37] : memref<64x32xbf16, #tpu.memory_space<vmem>>, vector<64x32xbf16>
    %cst_38 = arith.constant dense<0.000000e+00> : vector<64x32xf32>
    %77 = tpu.matmul %75, %76, %cst_38 {dimension_numbers = #tpu.dot_dimension_numbers<[1], [0], [0], [1], [0, 0, 1, 1], [], []>} : vector<64x64xbf16>, vector<64x32xbf16>, vector<64x32xf32> -> vector<64x32xf32>
    %78 = arith.mulf %63, %77 : vector<64x32xf32>
    %c0_39 = arith.constant 0 : index
    %c0_40 = arith.constant 0 : index
    %79 = vector.load %arg12[%c0_39, %c0_40] : memref<64x32xf32, #tpu.memory_space<vmem>>, vector<64x32xf32>
    tpu.vector_store %arg12[%c0_39, %c0_40], %78 {strides = array<i32>} : memref<64x32xf32, #tpu.memory_space<vmem>>, vector<64x32xf32>,
    return
  }
  func.func @transform_0(%arg0: i32) -> (i32, i32) {
    %c0_i32 = arith.constant 0 : i32
    %c0_i32_0 = arith.constant 0 : i32
    return %arg0, %c0_i32 : i32, i32
  }
  func.func @transform_1(%arg0: i32) -> (i32, i32) {
    %c0_i32 = arith.constant 0 : i32
    %c0_i32_0 = arith.constant 0 : i32
    return %arg0, %c0_i32 : i32, i32
  }
  func.func @transform_2(%arg0: i32) -> (i32, i32) {
    %c0_i32 = arith.constant 0 : i32
    %c0_i32_0 = arith.constant 0 : i32
    %c0_i32_1 = arith.constant 0 : i32
    return %c0_i32, %c0_i32_0 : i32, i32
  }
  func.func @transform_3(%arg0: i32) -> (i32, i32) {
    %c0_i32 = arith.constant 0 : i32
    %c0_i32_0 = arith.constant 0 : i32
    %c0_i32_1 = arith.constant 0 : i32
    return %c0_i32, %c0_i32_0 : i32, i32
  }
  func.func @transform_4(%arg0: i32) -> (i32, i32) {
    %c0_i32 = arith.constant 0 : i32
    %c0_i32_0 = arith.constant 0 : i32
    %c0_i32_1 = arith.constant 0 : i32
    return %c0_i32, %c0_i32_0 : i32, i32
  }
  func.func @transform_5(%arg0: i32) -> (i32, i32) {
    %c0_i32 = arith.constant 0 : i32
    %c0_i32_0 = arith.constant 0 : i32
    %c0_i32_1 = arith.constant 0 : i32
    return %c0_i32, %c0_i32_0 : i32, i32
  }
  func.func @transform_6(%arg0: i32) -> (i32, i32) {
    %c0_i32 = arith.constant 0 : i32
    %c0_i32_0 = arith.constant 0 : i32
    %c0_i32_1 = arith.constant 0 : i32
    return %c0_i32, %c0_i32_0 : i32, i32
  }
  func.func @transform_7(%arg0: i32) -> (i32, i32) {
    %c0_i32 = arith.constant 0 : i32
    %c0_i32_0 = arith.constant 0 : i32
    %c0_i32_1 = arith.constant 0 : i32
    return %c0_i32, %c0_i32_0 : i32, i32
  }
  func.func @transform_8(%arg0: i32) -> (i32, i32) {
    %c0_i32 = arith.constant 0 : i32
    %c0_i32_0 = arith.constant 0 : i32
    %c0_i32_1 = arith.constant 0 : i32
    return %c0_i32, %c0_i32_0 : i32, i32
  }
  func.func @transform_9(%arg0: i32) -> (i32, i32) {
    %c0_i32 = arith.constant 0 : i32
    %c0_i32_0 = arith.constant 0 : i32
    %c0_i32_1 = arith.constant 0 : i32
    return %c0_i32, %c0_i32_0 : i32, i32
  }
  func.func @transform_10(%arg0: i32) -> (i32, i32) {
    %c0_i32 = arith.constant 0 : i32
    %c0_i32_0 = arith.constant 0 : i32
    %c0_i32_1 = arith.constant 0 : i32
    return %c0_i32, %c0_i32_0 : i32, i32
  }
  func.func @transform_11(%arg0: i32) -> (i32, i32) {
    %c0_i32 = arith.constant 0 : i32
    %c0_i32_0 = arith.constant 0 : i32
    return %arg0, %c0_i32 : i32, i32
  }
}

</mosaic_0001>

<bundles_post_ra>
// kernel: _transition_block_impl.1
= control target key start
LH: loop header
LB: loop body
LE: loop exit
PB: predicated region body
PF: predicated region fallthrough
CT: control target
= control target key end

     0   :  { %s2086_s17 = smov 0   ;;  %s2805_s0 = inlined_call_operand.vmem [shape: f32[128,32], index: 0, kind: input, shape index: {}]   ;;  %s2806_s1 = inlined_call_operand.vmem [shape: f32[128,32], index: 1, kind: input, shape index: {}]   ;;  %s2807_s2 = inlined_call_operand.vmem [shape: f32[1,32], index: 2, kind: input, shape index: {}]   ;;  %s2808_s3 = inlined_call_operand.vmem [shape: bf16[32,32], index: 3, kind: input, shape index: {}]   ;;  %s2809_s4 = inlined_call_operand.vmem [shape: f32[1,32], index: 4, kind: input, shape index: {}]   ;;  %s2810_s5 = inlined_call_operand.vmem [shape: bf16[32,32], index: 5, kind: input, shape index: {}]   ;;  %s2811_s6 = inlined_call_operand.vmem [shape: bf16[32,64], index: 6, kind: input, shape index: {}]   ;;  %s2812_s7 = inlined_call_operand.vmem [shape: bf16[32,64], index: 7, kind: input, shape index: {}]   ;;  %s2813_s8 = inlined_call_operand.vmem [shape: bf16[64,32], index: 8, kind: input, shape index: {}]   ;;  %s2814_s9 = inlined_call_operand.vmem [shape: bf16[32,32], index: 9, kind: input, shape index: {}]   ;;  %s2815_s10 = inlined_call_operand.vmem [shape: f32[1,32], index: 10, kind: input, shape index: {}]   ;;  %s2816_s11 = inlined_call_operand.vmem [shape: f32[128,32], index: 11, kind: output, shape index: {}]  }
   0x1 LB: > { %s1732_s18 = sadd.s32 4294967295, %s2023_s17   ;;  %p1736_p0 = scmp.ge.s32.totalorder %s2023_s17, 1  ;;  %s2023_s17 = sphi %s2086_s17, %s21_s17  }
   0x2   : > { %p349_p1 = scmp.lt.s32.totalorder %s2023_s17, 3 }
   0x4   : > { %p350_p2 = pnand %p1736_p0, %p349_p1 }
   0x5   : > { %s1737_s19 = sshll.u32 (!%p350_p2), %s1732_s18, 3 }
   0x6   : > { %353 = sbr.rel (%p350_p2) target bundleno = 866 (0x362), region = 64  ;;  %p395_p3 = scmp.lt.s32.totalorder (!%p350_p2), %s1737_s19, 15 }
   0xb   : > { %s2848_s19 = smov (!%p395_p3, %s1737_s19), 15  ;;  %vm429_vm0 = vcmask 261120   ;;  %v2025_v16 = vmov 32.0  }
   0xc   : > { %s2094_s20 = sshll.u32 %s2848_s19, 3  ;;  %1879 = vrcp.f32 %v2025_v16 }
   0xd   : > { %s2100_s23 = scalar_lea.vmem %s2806_s1, %s2094_s20  ;;  %s2154_s26 = scalar_lea.vmem %s2805_s0, %s2094_s20 }
   0xe   : > { %v425_v0 = vld [vmem:[%s2100_s23 + $0x20] sm:$0xff]  ;;  %v423_v1 = vld [vmem:[%s2100_s23 + $0x10] sm:$0xff]  ;;  %v426_v6 = vld [vmem:[%s2100_s23 + $0x28] sm:$0xff]  ;;  %s2775_s30 = scalar_lea.vmem %s2816_s11, %s2094_s20 }
   0xf   : > { %v421_v2 = vld [vmem:[%s2100_s23] sm:$0xff]  ;;  %v625_v3 = vsel %vm429_vm0, %v425_v0, 0.0  ;;  %v619_v4 = vsel %vm429_vm0, %v423_v1, 0.0  ;;  %v424_v7 = vld [vmem:[%s2100_s23 + $0x18] sm:$0xff]  ;;  %v422_v8 = vld [vmem:[%s2100_s23 + $0x8] sm:$0xff]  ;;  %v628_v9 = vsel %vm429_vm0, %v426_v6, 0.0 }
  0x10   : > { %v613_v5 = vsel %vm429_vm0, %v421_v2, 0.0  ;;  %626 = vadd.xlane.f32.xlu2 %v625_v3  ;;  %620 = vadd.xlane.f32.xlu1 %v619_v4  ;;  %v622_v10 = vsel %vm429_vm0, %v424_v7, 0.0  ;;  %v616_v11 = vsel %vm429_vm0, %v422_v8, 0.0  ;;  %v428_v12 = vld [vmem:[%s2100_s23 + $0x38] sm:$0xff]  ;;  %v427_v13 = vld [vmem:[%s2100_s23 + $0x30] sm:$0xff]  ;;  %v2162_v55 = vld [vmem:[%s2154_s26] sm:$0xff] }
  0x11   : > { %614 = vadd.xlane.f32.xlu0 %v613_v5  ;;  %v634_v14 = vsel %vm429_vm0, %v428_v12, 0.0  ;;  %v631_v15 = vsel %vm429_vm0, %v427_v13, 0.0  ;;  %v430_v58 = vsel %vm429_vm0, %v2162_v55, 0.0  ;;  %v2190_v5 = vld [vmem:[%s2154_s26 + $0x10] sm:$0xff] }
  0x12   : > { %v1880_v17 = vpop.eup %1879 }
  0x13   : > { %v455_v18 = vmul.f32 32.0, %v1880_v17  ;;  %vm459_vm1 = vweird.f32 %v1880_v17 }
  0x15   : > { %v456_v19 = vsub.f32 1.0, %v455_v18 }
  0x17   : > { %v457_v20 = vmul.f32 %v1880_v17, %v456_v19 }
  0x18   : > { %629 = vadd.xlane.f32.xlu2 %v628_v9  ;;  %623 = vadd.xlane.f32.xlu1 %v622_v10  ;;  %v2200_v9 = vld [vmem:[%s2154_s26 + $0x28] sm:$0xff] }
  0x19   : > { %617 = vadd.xlane.f32.xlu0 %v616_v11  ;;  %v458_v21 = vadd.f32 %v1880_v17, %v457_v20  ;;  %v445_v10 = vsel %vm429_vm0, %v2200_v9, 0.0  ;;  %v2205_v11 = vld [vmem:[%s2154_s26 + $0x30] sm:$0xff]  ;;  %v1849_v20 = vld [vmem:[%s2808_s3] sm:$0xff] }
  0x1b   : > { %v2118_v22 = vsel %vm459_vm1, %v1880_v17, %v458_v21  ;;  %v1851_v21 = vld [vmem:[%s2810_s5] sm:$0xff] }
  0x20   : > { %635 = vadd.xlane.f32.xlu1 %v634_v14  ;;  %v1850_v14 = vld [vmem:[%s2808_s3 + $0x8] sm:$0xff] }
  0x21   : > { %632 = vadd.xlane.f32.xlu0 %v631_v15  ;;  %v1852_v15 = vld [vmem:[%s2810_s5 + $0x8] sm:$0xff]  ;;  %843 = vmatpush.bf16.msra.mxu0 %v1850_v14 }
  0x22   : > { %888 = vmatpush.bf16.msra.mxu1 %v1852_v15  ;;  %1863 = vmatpush.bf16.msra.mxu2 %v1850_v14 }
  0x23   : > { %1865 = vmatpush.bf16.msra.mxu3 %v1852_v15 }
  0x25   : > { %844 = vmatpush.bf16.msra.mxu0 %v1849_v20 }
  0x26   : > { %889 = vmatpush.bf16.msra.mxu1 %v1851_v21  ;;  %1864 = vmatpush.bf16.msra.mxu2 %v1849_v20 }
  0x27   : > { %1866 = vmatpush.bf16.msra.mxu3 %v1851_v21 }
  0x83   : > { %v627_v23 = vpop.xlane.xlu2 %626  ;;  %v621_v24 = vpop.xlane.xlu1 %620 }
  0x84   : > { %v639_v25 = vmul.f32 %v621_v24, %v2118_v22  ;;  %v615_v26 = vpop.xlane.xlu0 %614  ;;  %v641_v42 = vmul.f32 %v627_v23, %v2118_v22 }
  0x85   : > { %v637_v27 = vmul.f32 %v615_v26, %v2118_v22 }
  0x86   : > { %v2122_v28 = vsub.f32 %v423_v1, %v639_v25  ;;  %v2156_v49 = vsub.f32 %v425_v0, %v641_v42  ;;  %v2179_v0 = vld [vmem:[%s2154_s26 + $0x18] sm:$0xff]  ;;  %v2182_v1 = vld [vmem:[%s2154_s26 + $0x8] sm:$0xff] }
  0x87   : > { %v2124_v29 = vsub.f32 %v421_v2, %v637_v27  ;;  %v439_v2 = vsel %vm429_vm0, %v2179_v0, 0.0  ;;  %v433_v4 = vsel %vm429_vm0, %v2182_v1, 0.0 }
  0x88   : > { %v655_v30 = vmul.f32 %v2122_v28, %v2122_v28  ;;  %v657_v57 = vmul.f32 %v2156_v49, %v2156_v49 }
  0x89   : > { %v653_v31 = vmul.f32 %v2124_v29, %v2124_v29 }
  0x8a   : > { %v667_v32 = vsel %vm429_vm0, %v655_v30, 0.0  ;;  %v673_v61 = vsel %vm429_vm0, %v657_v57, 0.0 }
  0x8b   : > { %v630_v33 = vpop.xlane.xlu2 %629  ;;  %668 = vadd.xlane.f32.xlu1 %v667_v32  ;;  %v624_v34 = vpop.xlane.xlu1 %623  ;;  %v661_v35 = vsel %vm429_vm0, %v653_v31, 0.0 }
  0x8c   : > { %v642_v36 = vmul.f32 %v630_v33, %v2118_v22  ;;  %v640_v37 = vmul.f32 %v624_v34, %v2118_v22  ;;  %662 = vadd.xlane.f32.xlu2 %v661_v35  ;;  %v618_v38 = vpop.xlane.xlu0 %617 }
  0x8d   : > { %v638_v39 = vmul.f32 %v618_v38, %v2118_v22 }
  0x8e   : > { %v2135_v40 = vsub.f32 %v426_v6, %v642_v36  ;;  %v2137_v41 = vsub.f32 %v424_v7, %v640_v37  ;;  %v2193_v6 = vld [vmem:[%s2154_s26 + $0x20] sm:$0xff]  ;;  %v436_v7 = vsel %vm429_vm0, %v2190_v5, 0.0 }
  0x8f   : > { %v2140_v43 = vsub.f32 %v422_v8, %v638_v39  ;;  %v442_v8 = vsel %vm429_vm0, %v2193_v6, 0.0 }
  0x90   : > { %v658_v44 = vmul.f32 %v2135_v40, %v2135_v40  ;;  %v656_v45 = vmul.f32 %v2137_v41, %v2137_v41 }
  0x91   : > { %v654_v46 = vmul.f32 %v2140_v43, %v2140_v43 }
  0x92   : > { %v676_v47 = vsel %vm429_vm0, %v658_v44, 0.0  ;;  %v670_v48 = vsel %vm429_vm0, %v656_v45, 0.0 }
  0x93   : > { %677 = vadd.xlane.f32.xlu1 %v676_v47  ;;  %v664_v50 = vsel %vm429_vm0, %v654_v46, 0.0  ;;  %v636_v51 = vpop.xlane.xlu1 %635 }
  0x94   : > { %671 = vadd.xlane.f32.xlu2 %v670_v48  ;;  %665 = vadd.xlane.f32.xlu0 %v664_v50  ;;  %v633_v52 = vpop.xlane.xlu0 %632  ;;  %v644_v54 = vmul.f32 %v636_v51, %v2118_v22 }
  0x95   : > { %v643_v53 = vmul.f32 %v633_v52, %v2118_v22 }
  0x96   : > { %v2170_v59 = vsub.f32 %v428_v12, %v644_v54  ;;  %v448_v12 = vsel %vm429_vm0, %v2205_v11, 0.0 }
  0x97   : > { %v2164_v56 = vsub.f32 %v427_v13, %v643_v53 }
  0x98   : > { %v660_v63 = vmul.f32 %v2170_v59, %v2170_v59 }
  0x99   : > { %v659_v60 = vmul.f32 %v2164_v56, %v2164_v56 }
  0x9a   : > { %v682_v3 = vsel %vm429_vm0, %v660_v63, 0.0 }
  0x9b   : > { %v679_v62 = vsel %vm429_vm0, %v659_v60, 0.0  ;;  %431 = vadd.xlane.f32.xlu1 %v430_v58 }
  0x9c   : > { %674 = vadd.xlane.f32.xlu0 %v673_v61  ;;  %680 = vadd.xlane.f32.xlu2 %v679_v62 }
  0xa3   : > { %440 = vadd.xlane.f32.xlu1 %v439_v2 }
  0xa4   : > { %683 = vadd.xlane.f32.xlu0 %v682_v3  ;;  %434 = vadd.xlane.f32.xlu2 %v433_v4 }
  0xac   : > { %437 = vadd.xlane.f32.xlu0 %v436_v7  ;;  %443 = vadd.xlane.f32.xlu2 %v442_v8 }
  0xb4   : > { %446 = vadd.xlane.f32.xlu0 %v445_v10 }
  0xbc   : > { %449 = vadd.xlane.f32.xlu0 %v448_v12 }
  0xfe   : > { %v669_v13 = vpop.xlane.xlu1 %668 }
  0xff   : > { %v663_v16 = vpop.xlane.xlu2 %662  ;;  %v687_v18 = vmul.f32 %v669_v13, %v2118_v22 }
 0x100   : > { %v685_v17 = vmul.f32 %v663_v16, %v2118_v22 }
 0x101   : > { %v2223_v23 = vadd.f32 1e-05, %v687_v18 }
 0x102   : > { %v693_v19 = vadd.f32 1e-05, %v685_v17 }
 0x104   : > { %1881 = vrsqrt.f32 %v693_v19  ;;  %vm707_vm2 = vweird.f32 %v693_v19 }
 0x105   : > { %1883 = vrsqrt.f32 %v2223_v23 }
 0x106   : > { %v678_v24 = vpop.xlane.xlu1 %677 }
 0x107   : > { %v690_v25 = vmul.f32 %v678_v24, %v2118_v22  ;;  %v672_v26 = vpop.xlane.xlu2 %671  ;;  %v666_v27 = vpop.xlane.xlu0 %665 }
 0x108   : > { %v688_v30 = vmul.f32 %v672_v26, %v2118_v22  ;;  %v686_v31 = vmul.f32 %v666_v27, %v2118_v22 }
 0x109   : > { %v2228_v32 = vadd.f32 1e-05, %v690_v25 }
 0x10a   : > { %v2230_v33 = vpop.eup %1881  ;;  %v2233_v34 = vadd.f32 1e-05, %v688_v30  ;;  %v694_v35 = vadd.f32 1e-05, %v686_v31 }
 0x10b   : > { %v702_v36 = vmul.f32 %v2230_v33, %v693_v19  ;;  %1885 = vrsqrt.f32 %v2228_v32  ;;  %v2240_v46 = vpop.eup %1883  ;;  %vm708_vm3 = vweird.f32 %v2230_v33  ;;  %v2277_v19 = vld [vmem:[%s2154_s26 + $0x38] sm:$0xff]  ;;  %vm757_vm8 = vweird.f32 %v2228_v32 }
 0x10c   : > { %1887 = vrsqrt.f32 %v2233_v34  ;;  %v722_v2 = vmul.f32 %v2240_v46, %v2223_v23  ;;  %vm2265_vm4 = vmor %vm707_vm2, %vm708_vm3  ;;  %vm717_vm5 = vweird.f32 %v694_v35  ;;  %vm737_vm9 = vweird.f32 %v2233_v34 }
 0x10d   : > { %v703_v37 = vmul.f32 %v2230_v33, %v702_v36  ;;  %1889 = vrsqrt.f32 %v694_v35  ;;  %vm728_vm14 = vweird.f32 %v2240_v46  ;;  %vm727_vm3 = vweird.f32 %v2223_v23 }
 0x10e   : > { %v432_v38 = vpop.xlane.xlu1 %431  ;;  %v723_v20 = vmul.f32 %v2240_v46, %v722_v2 }
 0x10f   : > { %v704_v39 = vmul.f32 0.5, %v703_v37  ;;  %v681_v42 = vpop.xlane.xlu2 %680  ;;  %v675_v44 = vpop.xlane.xlu0 %674  ;;  %v461_v45 = vmul.f32 %v2118_v22, %v432_v38 }
 0x110   : > { %v691_v47 = vmul.f32 %v681_v42, %v2118_v22  ;;  %v689_v48 = vmul.f32 %v675_v44, %v2118_v22  ;;  %v724_v42 = vmul.f32 0.5, %v723_v20 }
 0x111   : > { %v2244_v50 = vpop.eup %1885  ;;  %v705_v51 = vsub.f32 1.5, %v704_v39  ;;  %v2256_v60 = vsub.f32 %v2162_v55, %v461_v45  ;;  %v2315_v45 = vld [vmem:[%s2807_s2] ss:$0 sm:$0xff] }
 0x112   : > { %v2246_v52 = vpop.eup %1887  ;;  %v752_v53 = vmul.f32 %v2244_v50, %v2228_v32  ;;  %v2250_v54 = vadd.f32 1e-05, %v691_v47  ;;  %v2253_v58 = vadd.f32 1e-05, %v689_v48  ;;  %vm758_vm10 = vweird.f32 %v2244_v50 }
 0x113   : > { %v1890_v57 = vpop.eup %1889  ;;  %v732_v62 = vmul.f32 %v2246_v52, %v2233_v34  ;;  %v706_v3 = vmul.f32 %v2230_v33, %v705_v51  ;;  %v477_v13 = vmul.f32 %v2256_v60, %v2256_v60  ;;  %vm2335_vm11 = vmor %vm757_vm8, %vm758_vm10  ;;  %vm738_vm12 = vweird.f32 %v2246_v52 }
 0x114   : > { %v753_v61 = vmul.f32 %v2244_v50, %v752_v53  ;;  %v712_v63 = vmul.f32 %v1890_v57, %v694_v35  ;;  %1891 = vrsqrt.f32 %v2250_v54  ;;  %vm718_vm6 = vweird.f32 %v1890_v57  ;;  %vm2364_vm15 = vmor %vm737_vm9, %vm738_vm12 }
 0x115   : > { %1893 = vrsqrt.f32 %v2253_v58  ;;  %v733_v15 = vmul.f32 %v2246_v52, %v732_v62  ;;  %v710_v21 = vsel %vm2265_vm4, %v2230_v33, %v706_v3  ;;  %v485_v24 = vsel %vm429_vm0, %v477_v13, 0.0  ;;  %vm2296_vm7 = vmor %vm717_vm5, %vm718_vm6 }
 0x116   : > { %v754_v55 = vmul.f32 0.5, %v753_v61  ;;  %v713_v7 = vmul.f32 %v1890_v57, %v712_v63  ;;  %v441_v8 = vpop.xlane.xlu1 %440  ;;  %486 = vadd.xlane.f32.xlu1 %v485_v24  ;;  %v781_v44 = vmul.f32 %v710_v21, %v2124_v29  ;;  %vm747_vm1 = vweird.f32 %v2253_v58  ;;  %vm2382_vm4 = vmor %vm727_vm3, %vm728_vm14 }
 0x117   : > { %v684_v10 = vpop.xlane.xlu0 %683  ;;  %v435_v12 = vpop.xlane.xlu2 %434  ;;  %v464_v14 = vmul.f32 %v2118_v22, %v441_v8 }
 0x118   : > { %v714_v16 = vmul.f32 0.5, %v713_v7  ;;  %v692_v17 = vmul.f32 %v684_v10, %v2118_v22  ;;  %v462_v18 = vmul.f32 %v2118_v22, %v435_v12  ;;  %v755_v26 = vsub.f32 1.5, %v754_v55 }
 0x119   : > { %v2285_v25 = vsub.f32 %v2179_v0, %v464_v14  ;;  %v451_v0 = vsel %vm429_vm0, %v2277_v19, 0.0  ;;  %v725_v7 = vsub.f32 1.5, %v724_v42 }
 0x11a   : > { %v715_v27 = vsub.f32 1.5, %v714_v16  ;;  %v2287_v30 = vadd.f32 1e-05, %v692_v17  ;;  %v2290_v31 = vsub.f32 %v2182_v1, %v462_v18  ;;  %v2292_v36 = vpop.eup %1891  ;;  %v734_v1 = vmul.f32 0.5, %v733_v15 }
 0x11b   : > { %v480_v33 = vmul.f32 %v2285_v25, %v2285_v25  ;;  %v2304_v38 = vpop.eup %1893  ;;  %v756_v47 = vmul.f32 %v2244_v50, %v755_v26  ;;  %v762_v53 = vmul.f32 %v2292_v36, %v2250_v54  ;;  %v726_v20 = vmul.f32 %v2240_v46, %v725_v7 }
 0x11c   : > { %v716_v39 = vmul.f32 %v1890_v57, %v715_v27  ;;  %v742_v35 = vmul.f32 %v2304_v38, %v2253_v58  ;;  %1895 = vrsqrt.f32 %v2287_v30  ;;  %v478_v51 = vmul.f32 %v2290_v31, %v2290_v31 }
 0x11d   : > { %v494_v63 = vsel %vm429_vm0, %v480_v33, 0.0  ;;  %v735_v3 = vsub.f32 1.5, %v734_v1  ;;  %v760_v13 = vsel %vm2335_vm11, %v2244_v50, %v756_v47  ;;  %v763_v16 = vmul.f32 %v2292_v36, %v762_v53 }
 0x11e   : > { %v720_v48 = vsel %vm2296_vm7, %v1890_v57, %v716_v39  ;;  %v743_v29 = vmul.f32 %v2304_v38, %v742_v35  ;;  %v488_v55 = vsel %vm429_vm0, %v478_v51, 0.0  ;;  %495 = vadd.xlane.f32.xlu0 %v494_v63  ;;  %452 = vadd.xlane.f32.xlu1 %v451_v0  ;;  %vm748_vm13 = vweird.f32 %v2304_v38 }
 0x11f   : > { %v438_v61 = vpop.xlane.xlu0 %437  ;;  %v444_v62 = vpop.xlane.xlu2 %443  ;;  %v782_v2 = vmul.f32 %v720_v48, %v2140_v43  ;;  %489 = vadd.xlane.f32.xlu2 %v488_v55  ;;  %v793_v43 = vmul.f32 %v2315_v45, %v781_v44  ;;  %v736_v50 = vmul.f32 %v2246_v52, %v735_v3  ;;  %vm749_vm2 = vmor %vm747_vm1, %vm748_vm13  ;;  %v786_v37 = vmul.f32 %v760_v13, %v2135_v40 }
 0x120   : > { %v463_v4 = vmul.f32 %v2118_v22, %v438_v61  ;;  %v465_v57 = vmul.f32 %v2118_v22, %v444_v62  ;;  %v744_v10 = vmul.f32 0.5, %v743_v29  ;;  %v764_v0 = vmul.f32 0.5, %v763_v16 }
 0x121   : > { %v794_v12 = vmul.f32 %v2315_v45, %v782_v2  ;;  %v740_v42 = vsel %vm2364_vm15, %v2246_v52, %v736_v50  ;;  %v798_v51 = vmul.f32 %v2315_v45, %v786_v37  ;;  %vm777_vm5 = vweird.f32 %v2287_v30 }
 0x122   : > { %v2346_v14 = vsub.f32 %v2190_v5, %v463_v4  ;;  %v2349_v32 = vsub.f32 %v2193_v6, %v465_v57  ;;  %v2351_v15 = vpop.eup %1895  ;;  %v745_v17 = vsub.f32 1.5, %v744_v10  ;;  %v765_v52 = vsub.f32 1.5, %v764_v0 }
 0x123   : > { %v801_v18 = vpack.c.bf16 %v794_v12, %v793_v43  ;;  %v772_v5 = vmul.f32 %v2351_v15, %v2287_v30  ;;  %vm778_vm6 = vweird.f32 %v2351_v15  ;;  %vm767_vm7 = vweird.f32 %v2250_v54 }
 0x124   : > { %v479_v6 = vmul.f32 %v2346_v14, %v2346_v14  ;;  %v746_v24 = vmul.f32 %v2304_v38, %v745_v17  ;;  %v481_v26 = vmul.f32 %v2349_v32, %v2349_v32  ;;  %vm768_vm8 = vweird.f32 %v2292_v36  ;;  %vm2408_vm9 = vmor %vm777_vm5, %vm778_vm6 }
 0x125   : > { %1751 = vmatmul.msk.bf16.vlgmr.msra.gmra.mxu0 %vm429_vm0, %v801_v18  ;;  %1763 = vmatmul.msk.bf16.vlgmr.msra.gmra.mxu1 %vm429_vm0, %v801_v18  ;;  %v773_v27 = vmul.f32 %v2351_v15, %v772_v5  ;;  %v766_v30 = vmul.f32 %v2292_v36, %v765_v52  ;;  %vm769_vm10 = vmor %vm767_vm7, %vm768_vm8  ;;  %v2451_v5 = vld [vmem:[%s2809_s4] ss:$0 sm:$0xff] }
 0x126   : > { %v491_v34 = vsel %vm429_vm0, %v479_v6, 0.0  ;;  %v750_v33 = vsel %vm749_vm2, %v2304_v38, %v746_v24  ;;  %v497_v1 = vsel %vm429_vm0, %v481_v26, 0.0  ;;  %v730_v38 = vsel %vm2382_vm4, %v2240_v46, %v726_v20 }
 0x127   : > { %v447_v58 = vpop.xlane.xlu0 %446  ;;  %v774_v35 = vmul.f32 0.5, %v773_v27  ;;  %v785_v23 = vmul.f32 %v750_v33, %v2156_v49  ;;  %492 = vadd.xlane.f32.xlu2 %v491_v34  ;;  %498 = vadd.xlane.f32.xlu1 %v497_v1  ;;  %v784_v49 = vmul.f32 %v740_v42, %v2137_v41  ;;  %v783_v29 = vmul.f32 %v730_v38, %v2122_v28  ;;  %v1858_v38 = vld [vmem:[%s2812_s7 + $0x8] sm:$0xff] }
 0x128   : > { %v466_v40 = vmul.f32 %v2118_v22, %v447_v58  ;;  %v770_v4 = vsel %vm769_vm10, %v2292_v36, %v766_v30  ;;  %1379 = vmatpush.bf16.msrb.mxu0 %v1858_v38 }
 0x129   : > { %v775_v44 = vsub.f32 1.5, %v774_v35  ;;  %v797_v48 = vmul.f32 %v2315_v45, %v785_v23  ;;  %v796_v54 = vmul.f32 %v2315_v45, %v784_v49  ;;  %v795_v2 = vmul.f32 %v2315_v45, %v783_v29  ;;  %v1856_v23 = vld [vmem:[%s2811_s6 + $0x8] sm:$0xff]  ;;  %v1857_v29 = vld [vmem:[%s2812_s7] sm:$0xff] }
 0x12a   : > { %v2395_v47 = vsub.f32 %v2200_v9, %v466_v40  ;;  %v787_v10 = vmul.f32 %v770_v4, %v2164_v56  ;;  %1334 = vmatpush.bf16.msrb.mxu3 %v1856_v23 }
 0x12b   : > { %v803_v53 = vpack.c.bf16 %v798_v51, %v797_v48  ;;  %v776_v9 = vmul.f32 %v2351_v15, %v775_v44  ;;  %v802_v55 = vpack.c.bf16 %v796_v54, %v795_v2 }
 0x12c   : > { %v482_v46 = vmul.f32 %v2395_v47, %v2395_v47  ;;  %v799_v43 = vmul.f32 %v2315_v45, %v787_v10  ;;  %1380 = vmatpush.bf16.msrb.mxu0 %v1857_v29 }
 0x12d   : > { %1753 = vmatmul.msk.bf16.vlgmr.msra.gmra.mxu2 %vm429_vm0, %v803_v53  ;;  %1765 = vmatmul.msk.bf16.vlgmr.msra.gmra.mxu3 %vm429_vm0, %v803_v53  ;;  %v780_v28 = vsel %vm2408_vm9, %v2351_v15, %v776_v9  ;;  %v1855_v9 = vld [vmem:[%s2811_s6] sm:$0xff] }
 0x12e   : > { %v500_v41 = vsel %vm429_vm0, %v482_v46, 0.0  ;;  %v788_v7 = vmul.f32 %v780_v28, %v2170_v59  ;;  %1335 = vmatpush.bf16.msrb.mxu3 %v1855_v9 }
 0x12f   : > { %v450_v62 = vpop.xlane.xlu0 %449  ;;  %501 = vadd.xlane.f32.xlu2 %v500_v41 }
 0x130   : > { %v467_v63 = vmul.f32 %v2118_v22, %v450_v62 }
 0x132   : > { %v2423_v3 = vsub.f32 %v2205_v11, %v467_v63  ;;  %v800_v11 = vmul.f32 %v2315_v45, %v788_v7 }
 0x134   : > { %v483_v57 = vmul.f32 %v2423_v3, %v2423_v3  ;;  %v804_v36 = vpack.c.bf16 %v800_v11, %v799_v43 }
 0x135   : > { %1752 = vmatmul.msk.bf16.gmra.mxu0 %vm429_vm0, %v802_v55  ;;  %1764 = vmatmul.msk.bf16.gmra.mxu1 %vm429_vm0, %v802_v55 }
 0x136   : > { %v503_v8 = vsel %vm429_vm0, %v483_v57, 0.0 }
 0x137   : > { %504 = vadd.xlane.f32.xlu0 %v503_v8 }
 0x13d   : > { %1754 = vmatmul.msk.bf16.gmra.mxu2 %vm429_vm0, %v804_v36  ;;  %1766 = vmatmul.msk.bf16.gmra.mxu3 %vm429_vm0, %v804_v36 }
 0x189   : > { %v487_v12 = vpop.xlane.xlu1 %486 }
 0x18a   : > { %v509_v17 = vmul.f32 %v487_v12, %v2118_v22 }
 0x18c   : > { %v2446_v50 = vadd.f32 1e-05, %v509_v17 }
 0x18e   : > { %1897 = vrsqrt.f32 %v2446_v50  ;;  %vm531_vm11 = vweird.f32 %v2446_v50 }
 0x191   : > { %v453_v59 = vpop.xlane.xlu1 %452  ;;  %v496_v27 = vpop.xlane.xlu0 %495 }
 0x192   : > { %v468_v13 = vmul.f32 %v2118_v22, %v453_v59  ;;  %v490_v16 = vpop.xlane.xlu2 %489  ;;  %v512_v39 = vmul.f32 %v496_v27, %v2118_v22 }
 0x193   : > { %v510_v45 = vmul.f32 %v490_v16, %v2118_v22 }
 0x194   : > { %v2439_v15 = vsub.f32 %v2277_v19, %v468_v13  ;;  %v2458_v24 = vpop.eup %1897  ;;  %v2480_v51 = vadd.f32 1e-05, %v512_v39 }
 0x195   : > { %v2453_v19 = vadd.f32 1e-05, %v510_v45  ;;  %v526_v33 = vmul.f32 %v2458_v24, %v2446_v50  ;;  %vm532_vm12 = vweird.f32 %v2458_v24 }
 0x196   : > { %v484_v56 = vmul.f32 %v2439_v15, %v2439_v15  ;;  %vm2521_vm1 = vmor %vm531_vm11, %vm532_vm12  ;;  %vm561_vm10 = vweird.f32 %v2480_v51 }
 0x197   : > { %1899 = vrsqrt.f32 %v2453_v19  ;;  %v527_v44 = vmul.f32 %v2458_v24, %v526_v33  ;;  %vm541_vm13 = vweird.f32 %v2453_v19 }
 0x198   : > { %v506_v18 = vsel %vm429_vm0, %v484_v56, 0.0 }
 0x199   : > { %507 = vadd.xlane.f32.xlu1 %v506_v18  ;;  %v528_v61 = vmul.f32 0.5, %v527_v44 }
 0x19a   : > { %v493_v37 = vpop.xlane.xlu2 %492  ;;  %v499_v18 = vpop.xlane.xlu1 %498 }
 0x19b   : > { %v511_v35 = vmul.f32 %v493_v37, %v2118_v22  ;;  %v529_v4 = vsub.f32 1.5, %v528_v61  ;;  %v513_v39 = vmul.f32 %v499_v18, %v2118_v22 }
 0x19d   : > { %v2460_v26 = vpop.eup %1899  ;;  %v2482_v49 = vadd.f32 1e-05, %v511_v35  ;;  %v530_v16 = vmul.f32 %v2458_v24, %v529_v4 }
 0x19e   : > { %v536_v1 = vmul.f32 %v2460_v26, %v2453_v19  ;;  %vm542_vm14 = vweird.f32 %v2460_v26 }
 0x19f   : > { %vm2533_vm2 = vmor %vm541_vm13, %vm542_vm14  ;;  %vm551_vm12 = vweird.f32 %v2482_v49 }
 0x1a0   : > { %v537_v48 = vmul.f32 %v2460_v26, %v536_v1 }
 0x1a2   : > { %v846_v6 = vpop.f32.mrf.mxu0  ;;  %v538_v30 = vmul.f32 0.5, %v537_v48  ;;  %v502_v7 = vpop.xlane.xlu2 %501 }
 0x1a3   : > { %v847_v20 = vadd.f32 %v2451_v5, %v846_v6  ;;  %v514_v56 = vmul.f32 %v502_v7, %v2118_v22  ;;  %v891_v35 = vpop.f32.mrf.mxu1 }
 0x1a4   : > { %v539_v55 = vsub.f32 1.5, %v538_v30 }
 0x1a5   : > { %v1767_v21 = vmul.f32 -1.442695, %v847_v20 }
 0x1a6   : > { %v540_v20 = vmul.f32 %v2460_v26, %v539_v55 }
 0x1a7   : > { %1901 = vpow2.f32 %v1767_v21 }
 0x1a8   : > { %v544_v48 = vsel %vm2533_vm2, %v2460_v26, %v540_v20 }
 0x1aa   : > { %v848_v34 = vpop.f32.mrf.mxu0 }
 0x1ab   : > { %v849_v0 = vadd.f32 %v2451_v5, %v848_v34 }
 0x1ad   : > { %v1902_v58 = vpop.eup %1901  ;;  %v1768_v42 = vmul.f32 -1.442695, %v849_v0 }
 0x1ae   : > { %v2469_v40 = vadd.f32 1.0, %v1902_v58 }
 0x1af   : > { %1903 = vpow2.f32 %v1768_v42  ;;  %v534_v42 = vsel %vm2521_vm1, %v2458_v24, %v530_v16 }
 0x1b0   : > { %1905 = vrcp.f32 %v2469_v40  ;;  %v856_v52 = vpop.f32.mrf.mxu2  ;;  %v952_v34 = vand.u32 2147483647, %v2469_v40  ;;  %v954_v37 = vand.u32 2147483648, %v2469_v40  ;;  %vm948_vm3 = vweird.f32 %v2469_v40 }
 0x1b1   : > { %1907 = vrsqrt.f32 %v2480_v51  ;;  %v857_v62 = vadd.f32 %v2451_v5, %v856_v52 }
 0x1b2   : > { %v851_v53 = vpop.f32.mrf.mxu0  ;;  %1909 = vrsqrt.f32 %v2482_v49  ;;  %vm953_vm5 = vcmp.eq.f32.partialorder %v952_v34, 8.507059e+37  ;;  %v955_v24 = vor.u32 1.1754944e-38, %v954_v37 }
 0x1b3   : > { %v852_v46 = vadd.f32 %v2451_v5, %v851_v53  ;;  %v1771_v8 = vmul.f32 -1.442695, %v857_v62  ;;  %v605_v62 = vmul.f32 %v534_v42, %v2256_v60 }
 0x1b5   : > { %v1904_v41 = vpop.eup %1903  ;;  %v1769_v54 = vmul.f32 -1.442695, %v852_v46 }
 0x1b6   : > { %v2493_v63 = vpop.eup %1905  ;;  %v2496_v28 = vadd.f32 1.0, %v1904_v41  ;;  %v2565_v41 = vadd.f32 1e-05, %v513_v39 }
 0x1b7   : > { %v944_v2 = vmul.f32 %v2493_v63, %v2469_v40  ;;  %1911 = vpow2.f32 %v1769_v54  ;;  %v2503_v36 = vpop.eup %1907  ;;  %vm949_vm15 = vweird.f32 %v2493_v63  ;;  %v2551_v40 = vadd.f32 1e-05, %v514_v56 }
 0x1b8   : > { %1913 = vrcp.f32 %v2496_v28  ;;  %v858_v10 = vpop.f32.mrf.mxu2  ;;  %v2509_v13 = vpop.eup %1909  ;;  %v556_v1 = vmul.f32 %v2503_v36, %v2480_v51  ;;  %vm2547_vm4 = vmor %vm948_vm3, %vm949_vm15  ;;  %v969_v52 = vand.u32 2147483648, %v2496_v28  ;;  %v967_v9 = vand.u32 2147483647, %v2496_v28 }
 0x1b9   : > { %v945_v57 = vsub.f32 1.0, %v944_v2  ;;  %v859_v11 = vadd.f32 %v2451_v5, %v858_v10  ;;  %1915 = vpow2.f32 %v1771_v8  ;;  %v546_v23 = vmul.f32 %v2509_v13, %v2482_v49  ;;  %v901_v51 = vpop.f32.mrf.mxu3 }
 0x1ba   : > { %v853_v43 = vpop.f32.mrf.mxu0  ;;  %v557_v61 = vmul.f32 %v2503_v36, %v556_v1  ;;  %vm963_vm7 = vweird.f32 %v2496_v28  ;;  %v970_v2 = vor.u32 1.1754944e-38, %v969_v52  ;;  %vm968_vm9 = vcmp.eq.f32.partialorder %v967_v9, 8.507059e+37 }
 0x1bb   : > { %v946_v12 = vmul.f32 %v2493_v63, %v945_v57  ;;  %v854_v59 = vadd.f32 %v2451_v5, %v853_v43  ;;  %v1772_v17 = vmul.f32 -1.442695, %v859_v11  ;;  %v547_v26 = vmul.f32 %v2509_v13, %v546_v23 }
 0x1bc   : > { %v558_v60 = vmul.f32 0.5, %v557_v61  ;;  %vm562_vm11 = vweird.f32 %v2503_v36  ;;  %vm552_vm13 = vweird.f32 %v2509_v13 }
 0x1bd   : > { %v1912_v45 = vpop.eup %1911  ;;  %v947_v6 = vadd.f32 %v2493_v63, %v946_v12  ;;  %1917 = vpow2.f32 %v1772_v17  ;;  %v1770_v58 = vmul.f32 -1.442695, %v854_v59  ;;  %v548_v43 = vmul.f32 0.5, %v547_v26  ;;  %v893_v12 = vpop.f32.mrf.mxu1  ;;  %vm2604_vm14 = vmor %vm561_vm10, %vm562_vm11 }
 0x1be   : > { %v1914_v21 = vpop.eup %1913  ;;  %v2527_v0 = vadd.f32 1.0, %v1912_v45  ;;  %v559_v18 = vsub.f32 1.5, %v558_v60  ;;  %vm2615_vm1 = vmor %vm551_vm12, %vm552_vm13  ;;  %vm581_vm10 = vweird.f32 %v2551_v40 }
 0x1bf   : > { %v959_v50 = vmul.f32 %v1914_v21, %v2496_v28  ;;  %v951_v38 = vsel %vm2547_vm4, %v2493_v63, %v947_v6  ;;  %v1916_v53 = vpop.eup %1915  ;;  %vm964_vm6 = vweird.f32 %v1914_v21  ;;  %v606_v63 = vmul.f32 %v544_v48, %v2290_v31 }
 0x1c0   : > { %1919 = vrcp.f32 %v2527_v0  ;;  %v956_v30 = vsel %vm953_vm5, %v955_v24, %v951_v38  ;;  %vm965_vm8 = vmor %vm963_vm7, %vm964_vm6  ;;  %v2576_v8 = vadd.f32 1.0, %v1916_v53  ;;  %v549_v27 = vsub.f32 1.5, %v548_v43 }
 0x1c1   : > { %v960_v44 = vsub.f32 1.0, %v959_v50  ;;  %1921 = vpow2.f32 %v1770_v58  ;;  %v1063_v57 = vmul.f32 %v956_v30, %v605_v62  ;;  %v560_v33 = vmul.f32 %v2503_v36, %v559_v18 }
 0x1c2   : > { %1923 = vrsqrt.f32 %v2551_v40  ;;  %v550_v39 = vmul.f32 %v2509_v13, %v549_v27  ;;  %v982_v42 = vand.u32 2147483647, %v2527_v0  ;;  %vm978_vm2 = vweird.f32 %v2527_v0 }
 0x1c3   : > { %v961_v46 = vmul.f32 %v1914_v21, %v960_v44  ;;  %v1918_v29 = vpop.eup %1917  ;;  %1925 = vrsqrt.f32 %v2565_v41  ;;  %v1071_v17 = vadd.f32 %v1063_v57, %v891_v35  ;;  %v984_v35 = vand.u32 2147483648, %v2527_v0 }
 0x1c4   : > { %v2572_v4 = vadd.f32 1.0, %v1918_v29  ;;  %v564_v52 = vsel %vm2604_vm14, %v2503_v36, %v560_v33  ;;  %v554_v29 = vsel %vm2615_vm1, %v2509_v13, %v550_v39  ;;  %vm983_vm4 = vcmp.eq.f32.partialorder %v982_v42, 8.507059e+37 }
 0x1c5   : > { %v962_v54 = vadd.f32 %v1914_v21, %v961_v46  ;;  %v896_v24 = vpop.f32.mrf.mxu1  ;;  %v985_v61 = vor.u32 1.1754944e-38, %v984_v35  ;;  %v607_v57 = vmul.f32 %v554_v29, %v2346_v14  ;;  %v608_v13 = vmul.f32 %v564_v52, %v2285_v25 }
 0x1c6   : > { %v2574_v55 = vpop.eup %1919  ;;  %1927 = vrcp.f32 %v2572_v4  ;;  %vm1023_vm1 = vweird.f32 %v2572_v4  ;;  %v1027_v27 = vand.u32 2147483647, %v2572_v4 }
 0x1c7   : > { %v966_v7 = vsel %vm965_vm8, %v1914_v21, %v962_v54  ;;  %v974_v28 = vmul.f32 %v2574_v55, %v2527_v0  ;;  %v1922_v11 = vpop.eup %1921  ;;  %1929 = vrcp.f32 %v2576_v8  ;;  %vm979_vm15 = vweird.f32 %v2574_v55 }
 0x1c8   : > { %v971_v10 = vsel %vm968_vm9, %v970_v2, %v966_v7  ;;  %v2582_v16 = vadd.f32 1.0, %v1922_v11  ;;  %v2584_v56 = vpop.eup %1923  ;;  %vm2624_vm3 = vmor %vm978_vm2, %vm979_vm15  ;;  %vm571_vm9 = vweird.f32 %v2565_v41 }
 0x1c9   : > { %v1064_v31 = vmul.f32 %v971_v10, %v606_v63  ;;  %v975_v59 = vsub.f32 1.0, %v974_v28  ;;  %v2589_v21 = vpop.eup %1925  ;;  %v576_v37 = vmul.f32 %v2584_v56, %v2551_v40  ;;  %vm582_vm11 = vweird.f32 %v2584_v56 }
 0x1ca   : > { %1931 = vrcp.f32 %v2582_v16  ;;  %v566_v58 = vmul.f32 %v2589_v21, %v2565_v41  ;;  %v999_v30 = vand.u32 2147483648, %v2582_v16  ;;  %v997_v54 = vand.u32 2147483647, %v2582_v16  ;;  %vm2656_vm15 = vmor %vm581_vm10, %vm582_vm11 }
 0x1cb   : > { %v1072_v45 = vadd.f32 %v1064_v31, %v893_v12  ;;  %v976_v20 = vmul.f32 %v2574_v55, %v975_v59  ;;  %v577_v44 = vmul.f32 %v2584_v56, %v576_v37  ;;  %vm993_vm6 = vweird.f32 %v2582_v16 }
 0x1cc   : > { %v2595_v34 = vpop.eup %1927  ;;  %v567_v53 = vmul.f32 %v2589_v21, %v566_v58  ;;  %v1000_v60 = vor.u32 1.1754944e-38, %v999_v30  ;;  %vm998_vm8 = vcmp.eq.f32.partialorder %v997_v54, 8.507059e+37  ;;  %vm572_vm13 = vweird.f32 %v2589_v21 }
 0x1cd   : > { %v1079_v6 = vpack.c.bf16 %v1072_v45, %v1071_v17  ;;  %v2602_v50 = vpop.eup %1929  ;;  %v977_v1 = vadd.f32 %v2574_v55, %v976_v20  ;;  %v1019_v23 = vmul.f32 %v2595_v34, %v2572_v4  ;;  %v578_v26 = vmul.f32 0.5, %v577_v44  ;;  %v898_v25 = vpop.f32.mrf.mxu1 }
 0x1ce   : > { %v1004_v0 = vmul.f32 %v2602_v50, %v2576_v8  ;;  %v568_v7 = vmul.f32 0.5, %v567_v53  ;;  %vm1024_vm12 = vweird.f32 %v2595_v34  ;;  %vm1009_vm14 = vweird.f32 %v2602_v50 }
 0x1cf   : > { %1803 = vmatmul.msk.bf16.vlgmr.msrb.gmra.mxu3 %vm429_vm0, %v1079_v6  ;;  %1815 = vmatmul.msk.bf16.vlgmr.msrb.gmra.mxu0 %vm429_vm0, %v1079_v6  ;;  %v981_v46 = vsel %vm2624_vm3, %v2574_v55, %v977_v1  ;;  %v1020_v62 = vsub.f32 1.0, %v1019_v23  ;;  %v579_v31 = vsub.f32 1.5, %v578_v26  ;;  %v1029_v6 = vand.u32 2147483648, %v2572_v4  ;;  %vm1025_vm2 = vmor %vm1023_vm1, %vm1024_vm12 }
 0x1d0   : > { %v1932_v49 = vpop.eup %1931  ;;  %v986_v63 = vsel %vm983_vm4, %v985_v61, %v981_v46  ;;  %v1005_v2 = vsub.f32 1.0, %v1004_v0  ;;  %v569_v17 = vsub.f32 1.5, %v568_v7  ;;  %v1014_v58 = vand.u32 2147483648, %v2576_v8  ;;  %vm2667_vm3 = vmor %vm571_vm9, %vm572_vm13 }
 0x1d1   : > { %v989_v38 = vmul.f32 %v1932_v49, %v2582_v16  ;;  %vm994_vm5 = vweird.f32 %v1932_v49  ;;  %v1065_v10 = vmul.f32 %v986_v63, %v607_v57  ;;  %v1021_v28 = vmul.f32 %v2595_v34, %v1020_v62 }
 0x1d2   : > { %vm995_vm7 = vmor %vm993_vm6, %vm994_vm5  ;;  %v1006_v12 = vmul.f32 %v2602_v50, %v1005_v2  ;;  %v580_v18 = vmul.f32 %v2584_v56, %v579_v31  ;;  %v570_v33 = vmul.f32 %v2589_v21, %v569_v17  ;;  %vm1008_vm4 = vweird.f32 %v2576_v8 }
 0x1d3   : > { %v990_v9 = vsub.f32 1.0, %v989_v38  ;;  %v1073_v14 = vadd.f32 %v1065_v10, %v896_v24  ;;  %v1022_v16 = vadd.f32 %v2595_v34, %v1021_v28  ;;  %vm1010_vm5 = vmor %vm1008_vm4, %vm1009_vm14  ;;  %v1030_v4 = vor.u32 1.1754944e-38, %v1029_v6  ;;  %v861_v24 = vpop.f32.mrf.mxu2 }
 0x1d4   : > { %v1007_v40 = vadd.f32 %v2602_v50, %v1006_v12  ;;  %v584_v41 = vsel %vm2656_vm15, %v2584_v56, %v580_v18  ;;  %vm1028_vm6 = vcmp.eq.f32.partialorder %v1027_v27, 8.507059e+37  ;;  %v903_v56 = vpop.f32.mrf.mxu3  ;;  %v862_v0 = vadd.f32 %v2451_v5, %v861_v24 }
 0x1d5   : > { %v991_v36 = vmul.f32 %v1932_v49, %v990_v9  ;;  %v1026_v39 = vsel %vm1025_vm2, %v2595_v34, %v1022_v16  ;;  %v1015_v34 = vor.u32 1.1754944e-38, %v1014_v58  ;;  %v610_v19 = vmul.f32 %v584_v41, %v2395_v47  ;;  %v505_v9 = vpop.xlane.xlu0 %504 }
 0x1d6   : > { %v1011_v42 = vsel %vm1010_vm5, %v2602_v50, %v1007_v40  ;;  %v1031_v35 = vsel %vm1028_vm6, %v1030_v4, %v1026_v39  ;;  %v1773_v46 = vmul.f32 -1.442695, %v862_v0  ;;  %v515_v29 = vmul.f32 %v505_v9, %v2118_v22  ;;  %v2011_v0 = vld [vmem:[%s2100_s23 + $0x10] sm:$0xff] }
 0x1d7   : > { %v992_v55 = vadd.f32 %v1932_v49, %v991_v36  ;;  %v1068_v44 = vmul.f32 %v1031_v35, %v610_v19 }
 0x1d8   : > { %1933 = vpow2.f32 %v1773_v46  ;;  %v523_v61 = vadd.f32 1e-05, %v515_v29  ;;  %v1861_v29 = vld [vmem:[%s2813_s8 + $0x10] sm:$0xff] }
 0x1d9   : > { %v996_v11 = vsel %vm995_vm7, %v1932_v49, %v992_v55  ;;  %v1012_v49 = vand.u32 2147483647, %v2576_v8  ;;  %v574_v8 = vsel %vm2667_vm3, %v2589_v21, %v570_v33  ;;  %v1076_v52 = vadd.f32 %v1068_v44, %v903_v56 }
 0x1da   : > { %v1001_v43 = vsel %vm998_vm8, %v1000_v60, %v996_v11  ;;  %v609_v38 = vmul.f32 %v574_v8, %v2349_v32  ;;  %vm591_vm8 = vweird.f32 %v523_v61 }
 0x1db   : > { %v1066_v59 = vmul.f32 %v1001_v43, %v608_v13  ;;  %vm1013_vm7 = vcmp.eq.f32.partialorder %v1012_v49, 8.507059e+37  ;;  %v863_v21 = vpop.f32.mrf.mxu2 }
 0x1dc   : > { %v1016_v23 = vsel %vm1013_vm7, %v1015_v34, %v1011_v42  ;;  %v864_v47 = vadd.f32 %v2451_v5, %v863_v21  ;;  %v906_v20 = vpop.f32.mrf.mxu3  ;;  %v2012_v21 = vld [vmem:[%s2100_s23 + $0x18] sm:$0xff] }
 0x1dd   : > { %v1074_v45 = vadd.f32 %v1066_v59, %v898_v25  ;;  %v1067_v48 = vmul.f32 %v1016_v23, %v609_v38  ;;  %v1084_v46 = vpack.c.bf16 %v2012_v21, %v2011_v0 }
 0x1de   : > { %v1774_v32 = vmul.f32 -1.442695, %v864_v47  ;;  %v1934_v30 = vpop.eup %1933 }
 0x1df   : > { %v1080_v37 = vpack.c.bf16 %v1074_v45, %v1073_v14  ;;  %v1075_v53 = vadd.f32 %v1067_v48, %v901_v51  ;;  %v941_v62 = vadd.f32 1.0, %v1934_v30 }
 0x1e0   : > { %1935 = vpow2.f32 %v1774_v32  ;;  %v1862_v32 = vld [vmem:[%s2813_s8 + $0x18] sm:$0xff] }
 0x1e1   : > { %1804 = vmatmul.msk.bf16.gmra.mxu3 %vm429_vm0, %v1080_v37  ;;  %1816 = vmatmul.msk.bf16.gmra.mxu0 %vm429_vm0, %v1080_v37  ;;  %v1081_v50 = vpack.c.bf16 %v1076_v52, %v1075_v53  ;;  %1937 = vrsqrt.f32 %v523_v61  ;;  %vm1038_vm12 = vweird.f32 %v941_v62  ;;  %v1042_v6 = vand.u32 2147483647, %v941_v62  ;;  %v2009_v52 = vld [vmem:[%s2100_s23] sm:$0xff]  ;;  %v2010_v53 = vld [vmem:[%s2100_s23 + $0x8] sm:$0xff] }
 0x1e2   : > { %1939 = vrcp.f32 %v941_v62  ;;  %1623 = vmatpush.bf16.msrb.mxu1 %v1862_v32 }
 0x1e3   : > { %vm1043_vm1 = vcmp.eq.f32.partialorder %v1042_v6, 8.507059e+37 }
 0x1e4   : > { %v908_v44 = vpop.f32.mrf.mxu3 }
 0x1e6   : > { %v1936_v36 = vpop.eup %1935  ;;  %1624 = vmatpush.bf16.msrb.mxu1 %v1861_v29 }
 0x1e7   : > { %v942_v54 = vadd.f32 1.0, %v1936_v36  ;;  %v1938_v26 = vpop.eup %1937 }
 0x1e8   : > { %v586_v63 = vmul.f32 %v1938_v26, %v523_v61  ;;  %v1940_v2 = vpop.eup %1939  ;;  %vm592_vm9 = vweird.f32 %v1938_v26 }
 0x1e9   : > { %1941 = vrcp.f32 %v942_v54  ;;  %v1034_v5 = vmul.f32 %v1940_v2, %v941_v62  ;;  %vm1039_vm10 = vweird.f32 %v1940_v2  ;;  %vm2693_vm11 = vmor %vm591_vm8, %vm592_vm9  ;;  %v1059_v1 = vand.u32 2147483648, %v942_v54 }
 0x1ea   : > { %v587_v55 = vmul.f32 %v1938_v26, %v586_v63  ;;  %vm1040_vm13 = vmor %vm1038_vm12, %vm1039_vm10  ;;  %vm1053_vm2 = vweird.f32 %v942_v54  ;;  %v1057_v49 = vand.u32 2147483647, %v942_v54  ;;  %v2014_v63 = vld [vmem:[%s2100_s23 + $0x28] sm:$0xff] }
 0x1eb   : > { %v1035_v28 = vsub.f32 1.0, %v1034_v5  ;;  %v1060_v34 = vor.u32 1.1754944e-38, %v1059_v1 }
 0x1ec   : > { %v588_v10 = vmul.f32 0.5, %v587_v55  ;;  %vm1058_vm6 = vcmp.eq.f32.partialorder %v1057_v49, 8.507059e+37 }
 0x1ed   : > { %v1036_v43 = vmul.f32 %v1940_v2, %v1035_v28 }
 0x1ee   : > { %v589_v31 = vsub.f32 1.5, %v588_v10 }
 0x1ef   : > { %v1942_v13 = vpop.eup %1941  ;;  %v1037_v14 = vadd.f32 %v1940_v2, %v1036_v43 }
 0x1f0   : > { %v1049_v11 = vmul.f32 %v1942_v13, %v942_v54  ;;  %v590_v25 = vmul.f32 %v1938_v26, %v589_v31  ;;  %vm1054_vm14 = vweird.f32 %v1942_v13  ;;  %v1860_v54 = vld [vmem:[%s2813_s8 + $0x8] sm:$0xff] }
 0x1f1   : > { %1805 = vmatmul.msk.bf16.gmra.mxu3 %vm429_vm0, %v1081_v50  ;;  %1817 = vmatmul.msk.bf16.gmra.mxu0 %vm429_vm0, %v1081_v50  ;;  %v1041_v37 = vsel %vm1040_vm13, %v1940_v2, %v1037_v14  ;;  %vm1055_vm4 = vmor %vm1053_vm2, %vm1054_vm14  ;;  %v1083_v50 = vpack.c.bf16 %v2010_v53, %v2009_v52 }
 0x1f2   : > { %v1050_v12 = vsub.f32 1.0, %v1049_v11  ;;  %v594_v27 = vsel %vm2693_vm11, %v1938_v26, %v590_v25  ;;  %1625 = vmatpush.bf16.msrb.mxu1 %v1860_v54  ;;  %v2013_v26 = vld [vmem:[%s2100_s23 + $0x20] sm:$0xff] }
 0x1f3   : > { %v611_v4 = vmul.f32 %v594_v27, %v2423_v3  ;;  %v1854_v3 = vld [vmem:[%s2814_s9 + $0x8] sm:$0xff]  ;;  %v1085_v2 = vpack.c.bf16 %v2014_v63, %v2013_v26 }
 0x1f4   : > { %v1051_v16 = vmul.f32 %v1942_v13, %v1050_v12  ;;  %1125 = vmatpush.bf16.msrb.mxu2 %v1854_v3 }
 0x1f6   : > { %v1052_v33 = vadd.f32 %v1942_v13, %v1051_v16 }
 0x1f8   : > { %v1056_v42 = vsel %vm1055_vm4, %v1942_v13, %v1052_v33 }
 0x1f9   : > { %v1061_v23 = vsel %vm1058_vm6, %v1060_v34, %v1056_v42 }
 0x20c   : > { %v508_v57 = vpop.xlane.xlu1 %507 }
 0x20d   : > { %v516_v7 = vmul.f32 %v508_v57, %v2118_v22  ;;  %v1044_v22 = vand.u32 2147483648, %v941_v62  ;;  %v1859_v57 = vld [vmem:[%s2813_s8] sm:$0xff] }
 0x20e   : > { %1626 = vmatpush.bf16.msrb.mxu1 %v1859_v57 }
 0x20f   : > { %v524_v60 = vadd.f32 1e-05, %v516_v7  ;;  %v1045_v51 = vor.u32 1.1754944e-38, %v1044_v22 }
 0x211   : > { %1943 = vrsqrt.f32 %v524_v60  ;;  %v1046_v39 = vsel %vm1043_vm1, %v1045_v51, %v1041_v37  ;;  %vm601_vm3 = vweird.f32 %v524_v60 }
 0x212   : > { %v1069_v35 = vmul.f32 %v1046_v39, %v611_v4 }
 0x214   : > { %v1077_v24 = vadd.f32 %v1069_v35, %v906_v20 }
 0x217   : > { %v1944_v59 = vpop.eup %1943 }
 0x218   : > { %v596_v17 = vmul.f32 %v1944_v59, %v524_v60  ;;  %vm602_vm15 = vweird.f32 %v1944_v59 }
 0x219   : > { %vm603_vm5 = vmor %vm601_vm3, %vm602_vm15  ;;  %vm1606_vm15 = vcmask 523264  }
 0x21a   : > { %v597_v18 = vmul.f32 %v1944_v59, %v596_v17 }
 0x21c   : > { %v598_v40 = vmul.f32 0.5, %v597_v18 }
 0x21e   : > { %v599_v58 = vsub.f32 1.5, %v598_v40 }
 0x220   : > { %v600_v41 = vmul.f32 %v1944_v59, %v599_v58 }
 0x222   : > { %v604_v8 = vsel %vm603_vm5, %v1944_v59, %v600_v41 }
 0x223   : > { %v612_v19 = vmul.f32 %v604_v8, %v2439_v15  ;;  %v1853_v15 = vld [vmem:[%s2814_s9] sm:$0xff] }
 0x224   : > { %1126 = vmatpush.bf16.msrb.mxu2 %v1853_v15 }
 0x225   : > { %v1070_v38 = vmul.f32 %v1061_v23, %v612_v19 }
 0x227   : > { %v1078_v48 = vadd.f32 %v1070_v38, %v908_v44  ;;  %1783 = vmatmul.msk.bf16.vlgmr.msrb.gmra.mxu2 %vm429_vm0, %v1083_v50 }
 0x229   : > { %v1082_v56 = vpack.c.bf16 %v1078_v48, %v1077_v24 }
 0x22b   : > { %1806 = vmatmul.msk.bf16.gmra.mxu3 %vm429_vm0, %v1082_v56  ;;  %1818 = vmatmul.msk.bf16.gmra.mxu0 %vm429_vm0, %v1082_v56 }
 0x237   : > { %1784 = vmatmul.msk.bf16.gmra.mxu2 %vm429_vm0, %v1084_v46 }
 0x247   : > { %1785 = vmatmul.msk.bf16.gmra.mxu2 %vm429_vm0, %v1085_v2 }
 0x24c   : > { %v1382_v31 = vpop.f32.mrf.mxu0 }
 0x252   : > { %v1337_v47 = vpop.f32.mrf.mxu3 }
 0x253   : > { %v1819_v9 = vmul.f32 -1.442695, %v1337_v47 }
 0x254   : > { %v1384_v58 = vpop.f32.mrf.mxu0 }
 0x255   : > { %1945 = vpow2.f32 %v1819_v9 }
 0x25a   : > { %v1339_v61 = vpop.f32.mrf.mxu3 }
 0x25b   : > { %v1946_v30 = vpop.eup %1945  ;;  %v1820_v62 = vmul.f32 -1.442695, %v1339_v61 }
 0x25c   : > { %v1426_v36 = vadd.f32 1.0, %v1946_v30  ;;  %v2016_v30 = vld [vmem:[%s2100_s23 + $0x30] sm:$0xff] }
 0x25d   : > { %1947 = vpow2.f32 %v1820_v62 }
 0x25e   : > { %1949 = vrcp.f32 %v1426_v36  ;;  %v1443_v59 = vand.u32 2147483647, %v1426_v36  ;;  %v1445_v17 = vand.u32 2147483648, %v1426_v36  ;;  %vm1439_vm8 = vweird.f32 %v1426_v36  ;;  %v1387_v56 = vpop.f32.mrf.mxu0 }
 0x260   : > { %vm1444_vm10 = vcmp.eq.f32.partialorder %v1443_v59, 8.507059e+37  ;;  %v1446_v6 = vor.u32 1.1754944e-38, %v1445_v17 }
 0x263   : > { %v1948_v55 = vpop.eup %1947 }
 0x264   : > { %v1950_v5 = vpop.eup %1949  ;;  %v1427_v7 = vadd.f32 1.0, %v1948_v55  ;;  %v2730_v60 = vpop.f32.mrf.mxu3 }
 0x265   : > { %v1435_v13 = vmul.f32 %v1950_v5, %v1426_v36  ;;  %v1821_v28 = vmul.f32 -1.442695, %v2730_v60  ;;  %vm1440_vm7 = vweird.f32 %v1950_v5 }
 0x266   : > { %1951 = vrcp.f32 %v1427_v7  ;;  %vm1441_vm9 = vmor %vm1439_vm8, %vm1440_vm7  ;;  %v1460_v20 = vand.u32 2147483648, %v1427_v7  ;;  %v1458_v37 = vand.u32 2147483647, %v1427_v7  ;;  %vm1454_vm12 = vweird.f32 %v1427_v7 }
 0x267   : > { %v1436_v10 = vsub.f32 1.0, %v1435_v13  ;;  %1953 = vpow2.f32 %v1821_v28 }
 0x268   : > { %v1461_v1 = vor.u32 1.1754944e-38, %v1460_v20  ;;  %vm1459_vm14 = vcmp.eq.f32.partialorder %v1458_v37, 8.507059e+37 }
 0x269   : > { %v1437_v11 = vmul.f32 %v1950_v5, %v1436_v10 }
 0x26b   : > { %v1438_v43 = vadd.f32 %v1950_v5, %v1437_v11 }
 0x26c   : > { %v1952_v12 = vpop.eup %1951  ;;  %v2733_v14 = vpop.f32.mrf.mxu3 }
 0x26d   : > { %v1450_v25 = vmul.f32 %v1952_v12, %v1427_v7  ;;  %v1954_v16 = vpop.eup %1953  ;;  %v1442_v45 = vsel %vm1441_vm9, %v1950_v5, %v1438_v43  ;;  %v1822_v18 = vmul.f32 -1.442695, %v2733_v14  ;;  %vm1455_vm11 = vweird.f32 %v1952_v12  ;;  %v1389_v7 = vpop.f32.mrf.mxu0 }
 0x26e   : > { %v1428_v40 = vadd.f32 1.0, %v1954_v16  ;;  %v1447_v33 = vsel %vm1444_vm10, %v1446_v6, %v1442_v45  ;;  %vm1456_vm13 = vmor %vm1454_vm12, %vm1455_vm11 }
 0x26f   : > { %v1451_v22 = vsub.f32 1.0, %v1450_v25  ;;  %1955 = vpow2.f32 %v1822_v18  ;;  %v1554_v49 = vmul.f32 %v1447_v33, %v1337_v47 }
 0x270   : > { %1957 = vrcp.f32 %v1428_v40  ;;  %v1475_v21 = vand.u32 2147483648, %v1428_v40  ;;  %vm1469_vm2 = vweird.f32 %v1428_v40  ;;  %v1473_v47 = vand.u32 2147483647, %v1428_v40 }
 0x271   : > { %v1452_v27 = vmul.f32 %v1952_v12, %v1451_v22  ;;  %v1562_v23 = vmul.f32 %v1554_v49, %v1382_v31 }
 0x272   : > { %v1476_v36 = vor.u32 1.1754944e-38, %v1475_v21  ;;  %vm1474_vm4 = vcmp.eq.f32.partialorder %v1473_v47, 8.507059e+37 }
 0x273   : > { %v1453_v51 = vadd.f32 %v1952_v12, %v1452_v27 }
 0x274   : > { %v2736_v4 = vpop.f32.mrf.mxu3 }
 0x275   : > { %v1457_v39 = vsel %vm1456_vm13, %v1952_v12, %v1453_v51  ;;  %v1956_v42 = vpop.eup %1955  ;;  %v1823_v34 = vmul.f32 -1.442695, %v2736_v4 }
 0x276   : > { %v1462_v41 = vsel %vm1459_vm14, %v1461_v1, %v1457_v39  ;;  %v1958_v35 = vpop.eup %1957  ;;  %v1429_v19 = vadd.f32 1.0, %v1956_v42 }
 0x277   : > { %v1555_v8 = vmul.f32 %v1462_v41, %v1339_v61  ;;  %v1465_v44 = vmul.f32 %v1958_v35, %v1428_v40  ;;  %1959 = vpow2.f32 %v1823_v34  ;;  %vm1470_vm1 = vweird.f32 %v1958_v35  ;;  %v2015_v61 = vld [vmem:[%s2100_s23 + $0x38] sm:$0xff] }
 0x278   : > { %1961 = vrcp.f32 %v1429_v19  ;;  %vm1471_vm3 = vmor %vm1469_vm2, %vm1470_vm1  ;;  %v1086_v62 = vpack.c.bf16 %v2015_v61, %v2016_v30  ;;  %v1490_v54 = vand.u32 2147483648, %v1429_v19  ;;  %v1488_v63 = vand.u32 2147483647, %v1429_v19 }
 0x279   : > { %v1563_v38 = vmul.f32 %v1555_v8, %v1384_v58  ;;  %v1466_v48 = vsub.f32 1.0, %v1465_v44  ;;  %vm1484_vm6 = vweird.f32 %v1429_v19 }
 0x27a   : > { %1786 = vmatmul.msk.bf16.gmra.mxu2 %vm429_vm0, %v1086_v62  ;;  %v1491_v13 = vor.u32 1.1754944e-38, %v1490_v54  ;;  %vm1489_vm8 = vcmp.eq.f32.partialorder %v1488_v63, 8.507059e+37 }
 0x27b   : > { %v1570_v24 = vpack.c.bf16 %v1563_v38, %v1562_v23  ;;  %v1467_v3 = vmul.f32 %v1958_v35, %v1466_v48 }
 0x27c   : > { %v2740_v15 = vpop.f32.mrf.mxu3 }
 0x27d   : > { %1843 = vmatmul.msk.bf16.vlgmr.msrb.gmra.mxu1 %vm1606_vm15, %v1570_v24  ;;  %v1960_v52 = vpop.eup %1959  ;;  %v1468_v53 = vadd.f32 %v1958_v35, %v1467_v3  ;;  %v1824_v50 = vmul.f32 -1.442695, %v2740_v15 }
 0x27e   : > { %v1962_v0 = vpop.eup %1961  ;;  %v1430_v46 = vadd.f32 1.0, %v1960_v52 }
 0x27f   : > { %v1480_v9 = vmul.f32 %v1962_v0, %v1429_v19  ;;  %1963 = vpow2.f32 %v1824_v50  ;;  %v1472_v32 = vsel %vm1471_vm3, %v1958_v35, %v1468_v53  ;;  %vm1485_vm5 = vweird.f32 %v1962_v0 }
 0x280   : > { %1965 = vrcp.f32 %v1430_v46  ;;  %v1477_v2 = vsel %vm1474_vm4, %v1476_v36, %v1472_v32  ;;  %vm1486_vm7 = vmor %vm1484_vm6, %vm1485_vm5  ;;  %v1505_v6 = vand.u32 2147483648, %v1430_v46  ;;  %vm1499_vm10 = vweird.f32 %v1430_v46 }
 0x281   : > { %v1481_v29 = vsub.f32 1.0, %v1480_v9  ;;  %v1556_v28 = vmul.f32 %v1477_v2, %v2730_v60  ;;  %v1503_v20 = vand.u32 2147483647, %v1430_v46  ;;  %v1392_v60 = vpop.f32.mrf.mxu0 }
 0x282   : > { %v1506_v33 = vor.u32 1.1754944e-38, %v1505_v6 }
 0x283   : > { %v1482_v26 = vmul.f32 %v1962_v0, %v1481_v29  ;;  %v1564_v17 = vmul.f32 %v1556_v28, %v1387_v56  ;;  %vm1504_vm12 = vcmp.eq.f32.partialorder %v1503_v20, 8.507059e+37 }
 0x285   : > { %v1964_v57 = vpop.eup %1963  ;;  %v1483_v55 = vadd.f32 %v1962_v0, %v1482_v26 }
 0x286   : > { %v1966_v5 = vpop.eup %1965  ;;  %v1431_v10 = vadd.f32 1.0, %v1964_v57 }
 0x287   : > { %v1487_v11 = vsel %vm1486_vm7, %v1962_v0, %v1483_v55  ;;  %v1495_v31 = vmul.f32 %v1966_v5, %v1430_v46  ;;  %vm1500_vm9 = vweird.f32 %v1966_v5 }
 0x288   : > { %v1492_v43 = vsel %vm1489_vm8, %v1491_v13, %v1487_v11  ;;  %1967 = vrcp.f32 %v1431_v10  ;;  %vm1501_vm11 = vmor %vm1499_vm10, %vm1500_vm9  ;;  %v1518_v58 = vand.u32 2147483647, %v1431_v10  ;;  %vm1514_vm14 = vweird.f32 %v1431_v10 }
 0x289   : > { %v1557_v12 = vmul.f32 %v1492_v43, %v2733_v14  ;;  %v1496_v59 = vsub.f32 1.0, %v1495_v31  ;;  %v1520_v14 = vand.u32 2147483648, %v1431_v10  ;;  %v1394_v35 = vpop.f32.mrf.mxu0 }
 0x28a   : > { %vm1519_vm2 = vcmp.eq.f32.partialorder %v1518_v58, 8.507059e+37 }
 0x28b   : > { %v1565_v25 = vmul.f32 %v1557_v12, %v1389_v7  ;;  %v1497_v16 = vmul.f32 %v1966_v5, %v1496_v59  ;;  %v1521_v39 = vor.u32 1.1754944e-38, %v1520_v14 }
 0x28d   : > { %v1498_v45 = vadd.f32 %v1966_v5, %v1497_v16  ;;  %v1571_v22 = vpack.c.bf16 %v1565_v25, %v1564_v17 }
 0x28e   : > { %v1968_v18 = vpop.eup %1967 }
 0x28f   : > { %v1510_v40 = vmul.f32 %v1968_v18, %v1431_v10  ;;  %1844 = vmatmul.msk.bf16.gmra.mxu1 %vm1606_vm15, %v1571_v22  ;;  %v1502_v27 = vsel %vm1501_vm11, %v1966_v5, %v1498_v45  ;;  %vm1515_vm13 = vweird.f32 %v1968_v18 }
 0x290   : > { %v1507_v1 = vsel %vm1504_vm12, %v1506_v33, %v1502_v27  ;;  %vm1516_vm1 = vmor %vm1514_vm14, %vm1515_vm13 }
 0x291   : > { %v1511_v37 = vsub.f32 1.0, %v1510_v40  ;;  %v1558_v41 = vmul.f32 %v1507_v1, %v2736_v4 }
 0x293   : > { %v1512_v51 = vmul.f32 %v1968_v18, %v1511_v37  ;;  %v1566_v19 = vmul.f32 %v1558_v41, %v1392_v60 }
 0x295   : > { %v1513_v49 = vadd.f32 %v1968_v18, %v1512_v51 }
 0x297   : > { %v1517_v42 = vsel %vm1516_vm1, %v1968_v18, %v1513_v49 }
 0x298   : > { %v1522_v8 = vsel %vm1519_vm2, %v1521_v39, %v1517_v42 }
 0x299   : > { %v1559_v34 = vmul.f32 %v1522_v8, %v2740_v15  ;;  %v2755_v15 = vld [vmem:[%s2815_s10] ss:$0 sm:$0xff] }
 0x29b   : > { %v1567_v23 = vmul.f32 %v1559_v34, %v1394_v35 }
 0x29d   : > { %v1572_v38 = vpack.c.bf16 %v1567_v23, %v1566_v19 }
 0x29f   : > { %1845 = vmatmul.msk.bf16.gmra.mxu1 %vm1606_vm15, %v1572_v38 }
 0x2a8   : > { %v1397_v26 = vpop.f32.mrf.mxu0 }
 0x2aa   : > { %v1128_v21 = vpop.f32.mrf.mxu2 }
 0x2ab   : > { %v1129_v47 = vadd.f32 %v2755_v15, %v1128_v21 }
 0x2ad   : > { %v1787_v29 = vmul.f32 -1.442695, %v1129_v47 }
 0x2ae   : > { %v1352_v44 = vpop.f32.mrf.mxu3 }
 0x2af   : > { %v1825_v24 = vmul.f32 -1.442695, %v1352_v44 }
 0x2b0   : > { %v1399_v45 = vpop.f32.mrf.mxu0 }
 0x2b1   : > { %1969 = vpow2.f32 %v1825_v24 }
 0x2b2   : > { %v1130_v54 = vpop.f32.mrf.mxu2 }
 0x2b3   : > { %v1131_v57 = vadd.f32 %v2755_v15, %v1130_v54 }
 0x2b5   : > { %v1788_v11 = vmul.f32 -1.442695, %v1131_v57 }
 0x2b6   : > { %v1354_v48 = vpop.f32.mrf.mxu3 }
 0x2b7   : > { %v1970_v3 = vpop.eup %1969  ;;  %v1826_v56 = vmul.f32 -1.442695, %v1354_v48 }
 0x2b8   : > { %v1432_v52 = vadd.f32 1.0, %v1970_v3 }
 0x2b9   : > { %1971 = vpow2.f32 %v1826_v56 }
 0x2ba   : > { %1973 = vrcp.f32 %v1432_v52  ;;  %v1535_v30 = vand.u32 2147483648, %v1432_v52  ;;  %vm1529_vm4 = vweird.f32 %v1432_v52  ;;  %v1533_v62 = vand.u32 2147483647, %v1432_v52  ;;  %v1133_v17 = vpop.f32.mrf.mxu2 }
 0x2bb   : > { %v1134_v40 = vadd.f32 %v2755_v15, %v1133_v17 }
 0x2bc   : > { %v1536_v55 = vor.u32 1.1754944e-38, %v1535_v30  ;;  %vm1534_vm6 = vcmp.eq.f32.partialorder %v1533_v62, 8.507059e+37 }
 0x2bd   : > { %v1789_v37 = vmul.f32 -1.442695, %v1134_v40 }
 0x2bf   : > { %v1972_v4 = vpop.eup %1971 }
 0x2c0   : > { %v1974_v53 = vpop.eup %1973  ;;  %v1433_v50 = vadd.f32 1.0, %v1972_v4 }
 0x2c1   : > { %v1525_v0 = vmul.f32 %v1974_v53, %v1432_v52  ;;  %vm1530_vm3 = vweird.f32 %v1974_v53 }
 0x2c2   : > { %1975 = vrcp.f32 %v1433_v50  ;;  %vm1531_vm5 = vmor %vm1529_vm4, %vm1530_vm3  ;;  %v1550_v5 = vand.u32 2147483648, %v1433_v50  ;;  %v1548_v13 = vand.u32 2147483647, %v1433_v50  ;;  %vm1544_vm8 = vweird.f32 %v1433_v50  ;;  %v1135_v27 = vpop.f32.mrf.mxu2 }
 0x2c3   : > { %v1526_v46 = vsub.f32 1.0, %v1525_v0  ;;  %1977 = vpow2.f32 %v1787_v29  ;;  %v1136_v51 = vadd.f32 %v2755_v15, %v1135_v27 }
 0x2c4   : > { %v1551_v31 = vor.u32 1.1754944e-38, %v1550_v5  ;;  %vm1549_vm10 = vcmp.eq.f32.partialorder %v1548_v13, 8.507059e+37  ;;  %1979 = vpow2.f32 %v1788_v11 }
 0x2c5   : > { %v1527_v9 = vmul.f32 %v1974_v53, %v1526_v46  ;;  %v1790_v49 = vmul.f32 -1.442695, %v1136_v51 }
 0x2c7   : > { %v1528_v32 = vadd.f32 %v1974_v53, %v1527_v9 }
 0x2c8   : > { %v1976_v61 = vpop.eup %1975 }
 0x2c9   : > { %v1540_v36 = vmul.f32 %v1976_v61, %v1433_v50  ;;  %v1532_v63 = vsel %vm1531_vm5, %v1974_v53, %v1528_v32  ;;  %vm1545_vm7 = vweird.f32 %v1976_v61  ;;  %v1978_v43 = vpop.eup %1977 }
 0x2ca   : > { %v1537_v10 = vsel %vm1534_vm6, %v1536_v55, %v1532_v63  ;;  %vm1546_vm9 = vmor %vm1544_vm8, %vm1545_vm7  ;;  %v1172_v22 = vadd.f32 1.0, %v1978_v43  ;;  %v1980_v60 = vpop.eup %1979  ;;  %v1138_v1 = vpop.f32.mrf.mxu2 }
 0x2cb   : > { %v1541_v2 = vsub.f32 1.0, %v1540_v36  ;;  %v1560_v12 = vmul.f32 %v1537_v10, %v1352_v44  ;;  %v1173_v33 = vadd.f32 1.0, %v1980_v60  ;;  %v1139_v8 = vadd.f32 %v2755_v15, %v1138_v1 }
 0x2cc   : > { %1981 = vrcp.f32 %v1172_v22  ;;  %v1191_v38 = vand.u32 2147483648, %v1172_v22  ;;  %v1189_v3 = vand.u32 2147483647, %v1172_v22 }
 0x2cd   : > { %v1542_v7 = vmul.f32 %v1976_v61, %v1541_v2  ;;  %v1568_v18 = vmul.f32 %v1560_v12, %v1397_v26  ;;  %1983 = vpow2.f32 %v1789_v37  ;;  %v1791_v23 = vmul.f32 -1.442695, %v1139_v8 }
 0x2ce   : > { %1985 = vrcp.f32 %v1173_v33  ;;  %v1192_v53 = vor.u32 1.1754944e-38, %v1191_v38  ;;  %vm1190_vm13 = vcmp.eq.f32.partialorder %v1189_v3, 8.507059e+37  ;;  %vm1200_vm14 = vweird.f32 %v1173_v33 }
 0x2cf   : > { %v1543_v28 = vadd.f32 %v1976_v61, %v1542_v7  ;;  %1987 = vpow2.f32 %v1790_v49  ;;  %v1206_v9 = vand.u32 2147483648, %v1173_v33 }
 0x2d1   : > { %v1547_v59 = vsel %vm1546_vm9, %v1976_v61, %v1543_v28  ;;  %v1204_v61 = vand.u32 2147483647, %v1173_v33  ;;  %v1207_v26 = vor.u32 1.1754944e-38, %v1206_v9 }
 0x2d2   : > { %v1552_v25 = vsel %vm1549_vm10, %v1551_v31, %v1547_v59  ;;  %v1982_v14 = vpop.eup %1981  ;;  %v1140_v44 = vpop.f32.mrf.mxu2 }
 0x2d3   : > { %v1561_v16 = vmul.f32 %v1552_v25, %v1354_v48  ;;  %v1181_v58 = vmul.f32 %v1982_v14, %v1172_v22  ;;  %v1984_v39 = vpop.eup %1983  ;;  %vm1186_vm11 = vweird.f32 %v1982_v14  ;;  %v1141_v52 = vadd.f32 %v2755_v15, %v1140_v44 }
 0x2d4   : > { %v1986_v42 = vpop.eup %1985  ;;  %v2763_v34 = vadd.f32 1.0, %v1984_v39  ;;  %vm1205_vm3 = vcmp.eq.f32.partialorder %v1204_v61, 8.507059e+37 }
 0x2d5   : > { %v1569_v6 = vmul.f32 %v1561_v16, %v1399_v45  ;;  %v1182_v41 = vsub.f32 1.0, %v1181_v58  ;;  %v1196_v19 = vmul.f32 %v1986_v42, %v1173_v33  ;;  %v1988_v24 = vpop.eup %1987  ;;  %vm1201_vm1 = vweird.f32 %v1986_v42 }
 0x2d6   : > { %1989 = vrcp.f32 %v2763_v34  ;;  %v2767_v4 = vadd.f32 1.0, %v1988_v24  ;;  %v1792_v46 = vmul.f32 -1.442695, %v1141_v52  ;;  %vm1202_vm2 = vmor %vm1200_vm14, %vm1201_vm1  ;;  %vm1215_vm4 = vweird.f32 %v2763_v34 }
 0x2d7   : > { %v1573_v20 = vpack.c.bf16 %v1569_v6, %v1568_v18  ;;  %v1183_v35 = vmul.f32 %v1982_v14, %v1182_v41  ;;  %v1197_v56 = vsub.f32 1.0, %v1196_v19  ;;  %1991 = vpow2.f32 %v1791_v23 }
 0x2d8   : > { %1993 = vrcp.f32 %v2767_v4  ;;  %v1221_v31 = vand.u32 2147483648, %v2763_v34  ;;  %v1219_v12 = vand.u32 2147483647, %v2763_v34  ;;  %vm1230_vm8 = vweird.f32 %v2767_v4 }
 0x2d9   : > { %1846 = vmatmul.msk.bf16.gmra.mxu1 %vm1606_vm15, %v1573_v20  ;;  %vm1185_vm15 = vweird.f32 %v1172_v22  ;;  %v1184_v48 = vadd.f32 %v1982_v14, %v1183_v35  ;;  %v1198_v0 = vmul.f32 %v1986_v42, %v1197_v56  ;;  %1995 = vpow2.f32 %v1792_v46 }
 0x2da   : > { %vm1187_vm12 = vmor %vm1185_vm15, %vm1186_vm11  ;;  %v1222_v25 = vor.u32 1.1754944e-38, %v1221_v31  ;;  %vm1220_vm7 = vcmp.eq.f32.partialorder %v1219_v12, 8.507059e+37  ;;  %v1236_v6 = vand.u32 2147483648, %v2767_v4  ;;  %v1234_v40 = vand.u32 2147483647, %v2767_v4 }
 0x2db   : > { %v1188_v50 = vsel %vm1187_vm12, %v1982_v14, %v1184_v48  ;;  %v1199_v29 = vadd.f32 %v1986_v42, %v1198_v0 }
 0x2dc   : > { %v1990_v21 = vpop.eup %1989  ;;  %v1193_v47 = vsel %vm1190_vm13, %v1192_v53, %v1188_v50  ;;  %v1237_v14 = vor.u32 1.1754944e-38, %v1236_v6  ;;  %vm1235_vm15 = vcmp.eq.f32.partialorder %v1234_v40, 8.507059e+37 }
 0x2dd   : > { %v1992_v32 = vpop.eup %1991  ;;  %v1211_v30 = vmul.f32 %v1990_v21, %v2763_v34  ;;  %v1203_v63 = vsel %vm1202_vm2, %v1986_v42, %v1199_v29  ;;  %vm1216_vm5 = vweird.f32 %v1990_v21 }
 0x2de   : > { %v1176_v54 = vadd.f32 1.0, %v1992_v32  ;;  %v1994_v57 = vpop.eup %1993  ;;  %v1208_v55 = vsel %vm1205_vm3, %v1207_v26, %v1203_v63  ;;  %vm1217_vm6 = vmor %vm1215_vm4, %vm1216_vm5 }
 0x2df   : > { %v1212_v2 = vsub.f32 1.0, %v1211_v30  ;;  %v1996_v5 = vpop.eup %1995  ;;  %v1226_v13 = vmul.f32 %v1994_v57, %v2767_v4  ;;  %vm1231_vm9 = vweird.f32 %v1994_v57 }
 0x2e0   : > { %1997 = vrcp.f32 %v1176_v54  ;;  %v1177_v11 = vadd.f32 1.0, %v1996_v5  ;;  %vm1232_vm10 = vmor %vm1230_vm8, %vm1231_vm9  ;;  %vm1245_vm11 = vweird.f32 %v1176_v54  ;;  %v1251_v39 = vand.u32 2147483648, %v1176_v54 }
 0x2e1   : > { %v1213_v7 = vmul.f32 %v1990_v21, %v1212_v2  ;;  %v1227_v59 = vsub.f32 1.0, %v1226_v13  ;;  %v1249_v42 = vand.u32 2147483647, %v1176_v54 }
 0x2e2   : > { %1999 = vrcp.f32 %v1177_v11  ;;  %v1252_v19 = vor.u32 1.1754944e-38, %v1251_v39  ;;  %vm1260_vm1 = vweird.f32 %v1177_v11  ;;  %v1266_v24 = vand.u32 2147483648, %v1177_v11 }
 0x2e3   : > { %v1214_v43 = vadd.f32 %v1990_v21, %v1213_v7  ;;  %v1228_v45 = vmul.f32 %v1994_v57, %v1227_v59  ;;  %vm1250_vm14 = vcmp.eq.f32.partialorder %v1249_v42, 8.507059e+37  ;;  %v1264_v3 = vand.u32 2147483647, %v1177_v11 }
 0x2e4   : > { %v1267_v4 = vor.u32 1.1754944e-38, %v1266_v24 }
 0x2e5   : > { %v1218_v16 = vsel %vm1217_vm6, %v1990_v21, %v1214_v43  ;;  %v1229_v20 = vadd.f32 %v1994_v57, %v1228_v45  ;;  %vm1265_vm4 = vcmp.eq.f32.partialorder %v1264_v3, 8.507059e+37 }
 0x2e6   : > { %v1998_v17 = vpop.eup %1997  ;;  %v1223_v18 = vsel %vm1220_vm7, %v1222_v25, %v1218_v16 }
 0x2e7   : > { %v1241_v22 = vmul.f32 %v1998_v17, %v1176_v54  ;;  %v1233_v51 = vsel %vm1232_vm10, %v1994_v57, %v1229_v20  ;;  %vm1246_vm12 = vweird.f32 %v1998_v17 }
 0x2e8   : > { %v2000_v27 = vpop.eup %1999  ;;  %v1238_v49 = vsel %vm1235_vm15, %v1237_v14, %v1233_v51  ;;  %vm1247_vm13 = vmor %vm1245_vm11, %vm1246_vm12 }
 0x2e9   : > { %v1242_v60 = vsub.f32 1.0, %v1241_v22  ;;  %v1256_v1 = vmul.f32 %v2000_v27, %v1177_v11  ;;  %vm1261_vm2 = vweird.f32 %v2000_v27 }
 0x2ea   : > { %vm1262_vm3 = vmor %vm1260_vm1, %vm1261_vm2 }
 0x2eb   : > { %v1243_v58 = vmul.f32 %v1998_v17, %v1242_v60  ;;  %v1257_v8 = vsub.f32 1.0, %v1256_v1 }
 0x2ed   : > { %v1244_v41 = vadd.f32 %v1998_v17, %v1243_v58  ;;  %v1258_v38 = vmul.f32 %v2000_v27, %v1257_v8 }
 0x2ef   : > { %v1248_v23 = vsel %vm1247_vm13, %v1998_v17, %v1244_v41  ;;  %v1259_v48 = vadd.f32 %v2000_v27, %v1258_v38 }
 0x2f0   : > { %v1253_v44 = vsel %vm1250_vm14, %v1252_v19, %v1248_v23 }
 0x2f1   : > { %v1263_v53 = vsel %vm1262_vm3, %v2000_v27, %v1259_v48 }
 0x2f2   : > { %v1268_v50 = vsel %vm1265_vm4, %v1267_v4, %v1263_v53 }
 0x2fa   : > { %v1628_v62 = vpop.f32.mrf.mxu1 }
 0x2fb   : > { %v1648_v36 = vmul.f32 %v1628_v62, %v1193_v47 }
 0x2fd   : > { %1656 = vst.msk [vmem:[%s2775_s30] sm:$0xff] %vm429_vm0, %v1648_v36  ;;  %v1143_v0 = vpop.f32.mrf.mxu2 }
 0x2fe   : > { %v1144_v47 = vadd.f32 %v2755_v15, %v1143_v0 }
 0x300   : > { %v1793_v9 = vmul.f32 -1.442695, %v1144_v47 }
 0x302   : > { %v1630_v10 = vpop.f32.mrf.mxu1  ;;  %2001 = vpow2.f32 %v1793_v9 }
 0x303   : > { %v1649_v28 = vmul.f32 %v1630_v10, %v1208_v55 }
 0x305   : > { %1657 = vst.msk [vmem:[%s2775_s30 + $0x8] sm:$0xff] %vm429_vm0, %v1649_v28  ;;  %v1145_v32 = vpop.f32.mrf.mxu2 }
 0x306   : > { %v1146_v29 = vadd.f32 %v2755_v15, %v1145_v32 }
 0x308   : > { %v1794_v61 = vmul.f32 -1.442695, %v1146_v29  ;;  %v2002_v30 = vpop.eup %2001 }
 0x309   : > { %v1178_v62 = vadd.f32 1.0, %v2002_v30 }
 0x30a   : > { %2003 = vpow2.f32 %v1794_v61 }
 0x30b   : > { %2005 = vrcp.f32 %v1178_v62  ;;  %vm1275_vm5 = vweird.f32 %v1178_v62  ;;  %v1281_v7 = vand.u32 2147483648, %v1178_v62  ;;  %v1279_v10 = vand.u32 2147483647, %v1178_v62 }
 0x30c   : > { %v1633_v37 = vpop.f32.mrf.mxu1 }
 0x30d   : > { %v1650_v33 = vmul.f32 %v1633_v37, %v1223_v18  ;;  %v1282_v28 = vor.u32 1.1754944e-38, %v1281_v7  ;;  %vm1280_vm8 = vcmp.eq.f32.partialorder %v1279_v10, 8.507059e+37 }
 0x30f   : > { %1658 = vst.msk [vmem:[%s2775_s30 + $0x10] sm:$0xff] %vm429_vm0, %v1650_v33 }
 0x310   : > { %v2004_v36 = vpop.eup %2003 }
 0x311   : > { %v1179_v54 = vadd.f32 1.0, %v2004_v36  ;;  %v2006_v26 = vpop.eup %2005 }
 0x312   : > { %v1271_v63 = vmul.f32 %v2006_v26, %v1178_v62  ;;  %vm1276_vm6 = vweird.f32 %v2006_v26 }
 0x313   : > { %2007 = vrcp.f32 %v1179_v54  ;;  %vm1277_vm7 = vmor %vm1275_vm5, %vm1276_vm6  ;;  %vm1290_vm9 = vweird.f32 %v1179_v54  ;;  %v1296_v59 = vand.u32 2147483648, %v1179_v54  ;;  %v1294_v16 = vand.u32 2147483647, %v1179_v54 }
 0x314   : > { %v1635_v34 = vpop.f32.mrf.mxu1  ;;  %v1272_v2 = vsub.f32 1.0, %v1271_v63 }
 0x315   : > { %v1651_v35 = vmul.f32 %v1635_v34, %v1238_v49  ;;  %v1297_v45 = vor.u32 1.1754944e-38, %v1296_v59  ;;  %vm1295_vm11 = vcmp.eq.f32.partialorder %v1294_v16, 8.507059e+37 }
 0x316   : > { %v1273_v55 = vmul.f32 %v2006_v26, %v1272_v2 }
 0x317   : > { %1659 = vst.msk [vmem:[%s2775_s30 + $0x18] sm:$0xff] %vm429_vm0, %v1651_v35 }
 0x318   : > { %v1274_v13 = vadd.f32 %v2006_v26, %v1273_v55 }
 0x319   : > { %v2008_v57 = vpop.eup %2007 }
 0x31a   : > { %v1286_v5 = vmul.f32 %v2008_v57, %v1179_v54  ;;  %v1278_v11 = vsel %vm1277_vm7, %v2006_v26, %v1274_v13  ;;  %vm1291_vm10 = vweird.f32 %v2008_v57 }
 0x31b   : > { %v1283_v43 = vsel %vm1280_vm8, %v1282_v28, %v1278_v11  ;;  %vm1292_vm15 = vmor %vm1290_vm9, %vm1291_vm10 }
 0x31c   : > { %v1638_v56 = vpop.f32.mrf.mxu1  ;;  %v1287_v15 = vsub.f32 1.0, %v1286_v5 }
 0x31d   : > { %v1652_v52 = vmul.f32 %v1638_v56, %v1253_v44 }
 0x31e   : > { %v1288_v31 = vmul.f32 %v2008_v57, %v1287_v15 }
 0x31f   : > { %1660 = vst.msk [vmem:[%s2775_s30 + $0x20] sm:$0xff] %vm429_vm0, %v1652_v52 }
 0x320   : > { %v1289_v25 = vadd.f32 %v2008_v57, %v1288_v31 }
 0x322   : > { %v1293_v22 = vsel %vm1292_vm15, %v2008_v57, %v1289_v25 }
 0x323   : > { %v1298_v18 = vsel %vm1295_vm11, %v1297_v45, %v1293_v22 }
 0x324   : > { %v1640_v21 = vpop.f32.mrf.mxu1 }
 0x325   : > { %v1653_v46 = vmul.f32 %v1640_v21, %v1268_v50 }
 0x327   : > { %1661 = vst.msk [vmem:[%s2775_s30 + $0x28] sm:$0xff] %vm429_vm0, %v1653_v46 }
 0x356   : > { %v1643_v12 = vpop.f32.mrf.mxu1 }
 0x357   : > { %v1654_v17 = vmul.f32 %v1643_v12, %v1283_v43 }
 0x359   : > { %1662 = vst.msk [vmem:[%s2775_s30 + $0x30] sm:$0xff] %vm429_vm0, %v1654_v17 }
 0x35e   : > { %v1645_v6 = vpop.f32.mrf.mxu1 }
 0x35f   : > { %v1655_v20 = vmul.f32 %v1645_v6, %v1298_v18 }
 0x361   : > { %1663 = vst.msk [vmem:[%s2775_s30 + $0x38] sm:$0xff] %vm429_vm0, %v1655_v20 }
 0x362 PF: > { %s21_s17 = sadd.s32 1, %s2023_s17  }
 0x363   : > { %p18_p4 = scmp.ge.s32.totalorder %s21_s17, 4  }
 0x365   :  { %20 = sbr.rel (!%p18_p4) target bundleno = 1 (0x1), region = 97 }

// kernel: _transition_block_impl.1
= control target key start
LH: loop header
LB: loop body
LE: loop exit
PB: predicated region body
PF: predicated region fallthrough
CT: control target
= control target key end

     0   :  { %s2086_s17 = smov 0   ;;  %s2805_s0 = inlined_call_operand.vmem [shape: f32[128,32], index: 0, kind: input, shape index: {}]   ;;  %s2806_s1 = inlined_call_operand.vmem [shape: f32[128,32], index: 1, kind: input, shape index: {}]   ;;  %s2807_s2 = inlined_call_operand.vmem [shape: f32[1,32], index: 2, kind: input, shape index: {}]   ;;  %s2808_s3 = inlined_call_operand.vmem [shape: bf16[32,32], index: 3, kind: input, shape index: {}]   ;;  %s2809_s4 = inlined_call_operand.vmem [shape: f32[1,32], index: 4, kind: input, shape index: {}]   ;;  %s2810_s5 = inlined_call_operand.vmem [shape: bf16[32,32], index: 5, kind: input, shape index: {}]   ;;  %s2811_s6 = inlined_call_operand.vmem [shape: bf16[32,64], index: 6, kind: input, shape index: {}]   ;;  %s2812_s7 = inlined_call_operand.vmem [shape: bf16[32,64], index: 7, kind: input, shape index: {}]   ;;  %s2813_s8 = inlined_call_operand.vmem [shape: bf16[64,32], index: 8, kind: input, shape index: {}]   ;;  %s2814_s9 = inlined_call_operand.vmem [shape: bf16[32,32], index: 9, kind: input, shape index: {}]   ;;  %s2815_s10 = inlined_call_operand.vmem [shape: f32[1,32], index: 10, kind: input, shape index: {}]   ;;  %s2816_s11 = inlined_call_operand.vmem [shape: f32[128,32], index: 11, kind: output, shape index: {}]  }
   0x1 LB: > { %s1732_s18 = sadd.s32 4294967295, %s2023_s17   ;;  %p1736_p0 = scmp.ge.s32.totalorder %s2023_s17, 1  ;;  %s2023_s17 = sphi %s2086_s17, %s21_s17  }
   0x2   : > { %p349_p1 = scmp.lt.s32.totalorder %s2023_s17, 3 }
   0x4   : > { %p350_p2 = pnand %p1736_p0, %p349_p1 }
   0x5   : > { %s1737_s19 = sshll.u32 (!%p350_p2), %s1732_s18, 3 }
   0x6   : > { %353 = sbr.rel (%p350_p2) target bundleno = 866 (0x362), region = 64  ;;  %p395_p3 = scmp.lt.s32.totalorder (!%p350_p2), %s1737_s19, 15 }
   0xb   : > { %s2848_s19 = smov (!%p395_p3, %s1737_s19), 15  ;;  %vm429_vm0 = vcmask 261120   ;;  %v2025_v16 = vmov 32.0  }
   0xc   : > { %s2094_s20 = sshll.u32 %s2848_s19, 3  ;;  %1879 = vrcp.f32 %v2025_v16 }
   0xd   : > { %s2100_s23 = scalar_lea.vmem %s2806_s1, %s2094_s20  ;;  %s2154_s26 = scalar_lea.vmem %s2805_s0, %s2094_s20 }
   0xe   : > { %v425_v0 = vld [vmem:[%s2100_s23 + $0x20] sm:$0xff]  ;;  %v423_v1 = vld [vmem:[%s2100_s23 + $0x10] sm:$0xff]  ;;  %v426_v6 = vld [vmem:[%s2100_s23 + $0x28] sm:$0xff]  ;;  %s2775_s30 = scalar_lea.vmem %s2816_s11, %s2094_s20 }
   0xf   : > { %v421_v2 = vld [vmem:[%s2100_s23] sm:$0xff]  ;;  %v625_v3 = vsel %vm429_vm0, %v425_v0, 0.0  ;;  %v619_v4 = vsel %vm429_vm0, %v423_v1, 0.0  ;;  %v424_v7 = vld [vmem:[%s2100_s23 + $0x18] sm:$0xff]  ;;  %v422_v8 = vld [vmem:[%s2100_s23 + $0x8] sm:$0xff]  ;;  %v628_v9 = vsel %vm429_vm0, %v426_v6, 0.0 }
  0x10   : > { %v613_v5 = vsel %vm429_vm0, %v421_v2, 0.0  ;;  %626 = vadd.xlane.f32.xlu2 %v625_v3  ;;  %620 = vadd.xlane.f32.xlu1 %v619_v4  ;;  %v622_v10 = vsel %vm429_vm0, %v424_v7, 0.0  ;;  %v616_v11 = vsel %vm429_vm0, %v422_v8, 0.0  ;;  %v428_v12 = vld [vmem:[%s2100_s23 + $0x38] sm:$0xff]  ;;  %v427_v13 = vld [vmem:[%s2100_s23 + $0x30] sm:$0xff]  ;;  %v2162_v55 = vld [vmem:[%s2154_s26] sm:$0xff] }
  0x11   : > { %614 = vadd.xlane.f32.xlu0 %v613_v5  ;;  %v634_v14 = vsel %vm429_vm0, %v428_v12, 0.0  ;;  %v631_v15 = vsel %vm429_vm0, %v427_v13, 0.0  ;;  %v430_v58 = vsel %vm429_vm0, %v2162_v55, 0.0  ;;  %v2190_v5 = vld [vmem:[%s2154_s26 + $0x10] sm:$0xff] }
  0x12   : > { %v1880_v17 = vpop.eup %1879 }
  0x13   : > { %v455_v18 = vmul.f32 32.0, %v1880_v17  ;;  %vm459_vm1 = vweird.f32 %v1880_v17 }
  0x15   : > { %v456_v19 = vsub.f32 1.0, %v455_v18 }
  0x17   : > { %v457_v20 = vmul.f32 %v1880_v17, %v456_v19 }
  0x18   : > { %629 = vadd.xlane.f32.xlu2 %v628_v9  ;;  %623 = vadd.xlane.f32.xlu1 %v622_v10  ;;  %v2200_v9 = vld [vmem:[%s2154_s26 + $0x28] sm:$0xff] }
  0x19   : > { %617 = vadd.xlane.f32.xlu0 %v616_v11  ;;  %v458_v21 = vadd.f32 %v1880_v17, %v457_v20  ;;  %v445_v10 = vsel %vm429_vm0, %v2200_v9, 0.0  ;;  %v2205_v11 = vld [vmem:[%s2154_s26 + $0x30] sm:$0xff]  ;;  %v1849_v20 = vld [vmem:[%s2808_s3] sm:$0xff] }
  0x1b   : > { %v2118_v22 = vsel %vm459_vm1, %v1880_v17, %v458_v21  ;;  %v1851_v21 = vld [vmem:[%s2810_s5] sm:$0xff] }
  0x20   : > { %635 = vadd.xlane.f32.xlu1 %v634_v14  ;;  %v1850_v14 = vld [vmem:[%s2808_s3 + $0x8] sm:$0xff] }
  0x21   : > { %632 = vadd.xlane.f32.xlu0 %v631_v15  ;;  %v1852_v15 = vld [vmem:[%s2810_s5 + $0x8] sm:$0xff]  ;;  %843 = vmatpush.bf16.msra.mxu0 %v1850_v14 }
  0x22   : > { %888 = vmatpush.bf16.msra.mxu1 %v1852_v15  ;;  %1863 = vmatpush.bf16.msra.mxu2 %v1850_v14 }
  0x23   : > { %1865 = vmatpush.bf16.msra.mxu3 %v1852_v15 }
  0x25   : > { %844 = vmatpush.bf16.msra.mxu0 %v1849_v20 }
  0x26   : > { %889 = vmatpush.bf16.msra.mxu1 %v1851_v21  ;;  %1864 = vmatpush.bf16.msra.mxu2 %v1849_v20 }
  0x27   : > { %1866 = vmatpush.bf16.msra.mxu3 %v1851_v21 }
  0x83   : > { %v627_v23 = vpop.xlane.xlu2 %626  ;;  %v621_v24 = vpop.xlane.xlu1 %620 }
  0x84   : > { %v639_v25 = vmul.f32 %v621_v24, %v2118_v22  ;;  %v615_v26 = vpop.xlane.xlu0 %614  ;;  %v641_v42 = vmul.f32 %v627_v23, %v2118_v22 }
  0x85   : > { %v637_v27 = vmul.f32 %v615_v26, %v2118_v22 }
  0x86   : > { %v2122_v28 = vsub.f32 %v423_v1, %v639_v25  ;;  %v2156_v49 = vsub.f32 %v425_v0, %v641_v42  ;;  %v2179_v0 = vld [vmem:[%s2154_s26 + $0x18] sm:$0xff]  ;;  %v2182_v1 = vld [vmem:[%s2154_s26 + $0x8] sm:$0xff] }
  0x87   : > { %v2124_v29 = vsub.f32 %v421_v2, %v637_v27  ;;  %v439_v2 = vsel %vm429_vm0, %v2179_v0, 0.0  ;;  %v433_v4 = vsel %vm429_vm0, %v2182_v1, 0.0 }
  0x88   : > { %v655_v30 = vmul.f32 %v2122_v28, %v2122_v28  ;;  %v657_v57 = vmul.f32 %v2156_v49, %v2156_v49 }
  0x89   : > { %v653_v31 = vmul.f32 %v2124_v29, %v2124_v29 }
  0x8a   : > { %v667_v32 = vsel %vm429_vm0, %v655_v30, 0.0  ;;  %v673_v61 = vsel %vm429_vm0, %v657_v57, 0.0 }
  0x8b   : > { %v630_v33 = vpop.xlane.xlu2 %629  ;;  %668 = vadd.xlane.f32.xlu1 %v667_v32  ;;  %v624_v34 = vpop.xlane.xlu1 %623  ;;  %v661_v35 = vsel %vm429_vm0, %v653_v31, 0.0 }
  0x8c   : > { %v642_v36 = vmul.f32 %v630_v33, %v2118_v22  ;;  %v640_v37 = vmul.f32 %v624_v34, %v2118_v22  ;;  %662 = vadd.xlane.f32.xlu2 %v661_v35  ;;  %v618_v38 = vpop.xlane.xlu0 %617 }
  0x8d   : > { %v638_v39 = vmul.f32 %v618_v38, %v2118_v22 }
  0x8e   : > { %v2135_v40 = vsub.f32 %v426_v6, %v642_v36  ;;  %v2137_v41 = vsub.f32 %v424_v7, %v640_v37  ;;  %v2193_v6 = vld [vmem:[%s2154_s26 + $0x20] sm:$0xff]  ;;  %v436_v7 = vsel %vm429_vm0, %v2190_v5, 0.0 }
  0x8f   : > { %v2140_v43 = vsub.f32 %v422_v8, %v638_v39  ;;  %v442_v8 = vsel %vm429_vm0, %v2193_v6, 0.0 }
  0x90   : > { %v658_v44 = vmul.f32 %v2135_v40, %v2135_v40  ;;  %v656_v45 = vmul.f32 %v2137_v41, %v2137_v41 }
  0x91   : > { %v654_v46 = vmul.f32 %v2140_v43, %v2140_v43 }
  0x92   : > { %v676_v47 = vsel %vm429_vm0, %v658_v44, 0.0  ;;  %v670_v48 = vsel %vm429_vm0, %v656_v45, 0.0 }
  0x93   : > { %677 = vadd.xlane.f32.xlu1 %v676_v47  ;;  %v664_v50 = vsel %vm429_vm0, %v654_v46, 0.0  ;;  %v636_v51 = vpop.xlane.xlu1 %635 }
  0x94   : > { %671 = vadd.xlane.f32.xlu2 %v670_v48  ;;  %665 = vadd.xlane.f32.xlu0 %v664_v50  ;;  %v633_v52 = vpop.xlane.xlu0 %632  ;;  %v644_v54 = vmul.f32 %v636_v51, %v2118_v22 }
  0x95   : > { %v643_v53 = vmul.f32 %v633_v52, %v2118_v22 }
  0x96   : > { %v2170_v59 = vsub.f32 %v428_v12, %v644_v54  ;;  %v448_v12 = vsel %vm429_vm0, %v2205_v11, 0.0 }
  0x97   : > { %v2164_v56 = vsub.f32 %v427_v13, %v643_v53 }
  0x98   : > { %v660_v63 = vmul.f32 %v2170_v59, %v2170_v59 }
  0x99   : > { %v659_v60 = vmul.f32 %v2164_v56, %v2164_v56 }
  0x9a   : > { %v682_v3 = vsel %vm429_vm0, %v660_v63, 0.0 }
  0x9b   : > { %v679_v62 = vsel %vm429_vm0, %v659_v60, 0.0  ;;  %431 = vadd.xlane.f32.xlu1 %v430_v58 }
  0x9c   : > { %674 = vadd.xlane.f32.xlu0 %v673_v61  ;;  %680 = vadd.xlane.f32.xlu2 %v679_v62 }
  0xa3   : > { %440 = vadd.xlane.f32.xlu1 %v439_v2 }
  0xa4   : > { %683 = vadd.xlane.f32.xlu0 %v682_v3  ;;  %434 = vadd.xlane.f32.xlu2 %v433_v4 }
  0xac   : > { %437 = vadd.xlane.f32.xlu0 %v436_v7  ;;  %443 = vadd.xlane.f32.xlu2 %v442_v8 }
  0xb4   : > { %446 = vadd.xlane.f32.xlu0 %v445_v10 }
  0xbc   : > { %449 = vadd.xlane.f32.xlu0 %v448_v12 }
  0xfe   : > { %v669_v13 = vpop.xlane.xlu1 %668 }
  0xff   : > { %v663_v16 = vpop.xlane.xlu2 %662  ;;  %v687_v18 = vmul.f32 %v669_v13, %v2118_v22 }
 0x100   : > { %v685_v17 = vmul.f32 %v663_v16, %v2118_v22 }
 0x101   : > { %v2223_v23 = vadd.f32 1e-05, %v687_v18 }
 0x102   : > { %v693_v19 = vadd.f32 1e-05, %v685_v17 }
 0x104   : > { %1881 = vrsqrt.f32 %v693_v19  ;;  %vm707_vm2 = vweird.f32 %v693_v19 }
 0x105   : > { %1883 = vrsqrt.f32 %v2223_v23 }
 0x106   : > { %v678_v24 = vpop.xlane.xlu1 %677 }
 0x107   : > { %v690_v25 = vmul.f32 %v678_v24, %v2118_v22  ;;  %v672_v26 = vpop.xlane.xlu2 %671  ;;  %v666_v27 = vpop.xlane.xlu0 %665 }
 0x108   : > { %v688_v30 = vmul.f32 %v672_v26, %v2118_v22  ;;  %v686_v31 = vmul.f32 %v666_v27, %v2118_v22 }
 0x109   : > { %v2228_v32 = vadd.f32 1e-05, %v690_v25 }
 0x10a   : > { %v2230_v33 = vpop.eup %1881  ;;  %v2233_v34 = vadd.f32 1e-05, %v688_v30  ;;  %v694_v35 = vadd.f32 1e-05, %v686_v31 }
 0x10b   : > { %v702_v36 = vmul.f32 %v2230_v33, %v693_v19  ;;  %1885 = vrsqrt.f32 %v2228_v32  ;;  %v2240_v46 = vpop.eup %1883  ;;  %vm708_vm3 = vweird.f32 %v2230_v33  ;;  %v2277_v19 = vld [vmem:[%s2154_s26 + $0x38] sm:$0xff]  ;;  %vm757_vm8 = vweird.f32 %v2228_v32 }
 0x10c   : > { %1887 = vrsqrt.f32 %v2233_v34  ;;  %v722_v2 = vmul.f32 %v2240_v46, %v2223_v23  ;;  %vm2265_vm4 = vmor %vm707_vm2, %vm708_vm3  ;;  %vm717_vm5 = vweird.f32 %v694_v35  ;;  %vm737_vm9 = vweird.f32 %v2233_v34 }
 0x10d   : > { %v703_v37 = vmul.f32 %v2230_v33, %v702_v36  ;;  %1889 = vrsqrt.f32 %v694_v35  ;;  %vm728_vm14 = vweird.f32 %v2240_v46  ;;  %vm727_vm3 = vweird.f32 %v2223_v23 }
 0x10e   : > { %v432_v38 = vpop.xlane.xlu1 %431  ;;  %v723_v20 = vmul.f32 %v2240_v46, %v722_v2 }
 0x10f   : > { %v704_v39 = vmul.f32 0.5, %v703_v37  ;;  %v681_v42 = vpop.xlane.xlu2 %680  ;;  %v675_v44 = vpop.xlane.xlu0 %674  ;;  %v461_v45 = vmul.f32 %v2118_v22, %v432_v38 }
 0x110   : > { %v691_v47 = vmul.f32 %v681_v42, %v2118_v22  ;;  %v689_v48 = vmul.f32 %v675_v44, %v2118_v22  ;;  %v724_v42 = vmul.f32 0.5, %v723_v20 }
 0x111   : > { %v2244_v50 = vpop.eup %1885  ;;  %v705_v51 = vsub.f32 1.5, %v704_v39  ;;  %v2256_v60 = vsub.f32 %v2162_v55, %v461_v45  ;;  %v2315_v45 = vld [vmem:[%s2807_s2] ss:$0 sm:$0xff] }
 0x112   : > { %v2246_v52 = vpop.eup %1887  ;;  %v752_v53 = vmul.f32 %v2244_v50, %v2228_v32  ;;  %v2250_v54 = vadd.f32 1e-05, %v691_v47  ;;  %v2253_v58 = vadd.f32 1e-05, %v689_v48  ;;  %vm758_vm10 = vweird.f32 %v2244_v50 }
 0x113   : > { %v1890_v57 = vpop.eup %1889  ;;  %v732_v62 = vmul.f32 %v2246_v52, %v2233_v34  ;;  %v706_v3 = vmul.f32 %v2230_v33, %v705_v51  ;;  %v477_v13 = vmul.f32 %v2256_v60, %v2256_v60  ;;  %vm2335_vm11 = vmor %vm757_vm8, %vm758_vm10  ;;  %vm738_vm12 = vweird.f32 %v2246_v52 }
 0x114   : > { %v753_v61 = vmul.f32 %v2244_v50, %v752_v53  ;;  %v712_v63 = vmul.f32 %v1890_v57, %v694_v35  ;;  %1891 = vrsqrt.f32 %v2250_v54  ;;  %vm718_vm6 = vweird.f32 %v1890_v57  ;;  %vm2364_vm15 = vmor %vm737_vm9, %vm738_vm12 }
 0x115   : > { %1893 = vrsqrt.f32 %v2253_v58  ;;  %v733_v15 = vmul.f32 %v2246_v52, %v732_v62  ;;  %v710_v21 = vsel %vm2265_vm4, %v2230_v33, %v706_v3  ;;  %v485_v24 = vsel %vm429_vm0, %v477_v13, 0.0  ;;  %vm2296_vm7 = vmor %vm717_vm5, %vm718_vm6 }
 0x116   : > { %v754_v55 = vmul.f32 0.5, %v753_v61  ;;  %v713_v7 = vmul.f32 %v1890_v57, %v712_v63  ;;  %v441_v8 = vpop.xlane.xlu1 %440  ;;  %486 = vadd.xlane.f32.xlu1 %v485_v24  ;;  %v781_v44 = vmul.f32 %v710_v21, %v2124_v29  ;;  %vm747_vm1 = vweird.f32 %v2253_v58  ;;  %vm2382_vm4 = vmor %vm727_vm3, %vm728_vm14 }
 0x117   : > { %v684_v10 = vpop.xlane.xlu0 %683  ;;  %v435_v12 = vpop.xlane.xlu2 %434  ;;  %v464_v14 = vmul.f32 %v2118_v22, %v441_v8 }
 0x118   : > { %v714_v16 = vmul.f32 0.5, %v713_v7  ;;  %v692_v17 = vmul.f32 %v684_v10, %v2118_v22  ;;  %v462_v18 = vmul.f32 %v2118_v22, %v435_v12  ;;  %v755_v26 = vsub.f32 1.5, %v754_v55 }
 0x119   : > { %v2285_v25 = vsub.f32 %v2179_v0, %v464_v14  ;;  %v451_v0 = vsel %vm429_vm0, %v2277_v19, 0.0  ;;  %v725_v7 = vsub.f32 1.5, %v724_v42 }
 0x11a   : > { %v715_v27 = vsub.f32 1.5, %v714_v16  ;;  %v2287_v30 = vadd.f32 1e-05, %v692_v17  ;;  %v2290_v31 = vsub.f32 %v2182_v1, %v462_v18  ;;  %v2292_v36 = vpop.eup %1891  ;;  %v734_v1 = vmul.f32 0.5, %v733_v15 }
 0x11b   : > { %v480_v33 = vmul.f32 %v2285_v25, %v2285_v25  ;;  %v2304_v38 = vpop.eup %1893  ;;  %v756_v47 = vmul.f32 %v2244_v50, %v755_v26  ;;  %v762_v53 = vmul.f32 %v2292_v36, %v2250_v54  ;;  %v726_v20 = vmul.f32 %v2240_v46, %v725_v7 }
 0x11c   : > { %v716_v39 = vmul.f32 %v1890_v57, %v715_v27  ;;  %v742_v35 = vmul.f32 %v2304_v38, %v2253_v58  ;;  %1895 = vrsqrt.f32 %v2287_v30  ;;  %v478_v51 = vmul.f32 %v2290_v31, %v2290_v31 }
 0x11d   : > { %v494_v63 = vsel %vm429_vm0, %v480_v33, 0.0  ;;  %v735_v3 = vsub.f32 1.5, %v734_v1  ;;  %v760_v13 = vsel %vm2335_vm11, %v2244_v50, %v756_v47  ;;  %v763_v16 = vmul.f32 %v2292_v36, %v762_v53 }
 0x11e   : > { %v720_v48 = vsel %vm2296_vm7, %v1890_v57, %v716_v39  ;;  %v743_v29 = vmul.f32 %v2304_v38, %v742_v35  ;;  %v488_v55 = vsel %vm429_vm0, %v478_v51, 0.0  ;;  %495 = vadd.xlane.f32.xlu0 %v494_v63  ;;  %452 = vadd.xlane.f32.xlu1 %v451_v0  ;;  %vm748_vm13 = vweird.f32 %v2304_v38 }
 0x11f   : > { %v438_v61 = vpop.xlane.xlu0 %437  ;;  %v444_v62 = vpop.xlane.xlu2 %443  ;;  %v782_v2 = vmul.f32 %v720_v48, %v2140_v43  ;;  %489 = vadd.xlane.f32.xlu2 %v488_v55  ;;  %v793_v43 = vmul.f32 %v2315_v45, %v781_v44  ;;  %v736_v50 = vmul.f32 %v2246_v52, %v735_v3  ;;  %vm749_vm2 = vmor %vm747_vm1, %vm748_vm13  ;;  %v786_v37 = vmul.f32 %v760_v13, %v2135_v40 }
 0x120   : > { %v463_v4 = vmul.f32 %v2118_v22, %v438_v61  ;;  %v465_v57 = vmul.f32 %v2118_v22, %v444_v62  ;;  %v744_v10 = vmul.f32 0.5, %v743_v29  ;;  %v764_v0 = vmul.f32 0.5, %v763_v16 }
 0x121   : > { %v794_v12 = vmul.f32 %v2315_v45, %v782_v2  ;;  %v740_v42 = vsel %vm2364_vm15, %v2246_v52, %v736_v50  ;;  %v798_v51 = vmul.f32 %v2315_v45, %v786_v37  ;;  %vm777_vm5 = vweird.f32 %v2287_v30 }
 0x122   : > { %v2346_v14 = vsub.f32 %v2190_v5, %v463_v4  ;;  %v2349_v32 = vsub.f32 %v2193_v6, %v465_v57  ;;  %v2351_v15 = vpop.eup %1895  ;;  %v745_v17 = vsub.f32 1.5, %v744_v10  ;;  %v765_v52 = vsub.f32 1.5, %v764_v0 }
 0x123   : > { %v801_v18 = vpack.c.bf16 %v794_v12, %v793_v43  ;;  %v772_v5 = vmul.f32 %v2351_v15, %v2287_v30  ;;  %vm778_vm6 = vweird.f32 %v2351_v15  ;;  %vm767_vm7 = vweird.f32 %v2250_v54 }
 0x124   : > { %v479_v6 = vmul.f32 %v2346_v14, %v2346_v14  ;;  %v746_v24 = vmul.f32 %v2304_v38, %v745_v17  ;;  %v481_v26 = vmul.f32 %v2349_v32, %v2349_v32  ;;  %vm768_vm8 = vweird.f32 %v2292_v36  ;;  %vm2408_vm9 = vmor %vm777_vm5, %vm778_vm6 }
 0x125   : > { %1751 = vmatmul.msk.bf16.vlgmr.msra.gmra.mxu0 %vm429_vm0, %v801_v18  ;;  %1763 = vmatmul.msk.bf16.vlgmr.msra.gmra.mxu1 %vm429_vm0, %v801_v18  ;;  %v773_v27 = vmul.f32 %v2351_v15, %v772_v5  ;;  %v766_v30 = vmul.f32 %v2292_v36, %v765_v52  ;;  %vm769_vm10 = vmor %vm767_vm7, %vm768_vm8  ;;  %v2451_v5 = vld [vmem:[%s2809_s4] ss:$0 sm:$0xff] }
 0x126   : > { %v491_v34 = vsel %vm429_vm0, %v479_v6, 0.0  ;;  %v750_v33 = vsel %vm749_vm2, %v2304_v38, %v746_v24  ;;  %v497_v1 = vsel %vm429_vm0, %v481_v26, 0.0  ;;  %v730_v38 = vsel %vm2382_vm4, %v2240_v46, %v726_v20 }
 0x127   : > { %v447_v58 = vpop.xlane.xlu0 %446  ;;  %v774_v35 = vmul.f32 0.5, %v773_v27  ;;  %v785_v23 = vmul.f32 %v750_v33, %v2156_v49  ;;  %492 = vadd.xlane.f32.xlu2 %v491_v34  ;;  %498 = vadd.xlane.f32.xlu1 %v497_v1  ;;  %v784_v49 = vmul.f32 %v740_v42, %v2137_v41  ;;  %v783_v29 = vmul.f32 %v730_v38, %v2122_v28  ;;  %v1858_v38 = vld [vmem:[%s2812_s7 + $0x8] sm:$0xff] }
 0x128   : > { %v466_v40 = vmul.f32 %v2118_v22, %v447_v58  ;;  %v770_v4 = vsel %vm769_vm10, %v2292_v36, %v766_v30  ;;  %1379 = vmatpush.bf16.msrb.mxu0 %v1858_v38 }
 0x129   : > { %v775_v44 = vsub.f32 1.5, %v774_v35  ;;  %v797_v48 = vmul.f32 %v2315_v45, %v785_v23  ;;  %v796_v54 = vmul.f32 %v2315_v45, %v784_v49  ;;  %v795_v2 = vmul.f32 %v2315_v45, %v783_v29  ;;  %v1856_v23 = vld [vmem:[%s2811_s6 + $0x8] sm:$0xff]  ;;  %v1857_v29 = vld [vmem:[%s2812_s7] sm:$0xff] }
 0x12a   : > { %v2395_v47 = vsub.f32 %v2200_v9, %v466_v40  ;;  %v787_v10 = vmul.f32 %v770_v4, %v2164_v56  ;;  %1334 = vmatpush.bf16.msrb.mxu3 %v1856_v23 }
 0x12b   : > { %v803_v53 = vpack.c.bf16 %v798_v51, %v797_v48  ;;  %v776_v9 = vmul.f32 %v2351_v15, %v775_v44  ;;  %v802_v55 = vpack.c.bf16 %v796_v54, %v795_v2 }
 0x12c   : > { %v482_v46 = vmul.f32 %v2395_v47, %v2395_v47  ;;  %v799_v43 = vmul.f32 %v2315_v45, %v787_v10  ;;  %1380 = vmatpush.bf16.msrb.mxu0 %v1857_v29 }
 0x12d   : > { %1753 = vmatmul.msk.bf16.vlgmr.msra.gmra.mxu2 %vm429_vm0, %v803_v53  ;;  %1765 = vmatmul.msk.bf16.vlgmr.msra.gmra.mxu3 %vm429_vm0, %v803_v53  ;;  %v780_v28 = vsel %vm2408_vm9, %v2351_v15, %v776_v9  ;;  %v1855_v9 = vld [vmem:[%s2811_s6] sm:$0xff] }
 0x12e   : > { %v500_v41 = vsel %vm429_vm0, %v482_v46, 0.0  ;;  %v788_v7 = vmul.f32 %v780_v28, %v2170_v59  ;;  %1335 = vmatpush.bf16.msrb.mxu3 %v1855_v9 }
 0x12f   : > { %v450_v62 = vpop.xlane.xlu0 %449  ;;  %501 = vadd.xlane.f32.xlu2 %v500_v41 }
 0x130   : > { %v467_v63 = vmul.f32 %v2118_v22, %v450_v62 }
 0x132   : > { %v2423_v3 = vsub.f32 %v2205_v11, %v467_v63  ;;  %v800_v11 = vmul.f32 %v2315_v45, %v788_v7 }
 0x134   : > { %v483_v57 = vmul.f32 %v2423_v3, %v2423_v3  ;;  %v804_v36 = vpack.c.bf16 %v800_v11, %v799_v43 }
 0x135   : > { %1752 = vmatmul.msk.bf16.gmra.mxu0 %vm429_vm0, %v802_v55  ;;  %1764 = vmatmul.msk.bf16.gmra.mxu1 %vm429_vm0, %v802_v55 }
 0x136   : > { %v503_v8 = vsel %vm429_vm0, %v483_v57, 0.0 }
 0x137   : > { %504 = vadd.xlane.f32.xlu0 %v503_v8 }
 0x13d   : > { %1754 = vmatmul.msk.bf16.gmra.mxu2 %vm429_vm0, %v804_v36  ;;  %1766 = vmatmul.msk.bf16.gmra.mxu3 %vm429_vm0, %v804_v36 }
 0x189   : > { %v487_v12 = vpop.xlane.xlu1 %486 }
 0x18a   : > { %v509_v17 = vmul.f32 %v487_v12, %v2118_v22 }
 0x18c   : > { %v2446_v50 = vadd.f32 1e-05, %v509_v17 }
 0x18e   : > { %1897 = vrsqrt.f32 %v2446_v50  ;;  %vm531_vm11 = vweird.f32 %v2446_v50 }
 0x191   : > { %v453_v59 = vpop.xlane.xlu1 %452  ;;  %v496_v27 = vpop.xlane.xlu0 %495 }
 0x192   : > { %v468_v13 = vmul.f32 %v2118_v22, %v453_v59  ;;  %v490_v16 = vpop.xlane.xlu2 %489  ;;  %v512_v39 = vmul.f32 %v496_v27, %v2118_v22 }
 0x193   : > { %v510_v45 = vmul.f32 %v490_v16, %v2118_v22 }
 0x194   : > { %v2439_v15 = vsub.f32 %v2277_v19, %v468_v13  ;;  %v2458_v24 = vpop.eup %1897  ;;  %v2480_v51 = vadd.f32 1e-05, %v512_v39 }
 0x195   : > { %v2453_v19 = vadd.f32 1e-05, %v510_v45  ;;  %v526_v33 = vmul.f32 %v2458_v24, %v2446_v50  ;;  %vm532_vm12 = vweird.f32 %v2458_v24 }
 0x196   : > { %v484_v56 = vmul.f32 %v2439_v15, %v2439_v15  ;;  %vm2521_vm1 = vmor %vm531_vm11, %vm532_vm12  ;;  %vm561_vm10 = vweird.f32 %v2480_v51 }
 0x197   : > { %1899 = vrsqrt.f32 %v2453_v19  ;;  %v527_v44 = vmul.f32 %v2458_v24, %v526_v33  ;;  %vm541_vm13 = vweird.f32 %v2453_v19 }
 0x198   : > { %v506_v18 = vsel %vm429_vm0, %v484_v56, 0.0 }
 0x199   : > { %507 = vadd.xlane.f32.xlu1 %v506_v18  ;;  %v528_v61 = vmul.f32 0.5, %v527_v44 }
 0x19a   : > { %v493_v37 = vpop.xlane.xlu2 %492  ;;  %v499_v18 = vpop.xlane.xlu1 %498 }
 0x19b   : > { %v511_v35 = vmul.f32 %v493_v37, %v2118_v22  ;;  %v529_v4 = vsub.f32 1.5, %v528_v61  ;;  %v513_v39 = vmul.f32 %v499_v18, %v2118_v22 }
 0x19d   : > { %v2460_v26 = vpop.eup %1899  ;;  %v2482_v49 = vadd.f32 1e-05, %v511_v35  ;;  %v530_v16 = vmul.f32 %v2458_v24, %v529_v4 }
 0x19e   : > { %v536_v1 = vmul.f32 %v2460_v26, %v2453_v19  ;;  %vm542_vm14 = vweird.f32 %v2460_v26 }
 0x19f   : > { %vm2533_vm2 = vmor %vm541_vm13, %vm542_vm14  ;;  %vm551_vm12 = vweird.f32 %v2482_v49 }
 0x1a0   : > { %v537_v48 = vmul.f32 %v2460_v26, %v536_v1 }
 0x1a2   : > { %v846_v6 = vpop.f32.mrf.mxu0  ;;  %v538_v30 = vmul.f32 0.5, %v537_v48  ;;  %v502_v7 = vpop.xlane.xlu2 %501 }
 0x1a3   : > { %v847_v20 = vadd.f32 %v2451_v5, %v846_v6  ;;  %v514_v56 = vmul.f32 %v502_v7, %v2118_v22  ;;  %v891_v35 = vpop.f32.mrf.mxu1 }
 0x1a4   : > { %v539_v55 = vsub.f32 1.5, %v538_v30 }
 0x1a5   : > { %v1767_v21 = vmul.f32 -1.442695, %v847_v20 }
 0x1a6   : > { %v540_v20 = vmul.f32 %v2460_v26, %v539_v55 }
 0x1a7   : > { %1901 = vpow2.f32 %v1767_v21 }
 0x1a8   : > { %v544_v48 = vsel %vm2533_vm2, %v2460_v26, %v540_v20 }
 0x1aa   : > { %v848_v34 = vpop.f32.mrf.mxu0 }
 0x1ab   : > { %v849_v0 = vadd.f32 %v2451_v5, %v848_v34 }
 0x1ad   : > { %v1902_v58 = vpop.eup %1901  ;;  %v1768_v42 = vmul.f32 -1.442695, %v849_v0 }
 0x1ae   : > { %v2469_v40 = vadd.f32 1.0, %v1902_v58 }
 0x1af   : > { %1903 = vpow2.f32 %v1768_v42  ;;  %v534_v42 = vsel %vm2521_vm1, %v2458_v24, %v530_v16 }
 0x1b0   : > { %1905 = vrcp.f32 %v2469_v40  ;;  %v856_v52 = vpop.f32.mrf.mxu2  ;;  %v952_v34 = vand.u32 2147483647, %v2469_v40  ;;  %v954_v37 = vand.u32 2147483648, %v2469_v40  ;;  %vm948_vm3 = vweird.f32 %v2469_v40 }
 0x1b1   : > { %1907 = vrsqrt.f32 %v2480_v51  ;;  %v857_v62 = vadd.f32 %v2451_v5, %v856_v52 }
 0x1b2   : > { %v851_v53 = vpop.f32.mrf.mxu0  ;;  %1909 = vrsqrt.f32 %v2482_v49  ;;  %vm953_vm5 = vcmp.eq.f32.partialorder %v952_v34, 8.507059e+37  ;;  %v955_v24 = vor.u32 1.1754944e-38, %v954_v37 }
 0x1b3   : > { %v852_v46 = vadd.f32 %v2451_v5, %v851_v53  ;;  %v1771_v8 = vmul.f32 -1.442695, %v857_v62  ;;  %v605_v62 = vmul.f32 %v534_v42, %v2256_v60 }
 0x1b5   : > { %v1904_v41 = vpop.eup %1903  ;;  %v1769_v54 = vmul.f32 -1.442695, %v852_v46 }
 0x1b6   : > { %v2493_v63 = vpop.eup %1905  ;;  %v2496_v28 = vadd.f32 1.0, %v1904_v41  ;;  %v2565_v41 = vadd.f32 1e-05, %v513_v39 }
 0x1b7   : > { %v944_v2 = vmul.f32 %v2493_v63, %v2469_v40  ;;  %1911 = vpow2.f32 %v1769_v54  ;;  %v2503_v36 = vpop.eup %1907  ;;  %vm949_vm15 = vweird.f32 %v2493_v63  ;;  %v2551_v40 = vadd.f32 1e-05, %v514_v56 }
 0x1b8   : > { %1913 = vrcp.f32 %v2496_v28  ;;  %v858_v10 = vpop.f32.mrf.mxu2  ;;  %v2509_v13 = vpop.eup %1909  ;;  %v556_v1 = vmul.f32 %v2503_v36, %v2480_v51  ;;  %vm2547_vm4 = vmor %vm948_vm3, %vm949_vm15  ;;  %v969_v52 = vand.u32 2147483648, %v2496_v28  ;;  %v967_v9 = vand.u32 2147483647, %v2496_v28 }
 0x1b9   : > { %v945_v57 = vsub.f32 1.0, %v944_v2  ;;  %v859_v11 = vadd.f32 %v2451_v5, %v858_v10  ;;  %1915 = vpow2.f32 %v1771_v8  ;;  %v546_v23 = vmul.f32 %v2509_v13, %v2482_v49  ;;  %v901_v51 = vpop.f32.mrf.mxu3 }
 0x1ba   : > { %v853_v43 = vpop.f32.mrf.mxu0  ;;  %v557_v61 = vmul.f32 %v2503_v36, %v556_v1  ;;  %vm963_vm7 = vweird.f32 %v2496_v28  ;;  %v970_v2 = vor.u32 1.1754944e-38, %v969_v52  ;;  %vm968_vm9 = vcmp.eq.f32.partialorder %v967_v9, 8.507059e+37 }
 0x1bb   : > { %v946_v12 = vmul.f32 %v2493_v63, %v945_v57  ;;  %v854_v59 = vadd.f32 %v2451_v5, %v853_v43  ;;  %v1772_v17 = vmul.f32 -1.442695, %v859_v11  ;;  %v547_v26 = vmul.f32 %v2509_v13, %v546_v23 }
 0x1bc   : > { %v558_v60 = vmul.f32 0.5, %v557_v61  ;;  %vm562_vm11 = vweird.f32 %v2503_v36  ;;  %vm552_vm13 = vweird.f32 %v2509_v13 }
 0x1bd   : > { %v1912_v45 = vpop.eup %1911  ;;  %v947_v6 = vadd.f32 %v2493_v63, %v946_v12  ;;  %1917 = vpow2.f32 %v1772_v17  ;;  %v1770_v58 = vmul.f32 -1.442695, %v854_v59  ;;  %v548_v43 = vmul.f32 0.5, %v547_v26  ;;  %v893_v12 = vpop.f32.mrf.mxu1  ;;  %vm2604_vm14 = vmor %vm561_vm10, %vm562_vm11 }
 0x1be   : > { %v1914_v21 = vpop.eup %1913  ;;  %v2527_v0 = vadd.f32 1.0, %v1912_v45  ;;  %v559_v18 = vsub.f32 1.5, %v558_v60  ;;  %vm2615_vm1 = vmor %vm551_vm12, %vm552_vm13  ;;  %vm581_vm10 = vweird.f32 %v2551_v40 }
 0x1bf   : > { %v959_v50 = vmul.f32 %v1914_v21, %v2496_v28  ;;  %v951_v38 = vsel %vm2547_vm4, %v2493_v63, %v947_v6  ;;  %v1916_v53 = vpop.eup %1915  ;;  %vm964_vm6 = vweird.f32 %v1914_v21  ;;  %v606_v63 = vmul.f32 %v544_v48, %v2290_v31 }
 0x1c0   : > { %1919 = vrcp.f32 %v2527_v0  ;;  %v956_v30 = vsel %vm953_vm5, %v955_v24, %v951_v38  ;;  %vm965_vm8 = vmor %vm963_vm7, %vm964_vm6  ;;  %v2576_v8 = vadd.f32 1.0, %v1916_v53  ;;  %v549_v27 = vsub.f32 1.5, %v548_v43 }
 0x1c1   : > { %v960_v44 = vsub.f32 1.0, %v959_v50  ;;  %1921 = vpow2.f32 %v1770_v58  ;;  %v1063_v57 = vmul.f32 %v956_v30, %v605_v62  ;;  %v560_v33 = vmul.f32 %v2503_v36, %v559_v18 }
 0x1c2   : > { %1923 = vrsqrt.f32 %v2551_v40  ;;  %v550_v39 = vmul.f32 %v2509_v13, %v549_v27  ;;  %v982_v42 = vand.u32 2147483647, %v2527_v0  ;;  %vm978_vm2 = vweird.f32 %v2527_v0 }
 0x1c3   : > { %v961_v46 = vmul.f32 %v1914_v21, %v960_v44  ;;  %v1918_v29 = vpop.eup %1917  ;;  %1925 = vrsqrt.f32 %v2565_v41  ;;  %v1071_v17 = vadd.f32 %v1063_v57, %v891_v35  ;;  %v984_v35 = vand.u32 2147483648, %v2527_v0 }
 0x1c4   : > { %v2572_v4 = vadd.f32 1.0, %v1918_v29  ;;  %v564_v52 = vsel %vm2604_vm14, %v2503_v36, %v560_v33  ;;  %v554_v29 = vsel %vm2615_vm1, %v2509_v13, %v550_v39  ;;  %vm983_vm4 = vcmp.eq.f32.partialorder %v982_v42, 8.507059e+37 }
 0x1c5   : > { %v962_v54 = vadd.f32 %v1914_v21, %v961_v46  ;;  %v896_v24 = vpop.f32.mrf.mxu1  ;;  %v985_v61 = vor.u32 1.1754944e-38, %v984_v35  ;;  %v607_v57 = vmul.f32 %v554_v29, %v2346_v14  ;;  %v608_v13 = vmul.f32 %v564_v52, %v2285_v25 }
 0x1c6   : > { %v2574_v55 = vpop.eup %1919  ;;  %1927 = vrcp.f32 %v2572_v4  ;;  %vm1023_vm1 = vweird.f32 %v2572_v4  ;;  %v1027_v27 = vand.u32 2147483647, %v2572_v4 }
 0x1c7   : > { %v966_v7 = vsel %vm965_vm8, %v1914_v21, %v962_v54  ;;  %v974_v28 = vmul.f32 %v2574_v55, %v2527_v0  ;;  %v1922_v11 = vpop.eup %1921  ;;  %1929 = vrcp.f32 %v2576_v8  ;;  %vm979_vm15 = vweird.f32 %v2574_v55 }
 0x1c8   : > { %v971_v10 = vsel %vm968_vm9, %v970_v2, %v966_v7  ;;  %v2582_v16 = vadd.f32 1.0, %v1922_v11  ;;  %v2584_v56 = vpop.eup %1923  ;;  %vm2624_vm3 = vmor %vm978_vm2, %vm979_vm15  ;;  %vm571_vm9 = vweird.f32 %v2565_v41 }
 0x1c9   : > { %v1064_v31 = vmul.f32 %v971_v10, %v606_v63  ;;  %v975_v59 = vsub.f32 1.0, %v974_v28  ;;  %v2589_v21 = vpop.eup %1925  ;;  %v576_v37 = vmul.f32 %v2584_v56, %v2551_v40  ;;  %vm582_vm11 = vweird.f32 %v2584_v56 }
 0x1ca   : > { %1931 = vrcp.f32 %v2582_v16  ;;  %v566_v58 = vmul.f32 %v2589_v21, %v2565_v41  ;;  %v999_v30 = vand.u32 2147483648, %v2582_v16  ;;  %v997_v54 = vand.u32 2147483647, %v2582_v16  ;;  %vm2656_vm15 = vmor %vm581_vm10, %vm582_vm11 }
 0x1cb   : > { %v1072_v45 = vadd.f32 %v1064_v31, %v893_v12  ;;  %v976_v20 = vmul.f32 %v2574_v55, %v975_v59  ;;  %v577_v44 = vmul.f32 %v2584_v56, %v576_v37  ;;  %vm993_vm6 = vweird.f32 %v2582_v16 }
 0x1cc   : > { %v2595_v34 = vpop.eup %1927  ;;  %v567_v53 = vmul.f32 %v2589_v21, %v566_v58  ;;  %v1000_v60 = vor.u32 1.1754944e-38, %v999_v30  ;;  %vm998_vm8 = vcmp.eq.f32.partialorder %v997_v54, 8.507059e+37  ;;  %vm572_vm13 = vweird.f32 %v2589_v21 }
 0x1cd   : > { %v1079_v6 = vpack.c.bf16 %v1072_v45, %v1071_v17  ;;  %v2602_v50 = vpop.eup %1929  ;;  %v977_v1 = vadd.f32 %v2574_v55, %v976_v20  ;;  %v1019_v23 = vmul.f32 %v2595_v34, %v2572_v4  ;;  %v578_v26 = vmul.f32 0.5, %v577_v44  ;;  %v898_v25 = vpop.f32.mrf.mxu1 }
 0x1ce   : > { %v1004_v0 = vmul.f32 %v2602_v50, %v2576_v8  ;;  %v568_v7 = vmul.f32 0.5, %v567_v53  ;;  %vm1024_vm12 = vweird.f32 %v2595_v34  ;;  %vm1009_vm14 = vweird.f32 %v2602_v50 }
 0x1cf   : > { %1803 = vmatmul.msk.bf16.vlgmr.msrb.gmra.mxu3 %vm429_vm0, %v1079_v6  ;;  %1815 = vmatmul.msk.bf16.vlgmr.msrb.gmra.mxu0 %vm429_vm0, %v1079_v6  ;;  %v981_v46 = vsel %vm2624_vm3, %v2574_v55, %v977_v1  ;;  %v1020_v62 = vsub.f32 1.0, %v1019_v23  ;;  %v579_v31 = vsub.f32 1.5, %v578_v26  ;;  %v1029_v6 = vand.u32 2147483648, %v2572_v4  ;;  %vm1025_vm2 = vmor %vm1023_vm1, %vm1024_vm12 }
 0x1d0   : > { %v1932_v49 = vpop.eup %1931  ;;  %v986_v63 = vsel %vm983_vm4, %v985_v61, %v981_v46  ;;  %v1005_v2 = vsub.f32 1.0, %v1004_v0  ;;  %v569_v17 = vsub.f32 1.5, %v568_v7  ;;  %v1014_v58 = vand.u32 2147483648, %v2576_v8  ;;  %vm2667_vm3 = vmor %vm571_vm9, %vm572_vm13 }
 0x1d1   : > { %v989_v38 = vmul.f32 %v1932_v49, %v2582_v16  ;;  %vm994_vm5 = vweird.f32 %v1932_v49  ;;  %v1065_v10 = vmul.f32 %v986_v63, %v607_v57  ;;  %v1021_v28 = vmul.f32 %v2595_v34, %v1020_v62 }
 0x1d2   : > { %vm995_vm7 = vmor %vm993_vm6, %vm994_vm5  ;;  %v1006_v12 = vmul.f32 %v2602_v50, %v1005_v2  ;;  %v580_v18 = vmul.f32 %v2584_v56, %v579_v31  ;;  %v570_v33 = vmul.f32 %v2589_v21, %v569_v17  ;;  %vm1008_vm4 = vweird.f32 %v2576_v8 }
 0x1d3   : > { %v990_v9 = vsub.f32 1.0, %v989_v38  ;;  %v1073_v14 = vadd.f32 %v1065_v10, %v896_v24  ;;  %v1022_v16 = vadd.f32 %v2595_v34, %v1021_v28  ;;  %vm1010_vm5 = vmor %vm1008_vm4, %vm1009_vm14  ;;  %v1030_v4 = vor.u32 1.1754944e-38, %v1029_v6  ;;  %v861_v24 = vpop.f32.mrf.mxu2 }
 0x1d4   : > { %v1007_v40 = vadd.f32 %v2602_v50, %v1006_v12  ;;  %v584_v41 = vsel %vm2656_vm15, %v2584_v56, %v580_v18  ;;  %vm1028_vm6 = vcmp.eq.f32.partialorder %v1027_v27, 8.507059e+37  ;;  %v903_v56 = vpop.f32.mrf.mxu3  ;;  %v862_v0 = vadd.f32 %v2451_v5, %v861_v24 }
 0x1d5   : > { %v991_v36 = vmul.f32 %v1932_v49, %v990_v9  ;;  %v1026_v39 = vsel %vm1025_vm2, %v2595_v34, %v1022_v16  ;;  %v1015_v34 = vor.u32 1.1754944e-38, %v1014_v58  ;;  %v610_v19 = vmul.f32 %v584_v41, %v2395_v47  ;;  %v505_v9 = vpop.xlane.xlu0 %504 }
 0x1d6   : > { %v1011_v42 = vsel %vm1010_vm5, %v2602_v50, %v1007_v40  ;;  %v1031_v35 = vsel %vm1028_vm6, %v1030_v4, %v1026_v39  ;;  %v1773_v46 = vmul.f32 -1.442695, %v862_v0  ;;  %v515_v29 = vmul.f32 %v505_v9, %v2118_v22  ;;  %v2011_v0 = vld [vmem:[%s2100_s23 + $0x10] sm:$0xff] }
 0x1d7   : > { %v992_v55 = vadd.f32 %v1932_v49, %v991_v36  ;;  %v1068_v44 = vmul.f32 %v1031_v35, %v610_v19 }
 0x1d8   : > { %1933 = vpow2.f32 %v1773_v46  ;;  %v523_v61 = vadd.f32 1e-05, %v515_v29  ;;  %v1861_v29 = vld [vmem:[%s2813_s8 + $0x10] sm:$0xff] }
 0x1d9   : > { %v996_v11 = vsel %vm995_vm7, %v1932_v49, %v992_v55  ;;  %v1012_v49 = vand.u32 2147483647, %v2576_v8  ;;  %v574_v8 = vsel %vm2667_vm3, %v2589_v21, %v570_v33  ;;  %v1076_v52 = vadd.f32 %v1068_v44, %v903_v56 }
 0x1da   : > { %v1001_v43 = vsel %vm998_vm8, %v1000_v60, %v996_v11  ;;  %v609_v38 = vmul.f32 %v574_v8, %v2349_v32  ;;  %vm591_vm8 = vweird.f32 %v523_v61 }
 0x1db   : > { %v1066_v59 = vmul.f32 %v1001_v43, %v608_v13  ;;  %vm1013_vm7 = vcmp.eq.f32.partialorder %v1012_v49, 8.507059e+37  ;;  %v863_v21 = vpop.f32.mrf.mxu2 }
 0x1dc   : > { %v1016_v23 = vsel %vm1013_vm7, %v1015_v34, %v1011_v42  ;;  %v864_v47 = vadd.f32 %v2451_v5, %v863_v21  ;;  %v906_v20 = vpop.f32.mrf.mxu3  ;;  %v2012_v21 = vld [vmem:[%s2100_s23 + $0x18] sm:$0xff] }
 0x1dd   : > { %v1074_v45 = vadd.f32 %v1066_v59, %v898_v25  ;;  %v1067_v48 = vmul.f32 %v1016_v23, %v609_v38  ;;  %v1084_v46 = vpack.c.bf16 %v2012_v21, %v2011_v0 }
 0x1de   : > { %v1774_v32 = vmul.f32 -1.442695, %v864_v47  ;;  %v1934_v30 = vpop.eup %1933 }
 0x1df   : > { %v1080_v37 = vpack.c.bf16 %v1074_v45, %v1073_v14  ;;  %v1075_v53 = vadd.f32 %v1067_v48, %v901_v51  ;;  %v941_v62 = vadd.f32 1.0, %v1934_v30 }
 0x1e0   : > { %1935 = vpow2.f32 %v1774_v32  ;;  %v1862_v32 = vld [vmem:[%s2813_s8 + $0x18] sm:$0xff] }
 0x1e1   : > { %1804 = vmatmul.msk.bf16.gmra.mxu3 %vm429_vm0, %v1080_v37  ;;  %1816 = vmatmul.msk.bf16.gmra.mxu0 %vm429_vm0, %v1080_v37  ;;  %v1081_v50 = vpack.c.bf16 %v1076_v52, %v1075_v53  ;;  %1937 = vrsqrt.f32 %v523_v61  ;;  %vm1038_vm12 = vweird.f32 %v941_v62  ;;  %v1042_v6 = vand.u32 2147483647, %v941_v62  ;;  %v2009_v52 = vld [vmem:[%s2100_s23] sm:$0xff]  ;;  %v2010_v53 = vld [vmem:[%s2100_s23 + $0x8] sm:$0xff] }
 0x1e2   : > { %1939 = vrcp.f32 %v941_v62  ;;  %1623 = vmatpush.bf16.msrb.mxu1 %v1862_v32 }
 0x1e3   : > { %vm1043_vm1 = vcmp.eq.f32.partialorder %v1042_v6, 8.507059e+37 }
 0x1e4   : > { %v908_v44 = vpop.f32.mrf.mxu3 }
 0x1e6   : > { %v1936_v36 = vpop.eup %1935  ;;  %1624 = vmatpush.bf16.msrb.mxu1 %v1861_v29 }
 0x1e7   : > { %v942_v54 = vadd.f32 1.0, %v1936_v36  ;;  %v1938_v26 = vpop.eup %1937 }
 0x1e8   : > { %v586_v63 = vmul.f32 %v1938_v26, %v523_v61  ;;  %v1940_v2 = vpop.eup %1939  ;;  %vm592_vm9 = vweird.f32 %v1938_v26 }
 0x1e9   : > { %1941 = vrcp.f32 %v942_v54  ;;  %v1034_v5 = vmul.f32 %v1940_v2, %v941_v62  ;;  %vm1039_vm10 = vweird.f32 %v1940_v2  ;;  %vm2693_vm11 = vmor %vm591_vm8, %vm592_vm9  ;;  %v1059_v1 = vand.u32 2147483648, %v942_v54 }
 0x1ea   : > { %v587_v55 = vmul.f32 %v1938_v26, %v586_v63  ;;  %vm1040_vm13 = vmor %vm1038_vm12, %vm1039_vm10  ;;  %vm1053_vm2 = vweird.f32 %v942_v54  ;;  %v1057_v49 = vand.u32 2147483647, %v942_v54  ;;  %v2014_v63 = vld [vmem:[%s2100_s23 + $0x28] sm:$0xff] }
 0x1eb   : > { %v1035_v28 = vsub.f32 1.0, %v1034_v5  ;;  %v1060_v34 = vor.u32 1.1754944e-38, %v1059_v1 }
 0x1ec   : > { %v588_v10 = vmul.f32 0.5, %v587_v55  ;;  %vm1058_vm6 = vcmp.eq.f32.partialorder %v1057_v49, 8.507059e+37 }
 0x1ed   : > { %v1036_v43 = vmul.f32 %v1940_v2, %v1035_v28 }
 0x1ee   : > { %v589_v31 = vsub.f32 1.5, %v588_v10 }
 0x1ef   : > { %v1942_v13 = vpop.eup %1941  ;;  %v1037_v14 = vadd.f32 %v1940_v2, %v1036_v43 }
 0x1f0   : > { %v1049_v11 = vmul.f32 %v1942_v13, %v942_v54  ;;  %v590_v25 = vmul.f32 %v1938_v26, %v589_v31  ;;  %vm1054_vm14 = vweird.f32 %v1942_v13  ;;  %v1860_v54 = vld [vmem:[%s2813_s8 + $0x8] sm:$0xff] }
 0x1f1   : > { %1805 = vmatmul.msk.bf16.gmra.mxu3 %vm429_vm0, %v1081_v50  ;;  %1817 = vmatmul.msk.bf16.gmra.mxu0 %vm429_vm0, %v1081_v50  ;;  %v1041_v37 = vsel %vm1040_vm13, %v1940_v2, %v1037_v14  ;;  %vm1055_vm4 = vmor %vm1053_vm2, %vm1054_vm14  ;;  %v1083_v50 = vpack.c.bf16 %v2010_v53, %v2009_v52 }
 0x1f2   : > { %v1050_v12 = vsub.f32 1.0, %v1049_v11  ;;  %v594_v27 = vsel %vm2693_vm11, %v1938_v26, %v590_v25  ;;  %1625 = vmatpush.bf16.msrb.mxu1 %v1860_v54  ;;  %v2013_v26 = vld [vmem:[%s2100_s23 + $0x20] sm:$0xff] }
 0x1f3   : > { %v611_v4 = vmul.f32 %v594_v27, %v2423_v3  ;;  %v1854_v3 = vld [vmem:[%s2814_s9 + $0x8] sm:$0xff]  ;;  %v1085_v2 = vpack.c.bf16 %v2014_v63, %v2013_v26 }
 0x1f4   : > { %v1051_v16 = vmul.f32 %v1942_v13, %v1050_v12  ;;  %1125 = vmatpush.bf16.msrb.mxu2 %v1854_v3 }
 0x1f6   : > { %v1052_v33 = vadd.f32 %v1942_v13, %v1051_v16 }
 0x1f8   : > { %v1056_v42 = vsel %vm1055_vm4, %v1942_v13, %v1052_v33 }
 0x1f9   : > { %v1061_v23 = vsel %vm1058_vm6, %v1060_v34, %v1056_v42 }
 0x20c   : > { %v508_v57 = vpop.xlane.xlu1 %507 }
 0x20d   : > { %v516_v7 = vmul.f32 %v508_v57, %v2118_v22  ;;  %v1044_v22 = vand.u32 2147483648, %v941_v62  ;;  %v1859_v57 = vld [vmem:[%s2813_s8] sm:$0xff] }
 0x20e   : > { %1626 = vmatpush.bf16.msrb.mxu1 %v1859_v57 }
 0x20f   : > { %v524_v60 = vadd.f32 1e-05, %v516_v7  ;;  %v1045_v51 = vor.u32 1.1754944e-38, %v1044_v22 }
 0x211   : > { %1943 = vrsqrt.f32 %v524_v60  ;;  %v1046_v39 = vsel %vm1043_vm1, %v1045_v51, %v1041_v37  ;;  %vm601_vm3 = vweird.f32 %v524_v60 }
 0x212   : > { %v1069_v35 = vmul.f32 %v1046_v39, %v611_v4 }
 0x214   : > { %v1077_v24 = vadd.f32 %v1069_v35, %v906_v20 }
 0x217   : > { %v1944_v59 = vpop.eup %1943 }
 0x218   : > { %v596_v17 = vmul.f32 %v1944_v59, %v524_v60  ;;  %vm602_vm15 = vweird.f32 %v1944_v59 }
 0x219   : > { %vm603_vm5 = vmor %vm601_vm3, %vm602_vm15  ;;  %vm1606_vm15 = vcmask 523264  }
 0x21a   : > { %v597_v18 = vmul.f32 %v1944_v59, %v596_v17 }
 0x21c   : > { %v598_v40 = vmul.f32 0.5, %v597_v18 }
 0x21e   : > { %v599_v58 = vsub.f32 1.5, %v598_v40 }
 0x220   : > { %v600_v41 = vmul.f32 %v1944_v59, %v599_v58 }
 0x222   : > { %v604_v8 = vsel %vm603_vm5, %v1944_v59, %v600_v41 }
 0x223   : > { %v612_v19 = vmul.f32 %v604_v8, %v2439_v15  ;;  %v1853_v15 = vld [vmem:[%s2814_s9] sm:$0xff] }
 0x224   : > { %1126 = vmatpush.bf16.msrb.mxu2 %v1853_v15 }
 0x225   : > { %v1070_v38 = vmul.f32 %v1061_v23, %v612_v19 }
 0x227   : > { %v1078_v48 = vadd.f32 %v1070_v38, %v908_v44  ;;  %1783 = vmatmul.msk.bf16.vlgmr.msrb.gmra.mxu2 %vm429_vm0, %v1083_v50 }
 0x229   : > { %v1082_v56 = vpack.c.bf16 %v1078_v48, %v1077_v24 }
 0x22b   : > { %1806 = vmatmul.msk.bf16.gmra.mxu3 %vm429_vm0, %v1082_v56  ;;  %1818 = vmatmul.msk.bf16.gmra.mxu0 %vm429_vm0, %v1082_v56 }
 0x237   : > { %1784 = vmatmul.msk.bf16.gmra.mxu2 %vm429_vm0, %v1084_v46 }
 0x247   : > { %1785 = vmatmul.msk.bf16.gmra.mxu2 %vm429_vm0, %v1085_v2 }
 0x24c   : > { %v1382_v31 = vpop.f32.mrf.mxu0 }
 0x252   : > { %v1337_v47 = vpop.f32.mrf.mxu3 }
 0x253   : > { %v1819_v9 = vmul.f32 -1.442695, %v1337_v47 }
 0x254   : > { %v1384_v58 = vpop.f32.mrf.mxu0 }
 0x255   : > { %1945 = vpow2.f32 %v1819_v9 }
 0x25a   : > { %v1339_v61 = vpop.f32.mrf.mxu3 }
 0x25b   : > { %v1946_v30 = vpop.eup %1945  ;;  %v1820_v62 = vmul.f32 -1.442695, %v1339_v61 }
 0x25c   : > { %v1426_v36 = vadd.f32 1.0, %v1946_v30  ;;  %v2016_v30 = vld [vmem:[%s2100_s23 + $0x30] sm:$0xff] }
 0x25d   : > { %1947 = vpow2.f32 %v1820_v62 }
 0x25e   : > { %1949 = vrcp.f32 %v1426_v36  ;;  %v1443_v59 = vand.u32 2147483647, %v1426_v36  ;;  %v1445_v17 = vand.u32 2147483648, %v1426_v36  ;;  %vm1439_vm8 = vweird.f32 %v1426_v36  ;;  %v1387_v56 = vpop.f32.mrf.mxu0 }
 0x260   : > { %vm1444_vm10 = vcmp.eq.f32.partialorder %v1443_v59, 8.507059e+37  ;;  %v1446_v6 = vor.u32 1.1754944e-38, %v1445_v17 }
 0x263   : > { %v1948_v55 = vpop.eup %1947 }
 0x264   : > { %v1950_v5 = vpop.eup %1949  ;;  %v1427_v7 = vadd.f32 1.0, %v1948_v55  ;;  %v2730_v60 = vpop.f32.mrf.mxu3 }
 0x265   : > { %v1435_v13 = vmul.f32 %v1950_v5, %v1426_v36  ;;  %v1821_v28 = vmul.f32 -1.442695, %v2730_v60  ;;  %vm1440_vm7 = vweird.f32 %v1950_v5 }
 0x266   : > { %1951 = vrcp.f32 %v1427_v7  ;;  %vm1441_vm9 = vmor %vm1439_vm8, %vm1440_vm7  ;;  %v1460_v20 = vand.u32 2147483648, %v1427_v7  ;;  %v1458_v37 = vand.u32 2147483647, %v1427_v7  ;;  %vm1454_vm12 = vweird.f32 %v1427_v7 }
 0x267   : > { %v1436_v10 = vsub.f32 1.0, %v1435_v13  ;;  %1953 = vpow2.f32 %v1821_v28 }
 0x268   : > { %v1461_v1 = vor.u32 1.1754944e-38, %v1460_v20  ;;  %vm1459_vm14 = vcmp.eq.f32.partialorder %v1458_v37, 8.507059e+37 }
 0x269   : > { %v1437_v11 = vmul.f32 %v1950_v5, %v1436_v10 }
 0x26b   : > { %v1438_v43 = vadd.f32 %v1950_v5, %v1437_v11 }
 0x26c   : > { %v1952_v12 = vpop.eup %1951  ;;  %v2733_v14 = vpop.f32.mrf.mxu3 }
 0x26d   : > { %v1450_v25 = vmul.f32 %v1952_v12, %v1427_v7  ;;  %v1954_v16 = vpop.eup %1953  ;;  %v1442_v45 = vsel %vm1441_vm9, %v1950_v5, %v1438_v43  ;;  %v1822_v18 = vmul.f32 -1.442695, %v2733_v14  ;;  %vm1455_vm11 = vweird.f32 %v1952_v12  ;;  %v1389_v7 = vpop.f32.mrf.mxu0 }
 0x26e   : > { %v1428_v40 = vadd.f32 1.0, %v1954_v16  ;;  %v1447_v33 = vsel %vm1444_vm10, %v1446_v6, %v1442_v45  ;;  %vm1456_vm13 = vmor %vm1454_vm12, %vm1455_vm11 }
 0x26f   : > { %v1451_v22 = vsub.f32 1.0, %v1450_v25  ;;  %1955 = vpow2.f32 %v1822_v18  ;;  %v1554_v49 = vmul.f32 %v1447_v33, %v1337_v47 }
 0x270   : > { %1957 = vrcp.f32 %v1428_v40  ;;  %v1475_v21 = vand.u32 2147483648, %v1428_v40  ;;  %vm1469_vm2 = vweird.f32 %v1428_v40  ;;  %v1473_v47 = vand.u32 2147483647, %v1428_v40 }
 0x271   : > { %v1452_v27 = vmul.f32 %v1952_v12, %v1451_v22  ;;  %v1562_v23 = vmul.f32 %v1554_v49, %v1382_v31 }
 0x272   : > { %v1476_v36 = vor.u32 1.1754944e-38, %v1475_v21  ;;  %vm1474_vm4 = vcmp.eq.f32.partialorder %v1473_v47, 8.507059e+37 }
 0x273   : > { %v1453_v51 = vadd.f32 %v1952_v12, %v1452_v27 }
 0x274   : > { %v2736_v4 = vpop.f32.mrf.mxu3 }
 0x275   : > { %v1457_v39 = vsel %vm1456_vm13, %v1952_v12, %v1453_v51  ;;  %v1956_v42 = vpop.eup %1955  ;;  %v1823_v34 = vmul.f32 -1.442695, %v2736_v4 }
 0x276   : > { %v1462_v41 = vsel %vm1459_vm14, %v1461_v1, %v1457_v39  ;;  %v1958_v35 = vpop.eup %1957  ;;  %v1429_v19 = vadd.f32 1.0, %v1956_v42 }
 0x277   : > { %v1555_v8 = vmul.f32 %v1462_v41, %v1339_v61  ;;  %v1465_v44 = vmul.f32 %v1958_v35, %v1428_v40  ;;  %1959 = vpow2.f32 %v1823_v34  ;;  %vm1470_vm1 = vweird.f32 %v1958_v35  ;;  %v2015_v61 = vld [vmem:[%s2100_s23 + $0x38] sm:$0xff] }
 0x278   : > { %1961 = vrcp.f32 %v1429_v19  ;;  %vm1471_vm3 = vmor %vm1469_vm2, %vm1470_vm1  ;;  %v1086_v62 = vpack.c.bf16 %v2015_v61, %v2016_v30  ;;  %v1490_v54 = vand.u32 2147483648, %v1429_v19  ;;  %v1488_v63 = vand.u32 2147483647, %v1429_v19 }
 0x279   : > { %v1563_v38 = vmul.f32 %v1555_v8, %v1384_v58  ;;  %v1466_v48 = vsub.f32 1.0, %v1465_v44  ;;  %vm1484_vm6 = vweird.f32 %v1429_v19 }
 0x27a   : > { %1786 = vmatmul.msk.bf16.gmra.mxu2 %vm429_vm0, %v1086_v62  ;;  %v1491_v13 = vor.u32 1.1754944e-38, %v1490_v54  ;;  %vm1489_vm8 = vcmp.eq.f32.partialorder %v1488_v63, 8.507059e+37 }
 0x27b   : > { %v1570_v24 = vpack.c.bf16 %v1563_v38, %v1562_v23  ;;  %v1467_v3 = vmul.f32 %v1958_v35, %v1466_v48 }
 0x27c   : > { %v2740_v15 = vpop.f32.mrf.mxu3 }
 0x27d   : > { %1843 = vmatmul.msk.bf16.vlgmr.msrb.gmra.mxu1 %vm1606_vm15, %v1570_v24  ;;  %v1960_v52 = vpop.eup %1959  ;;  %v1468_v53 = vadd.f32 %v1958_v35, %v1467_v3  ;;  %v1824_v50 = vmul.f32 -1.442695, %v2740_v15 }
 0x27e   : > { %v1962_v0 = vpop.eup %1961  ;;  %v1430_v46 = vadd.f32 1.0, %v1960_v52 }
 0x27f   : > { %v1480_v9 = vmul.f32 %v1962_v0, %v1429_v19  ;;  %1963 = vpow2.f32 %v1824_v50  ;;  %v1472_v32 = vsel %vm1471_vm3, %v1958_v35, %v1468_v53  ;;  %vm1485_vm5 = vweird.f32 %v1962_v0 }
 0x280   : > { %1965 = vrcp.f32 %v1430_v46  ;;  %v1477_v2 = vsel %vm1474_vm4, %v1476_v36, %v1472_v32  ;;  %vm1486_vm7 = vmor %vm1484_vm6, %vm1485_vm5  ;;  %v1505_v6 = vand.u32 2147483648, %v1430_v46  ;;  %vm1499_vm10 = vweird.f32 %v1430_v46 }
 0x281   : > { %v1481_v29 = vsub.f32 1.0, %v1480_v9  ;;  %v1556_v28 = vmul.f32 %v1477_v2, %v2730_v60  ;;  %v1503_v20 = vand.u32 2147483647, %v1430_v46  ;;  %v1392_v60 = vpop.f32.mrf.mxu0 }
 0x282   : > { %v1506_v33 = vor.u32 1.1754944e-38, %v1505_v6 }
 0x283   : > { %v1482_v26 = vmul.f32 %v1962_v0, %v1481_v29  ;;  %v1564_v17 = vmul.f32 %v1556_v28, %v1387_v56  ;;  %vm1504_vm12 = vcmp.eq.f32.partialorder %v1503_v20, 8.507059e+37 }
 0x285   : > { %v1964_v57 = vpop.eup %1963  ;;  %v1483_v55 = vadd.f32 %v1962_v0, %v1482_v26 }
 0x286   : > { %v1966_v5 = vpop.eup %1965  ;;  %v1431_v10 = vadd.f32 1.0, %v1964_v57 }
 0x287   : > { %v1487_v11 = vsel %vm1486_vm7, %v1962_v0, %v1483_v55  ;;  %v1495_v31 = vmul.f32 %v1966_v5, %v1430_v46  ;;  %vm1500_vm9 = vweird.f32 %v1966_v5 }
 0x288   : > { %v1492_v43 = vsel %vm1489_vm8, %v1491_v13, %v1487_v11  ;;  %1967 = vrcp.f32 %v1431_v10  ;;  %vm1501_vm11 = vmor %vm1499_vm10, %vm1500_vm9  ;;  %v1518_v58 = vand.u32 2147483647, %v1431_v10  ;;  %vm1514_vm14 = vweird.f32 %v1431_v10 }
 0x289   : > { %v1557_v12 = vmul.f32 %v1492_v43, %v2733_v14  ;;  %v1496_v59 = vsub.f32 1.0, %v1495_v31  ;;  %v1520_v14 = vand.u32 2147483648, %v1431_v10  ;;  %v1394_v35 = vpop.f32.mrf.mxu0 }
 0x28a   : > { %vm1519_vm2 = vcmp.eq.f32.partialorder %v1518_v58, 8.507059e+37 }
 0x28b   : > { %v1565_v25 = vmul.f32 %v1557_v12, %v1389_v7  ;;  %v1497_v16 = vmul.f32 %v1966_v5, %v1496_v59  ;;  %v1521_v39 = vor.u32 1.1754944e-38, %v1520_v14 }
 0x28d   : > { %v1498_v45 = vadd.f32 %v1966_v5, %v1497_v16  ;;  %v1571_v22 = vpack.c.bf16 %v1565_v25, %v1564_v17 }
 0x28e   : > { %v1968_v18 = vpop.eup %1967 }
 0x28f   : > { %v1510_v40 = vmul.f32 %v1968_v18, %v1431_v10  ;;  %1844 = vmatmul.msk.bf16.gmra.mxu1 %vm1606_vm15, %v1571_v22  ;;  %v1502_v27 = vsel %vm1501_vm11, %v1966_v5, %v1498_v45  ;;  %vm1515_vm13 = vweird.f32 %v1968_v18 }
 0x290   : > { %v1507_v1 = vsel %vm1504_vm12, %v1506_v33, %v1502_v27  ;;  %vm1516_vm1 = vmor %vm1514_vm14, %vm1515_vm13 }
 0x291   : > { %v1511_v37 = vsub.f32 1.0, %v1510_v40  ;;  %v1558_v41 = vmul.f32 %v1507_v1, %v2736_v4 }
 0x293   : > { %v1512_v51 = vmul.f32 %v1968_v18, %v1511_v37  ;;  %v1566_v19 = vmul.f32 %v1558_v41, %v1392_v60 }
 0x295   : > { %v1513_v49 = vadd.f32 %v1968_v18, %v1512_v51 }
 0x297   : > { %v1517_v42 = vsel %vm1516_vm1, %v1968_v18, %v1513_v49 }
 0x298   : > { %v1522_v8 = vsel %vm1519_vm2, %v1521_v39, %v1517_v42 }
 0x299   : > { %v1559_v34 = vmul.f32 %v1522_v8, %v2740_v15  ;;  %v2755_v15 = vld [vmem:[%s2815_s10] ss:$0 sm:$0xff] }
 0x29b   : > { %v1567_v23 = vmul.f32 %v1559_v34, %v1394_v35 }
 0x29d   : > { %v1572_v38 = vpack.c.bf16 %v1567_v23, %v1566_v19 }
 0x29f   : > { %1845 = vmatmul.msk.bf16.gmra.mxu1 %vm1606_vm15, %v1572_v38 }
 0x2a8   : > { %v1397_v26 = vpop.f32.mrf.mxu0 }
 0x2aa   : > { %v1128_v21 = vpop.f32.mrf.mxu2 }
 0x2ab   : > { %v1129_v47 = vadd.f32 %v2755_v15, %v1128_v21 }
 0x2ad   : > { %v1787_v29 = vmul.f32 -1.442695, %v1129_v47 }
 0x2ae   : > { %v1352_v44 = vpop.f32.mrf.mxu3 }
 0x2af   : > { %v1825_v24 = vmul.f32 -1.442695, %v1352_v44 }
 0x2b0   : > { %v1399_v45 = vpop.f32.mrf.mxu0 }
 0x2b1   : > { %1969 = vpow2.f32 %v1825_v24 }
 0x2b2   : > { %v1130_v54 = vpop.f32.mrf.mxu2 }
 0x2b3   : > { %v1131_v57 = vadd.f32 %v2755_v15, %v1130_v54 }
 0x2b5   : > { %v1788_v11 = vmul.f32 -1.442695, %v1131_v57 }
 0x2b6   : > { %v1354_v48 = vpop.f32.mrf.mxu3 }
 0x2b7   : > { %v1970_v3 = vpop.eup %1969  ;;  %v1826_v56 = vmul.f32 -1.442695, %v1354_v48 }
 0x2b8   : > { %v1432_v52 = vadd.f32 1.0, %v1970_v3 }
 0x2b9   : > { %1971 = vpow2.f32 %v1826_v56 }
 0x2ba   : > { %1973 = vrcp.f32 %v1432_v52  ;;  %v1535_v30 = vand.u32 2147483648, %v1432_v52  ;;  %vm1529_vm4 = vweird.f32 %v1432_v52  ;;  %v1533_v62 = vand.u32 2147483647, %v1432_v52  ;;  %v1133_v17 = vpop.f32.mrf.mxu2 }
 0x2bb   : > { %v1134_v40 = vadd.f32 %v2755_v15, %v1133_v17 }
 0x2bc   : > { %v1536_v55 = vor.u32 1.1754944e-38, %v1535_v30  ;;  %vm1534_vm6 = vcmp.eq.f32.partialorder %v1533_v62, 8.507059e+37 }
 0x2bd   : > { %v1789_v37 = vmul.f32 -1.442695, %v1134_v40 }
 0x2bf   : > { %v1972_v4 = vpop.eup %1971 }
 0x2c0   : > { %v1974_v53 = vpop.eup %1973  ;;  %v1433_v50 = vadd.f32 1.0, %v1972_v4 }
 0x2c1   : > { %v1525_v0 = vmul.f32 %v1974_v53, %v1432_v52  ;;  %vm1530_vm3 = vweird.f32 %v1974_v53 }
 0x2c2   : > { %1975 = vrcp.f32 %v1433_v50  ;;  %vm1531_vm5 = vmor %vm1529_vm4, %vm1530_vm3  ;;  %v1550_v5 = vand.u32 2147483648, %v1433_v50  ;;  %v1548_v13 = vand.u32 2147483647, %v1433_v50  ;;  %vm1544_vm8 = vweird.f32 %v1433_v50  ;;  %v1135_v27 = vpop.f32.mrf.mxu2 }
 0x2c3   : > { %v1526_v46 = vsub.f32 1.0, %v1525_v0  ;;  %1977 = vpow2.f32 %v1787_v29  ;;  %v1136_v51 = vadd.f32 %v2755_v15, %v1135_v27 }
 0x2c4   : > { %v1551_v31 = vor.u32 1.1754944e-38, %v1550_v5  ;;  %vm1549_vm10 = vcmp.eq.f32.partialorder %v1548_v13, 8.507059e+37  ;;  %1979 = vpow2.f32 %v1788_v11 }
 0x2c5   : > { %v1527_v9 = vmul.f32 %v1974_v53, %v1526_v46  ;;  %v1790_v49 = vmul.f32 -1.442695, %v1136_v51 }
 0x2c7   : > { %v1528_v32 = vadd.f32 %v1974_v53, %v1527_v9 }
 0x2c8   : > { %v1976_v61 = vpop.eup %1975 }
 0x2c9   : > { %v1540_v36 = vmul.f32 %v1976_v61, %v1433_v50  ;;  %v1532_v63 = vsel %vm1531_vm5, %v1974_v53, %v1528_v32  ;;  %vm1545_vm7 = vweird.f32 %v1976_v61  ;;  %v1978_v43 = vpop.eup %1977 }
 0x2ca   : > { %v1537_v10 = vsel %vm1534_vm6, %v1536_v55, %v1532_v63  ;;  %vm1546_vm9 = vmor %vm1544_vm8, %vm1545_vm7  ;;  %v1172_v22 = vadd.f32 1.0, %v1978_v43  ;;  %v1980_v60 = vpop.eup %1979  ;;  %v1138_v1 = vpop.f32.mrf.mxu2 }
 0x2cb   : > { %v1541_v2 = vsub.f32 1.0, %v1540_v36  ;;  %v1560_v12 = vmul.f32 %v1537_v10, %v1352_v44  ;;  %v1173_v33 = vadd.f32 1.0, %v1980_v60  ;;  %v1139_v8 = vadd.f32 %v2755_v15, %v1138_v1 }
 0x2cc   : > { %1981 = vrcp.f32 %v1172_v22  ;;  %v1191_v38 = vand.u32 2147483648, %v1172_v22  ;;  %v1189_v3 = vand.u32 2147483647, %v1172_v22 }
 0x2cd   : > { %v1542_v7 = vmul.f32 %v1976_v61, %v1541_v2  ;;  %v1568_v18 = vmul.f32 %v1560_v12, %v1397_v26  ;;  %1983 = vpow2.f32 %v1789_v37  ;;  %v1791_v23 = vmul.f32 -1.442695, %v1139_v8 }
 0x2ce   : > { %1985 = vrcp.f32 %v1173_v33  ;;  %v1192_v53 = vor.u32 1.1754944e-38, %v1191_v38  ;;  %vm1190_vm13 = vcmp.eq.f32.partialorder %v1189_v3, 8.507059e+37  ;;  %vm1200_vm14 = vweird.f32 %v1173_v33 }
 0x2cf   : > { %v1543_v28 = vadd.f32 %v1976_v61, %v1542_v7  ;;  %1987 = vpow2.f32 %v1790_v49  ;;  %v1206_v9 = vand.u32 2147483648, %v1173_v33 }
 0x2d1   : > { %v1547_v59 = vsel %vm1546_vm9, %v1976_v61, %v1543_v28  ;;  %v1204_v61 = vand.u32 2147483647, %v1173_v33  ;;  %v1207_v26 = vor.u32 1.1754944e-38, %v1206_v9 }
 0x2d2   : > { %v1552_v25 = vsel %vm1549_vm10, %v1551_v31, %v1547_v59  ;;  %v1982_v14 = vpop.eup %1981  ;;  %v1140_v44 = vpop.f32.mrf.mxu2 }
 0x2d3   : > { %v1561_v16 = vmul.f32 %v1552_v25, %v1354_v48  ;;  %v1181_v58 = vmul.f32 %v1982_v14, %v1172_v22  ;;  %v1984_v39 = vpop.eup %1983  ;;  %vm1186_vm11 = vweird.f32 %v1982_v14  ;;  %v1141_v52 = vadd.f32 %v2755_v15, %v1140_v44 }
 0x2d4   : > { %v1986_v42 = vpop.eup %1985  ;;  %v2763_v34 = vadd.f32 1.0, %v1984_v39  ;;  %vm1205_vm3 = vcmp.eq.f32.partialorder %v1204_v61, 8.507059e+37 }
 0x2d5   : > { %v1569_v6 = vmul.f32 %v1561_v16, %v1399_v45  ;;  %v1182_v41 = vsub.f32 1.0, %v1181_v58  ;;  %v1196_v19 = vmul.f32 %v1986_v42, %v1173_v33  ;;  %v1988_v24 = vpop.eup %1987  ;;  %vm1201_vm1 = vweird.f32 %v1986_v42 }
 0x2d6   : > { %1989 = vrcp.f32 %v2763_v34  ;;  %v2767_v4 = vadd.f32 1.0, %v1988_v24  ;;  %v1792_v46 = vmul.f32 -1.442695, %v1141_v52  ;;  %vm1202_vm2 = vmor %vm1200_vm14, %vm1201_vm1  ;;  %vm1215_vm4 = vweird.f32 %v2763_v34 }
 0x2d7   : > { %v1573_v20 = vpack.c.bf16 %v1569_v6, %v1568_v18  ;;  %v1183_v35 = vmul.f32 %v1982_v14, %v1182_v41  ;;  %v1197_v56 = vsub.f32 1.0, %v1196_v19  ;;  %1991 = vpow2.f32 %v1791_v23 }
 0x2d8   : > { %1993 = vrcp.f32 %v2767_v4  ;;  %v1221_v31 = vand.u32 2147483648, %v2763_v34  ;;  %v1219_v12 = vand.u32 2147483647, %v2763_v34  ;;  %vm1230_vm8 = vweird.f32 %v2767_v4 }
 0x2d9   : > { %1846 = vmatmul.msk.bf16.gmra.mxu1 %vm1606_vm15, %v1573_v20  ;;  %vm1185_vm15 = vweird.f32 %v1172_v22  ;;  %v1184_v48 = vadd.f32 %v1982_v14, %v1183_v35  ;;  %v1198_v0 = vmul.f32 %v1986_v42, %v1197_v56  ;;  %1995 = vpow2.f32 %v1792_v46 }
 0x2da   : > { %vm1187_vm12 = vmor %vm1185_vm15, %vm1186_vm11  ;;  %v1222_v25 = vor.u32 1.1754944e-38, %v1221_v31  ;;  %vm1220_vm7 = vcmp.eq.f32.partialorder %v1219_v12, 8.507059e+37  ;;  %v1236_v6 = vand.u32 2147483648, %v2767_v4  ;;  %v1234_v40 = vand.u32 2147483647, %v2767_v4 }
 0x2db   : > { %v1188_v50 = vsel %vm1187_vm12, %v1982_v14, %v1184_v48  ;;  %v1199_v29 = vadd.f32 %v1986_v42, %v1198_v0 }
 0x2dc   : > { %v1990_v21 = vpop.eup %1989  ;;  %v1193_v47 = vsel %vm1190_vm13, %v1192_v53, %v1188_v50  ;;  %v1237_v14 = vor.u32 1.1754944e-38, %v1236_v6  ;;  %vm1235_vm15 = vcmp.eq.f32.partialorder %v1234_v40, 8.507059e+37 }
 0x2dd   : > { %v1992_v32 = vpop.eup %1991  ;;  %v1211_v30 = vmul.f32 %v1990_v21, %v2763_v34  ;;  %v1203_v63 = vsel %vm1202_vm2, %v1986_v42, %v1199_v29  ;;  %vm1216_vm5 = vweird.f32 %v1990_v21 }
 0x2de   : > { %v1176_v54 = vadd.f32 1.0, %v1992_v32  ;;  %v1994_v57 = vpop.eup %1993  ;;  %v1208_v55 = vsel %vm1205_vm3, %v1207_v26, %v1203_v63  ;;  %vm1217_vm6 = vmor %vm1215_vm4, %vm1216_vm5 }
 0x2df   : > { %v1212_v2 = vsub.f32 1.0, %v1211_v30  ;;  %v1996_v5 = vpop.eup %1995  ;;  %v1226_v13 = vmul.f32 %v1994_v57, %v2767_v4  ;;  %vm1231_vm9 = vweird.f32 %v1994_v57 }
 0x2e0   : > { %1997 = vrcp.f32 %v1176_v54  ;;  %v1177_v11 = vadd.f32 1.0, %v1996_v5  ;;  %vm1232_vm10 = vmor %vm1230_vm8, %vm1231_vm9  ;;  %vm1245_vm11 = vweird.f32 %v1176_v54  ;;  %v1251_v39 = vand.u32 2147483648, %v1176_v54 }
 0x2e1   : > { %v1213_v7 = vmul.f32 %v1990_v21, %v1212_v2  ;;  %v1227_v59 = vsub.f32 1.0, %v1226_v13  ;;  %v1249_v42 = vand.u32 2147483647, %v1176_v54 }
 0x2e2   : > { %1999 = vrcp.f32 %v1177_v11  ;;  %v1252_v19 = vor.u32 1.1754944e-38, %v1251_v39  ;;  %vm1260_vm1 = vweird.f32 %v1177_v11  ;;  %v1266_v24 = vand.u32 2147483648, %v1177_v11 }
 0x2e3   : > { %v1214_v43 = vadd.f32 %v1990_v21, %v1213_v7  ;;  %v1228_v45 = vmul.f32 %v1994_v57, %v1227_v59  ;;  %vm1250_vm14 = vcmp.eq.f32.partialorder %v1249_v42, 8.507059e+37  ;;  %v1264_v3 = vand.u32 2147483647, %v1177_v11 }
 0x2e4   : > { %v1267_v4 = vor.u32 1.1754944e-38, %v1266_v24 }
 0x2e5   : > { %v1218_v16 = vsel %vm1217_vm6, %v1990_v21, %v1214_v43  ;;  %v1229_v20 = vadd.f32 %v1994_v57, %v1228_v45  ;;  %vm1265_vm4 = vcmp.eq.f32.partialorder %v1264_v3, 8.507059e+37 }
 0x2e6   : > { %v1998_v17 = vpop.eup %1997  ;;  %v1223_v18 = vsel %vm1220_vm7, %v1222_v25, %v1218_v16 }
 0x2e7   : > { %v1241_v22 = vmul.f32 %v1998_v17, %v1176_v54  ;;  %v1233_v51 = vsel %vm1232_vm10, %v1994_v57, %v1229_v20  ;;  %vm1246_vm12 = vweird.f32 %v1998_v17 }
 0x2e8   : > { %v2000_v27 = vpop.eup %1999  ;;  %v1238_v49 = vsel %vm1235_vm15, %v1237_v14, %v1233_v51  ;;  %vm1247_vm13 = vmor %vm1245_vm11, %vm1246_vm12 }
 0x2e9   : > { %v1242_v60 = vsub.f32 1.0, %v1241_v22  ;;  %v1256_v1 = vmul.f32 %v2000_v27, %v1177_v11  ;;  %vm1261_vm2 = vweird.f32 %v2000_v27 }
 0x2ea   : > { %vm1262_vm3 = vmor %vm1260_vm1, %vm1261_vm2 }
 0x2eb   : > { %v1243_v58 = vmul.f32 %v1998_v17, %v1242_v60  ;;  %v1257_v8 = vsub.f32 1.0, %v1256_v1 }
 0x2ed   : > { %v1244_v41 = vadd.f32 %v1998_v17, %v1243_v58  ;;  %v1258_v38 = vmul.f32 %v2000_v27, %v1257_v8 }
 0x2ef   : > { %v1248_v23 = vsel %vm1247_vm13, %v1998_v17, %v1244_v41  ;;  %v1259_v48 = vadd.f32 %v2000_v27, %v1258_v38 }
 0x2f0   : > { %v1253_v44 = vsel %vm1250_vm14, %v1252_v19, %v1248_v23 }
 0x2f1   : > { %v1263_v53 = vsel %vm1262_vm3, %v2000_v27, %v1259_v48 }
 0x2f2   : > { %v1268_v50 = vsel %vm1265_vm4, %v1267_v4, %v1263_v53 }
 0x2fa   : > { %v1628_v62 = vpop.f32.mrf.mxu1 }
 0x2fb   : > { %v1648_v36 = vmul.f32 %v1628_v62, %v1193_v47 }
 0x2fd   : > { %1656 = vst.msk [vmem:[%s2775_s30] sm:$0xff] %vm429_vm0, %v1648_v36  ;;  %v1143_v0 = vpop.f32.mrf.mxu2 }
 0x2fe   : > { %v1144_v47 = vadd.f32 %v2755_v15, %v1143_v0 }
 0x300   : > { %v1793_v9 = vmul.f32 -1.442695, %v1144_v47 }
 0x302   : > { %v1630_v10 = vpop.f32.mrf.mxu1  ;;  %2001 = vpow2.f32 %v1793_v9 }
 0x303   : > { %v1649_v28 = vmul.f32 %v1630_v10, %v1208_v55 }
 0x305   : > { %1657 = vst.msk [vmem:[%s2775_s30 + $0x8] sm:$0xff] %vm429_vm0, %v1649_v28  ;;  %v1145_v32 = vpop.f32.mrf.mxu2 }
 0x306   : > { %v1146_v29 = vadd.f32 %v2755_v15, %v1145_v32 }
 0x308   : > { %v1794_v61 = vmul.f32 -1.442695, %v1146_v29  ;;  %v2002_v30 = vpop.eup %2001 }
 0x309   : > { %v1178_v62 = vadd.f32 1.0, %v2002_v30 }
 0x30a   : > { %2003 = vpow2.f32 %v1794_v61 }
 0x30b   : > { %2005 = vrcp.f32 %v1178_v62  ;;  %vm1275_vm5 = vweird.f32 %v1178_v62  ;;  %v1281_v7 = vand.u32 2147483648, %v1178_v62  ;;  %v1279_v10 = vand.u32 2147483647, %v1178_v62 }
 0x30c   : > { %v1633_v37 = vpop.f32.mrf.mxu1 }
 0x30d   : > { %v1650_v33 = vmul.f32 %v1633_v37, %v1223_v18  ;;  %v1282_v28 = vor.u32 1.1754944e-38, %v1281_v7  ;;  %vm1280_vm8 = vcmp.eq.f32.partialorder %v1279_v10, 8.507059e+37 }
 0x30f   : > { %1658 = vst.msk [vmem:[%s2775_s30 + $0x10] sm:$0xff] %vm429_vm0, %v1650_v33 }
 0x310   : > { %v2004_v36 = vpop.eup %2003 }
 0x311   : > { %v1179_v54 = vadd.f32 1.0, %v2004_v36  ;;  %v2006_v26 = vpop.eup %2005 }
 0x312   : > { %v1271_v63 = vmul.f32 %v2006_v26, %v1178_v62  ;;  %vm1276_vm6 = vweird.f32 %v2006_v26 }
 0x313   : > { %2007 = vrcp.f32 %v1179_v54  ;;  %vm1277_vm7 = vmor %vm1275_vm5, %vm1276_vm6  ;;  %vm1290_vm9 = vweird.f32 %v1179_v54  ;;  %v1296_v59 = vand.u32 2147483648, %v1179_v54  ;;  %v1294_v16 = vand.u32 2147483647, %v1179_v54 }
 0x314   : > { %v1635_v34 = vpop.f32.mrf.mxu1  ;;  %v1272_v2 = vsub.f32 1.0, %v1271_v63 }
 0x315   : > { %v1651_v35 = vmul.f32 %v1635_v34, %v1238_v49  ;;  %v1297_v45 = vor.u32 1.1754944e-38, %v1296_v59  ;;  %vm1295_vm11 = vcmp.eq.f32.partialorder %v1294_v16, 8.507059e+37 }
 0x316   : > { %v1273_v55 = vmul.f32 %v2006_v26, %v1272_v2 }
 0x317   : > { %1659 = vst.msk [vmem:[%s2775_s30 + $0x18] sm:$0xff] %vm429_vm0, %v1651_v35 }
 0x318   : > { %v1274_v13 = vadd.f32 %v2006_v26, %v1273_v55 }
 0x319   : > { %v2008_v57 = vpop.eup %2007 }
 0x31a   : > { %v1286_v5 = vmul.f32 %v2008_v57, %v1179_v54  ;;  %v1278_v11 = vsel %vm1277_vm7, %v2006_v26, %v1274_v13  ;;  %vm1291_vm10 = vweird.f32 %v2008_v57 }
 0x31b   : > { %v1283_v43 = vsel %vm1280_vm8, %v1282_v28, %v1278_v11  ;;  %vm1292_vm15 = vmor %vm1290_vm9, %vm1291_vm10 }
 0x31c   : > { %v1638_v56 = vpop.f32.mrf.mxu1  ;;  %v1287_v15 = vsub.f32 1.0, %v1286_v5 }
 0x31d   : > { %v1652_v52 = vmul.f32 %v1638_v56, %v1253_v44 }
 0x31e   : > { %v1288_v31 = vmul.f32 %v2008_v57, %v1287_v15 }
 0x31f   : > { %1660 = vst.msk [vmem:[%s2775_s30 + $0x20] sm:$0xff] %vm429_vm0, %v1652_v52 }
 0x320   : > { %v1289_v25 = vadd.f32 %v2008_v57, %v1288_v31 }
 0x322   : > { %v1293_v22 = vsel %vm1292_vm15, %v2008_v57, %v1289_v25 }
 0x323   : > { %v1298_v18 = vsel %vm1295_vm11, %v1297_v45, %v1293_v22 }
 0x324   : > { %v1640_v21 = vpop.f32.mrf.mxu1 }
 0x325   : > { %v1653_v46 = vmul.f32 %v1640_v21, %v1268_v50 }
 0x327   : > { %1661 = vst.msk [vmem:[%s2775_s30 + $0x28] sm:$0xff] %vm429_vm0, %v1653_v46 }
 0x356   : > { %v1643_v12 = vpop.f32.mrf.mxu1 }
 0x357   : > { %v1654_v17 = vmul.f32 %v1643_v12, %v1283_v43 }
 0x359   : > { %1662 = vst.msk [vmem:[%s2775_s30 + $0x30] sm:$0xff] %vm429_vm0, %v1654_v17 }
 0x35e   : > { %v1645_v6 = vpop.f32.mrf.mxu1 }
 0x35f   : > { %v1655_v20 = vmul.f32 %v1645_v6, %v1298_v18 }
 0x361   : > { %1663 = vst.msk [vmem:[%s2775_s30 + $0x38] sm:$0xff] %vm429_vm0, %v1655_v20 }
 0x362 PF: > { %s21_s17 = sadd.s32 1, %s2023_s17  }
 0x363   : > { %p18_p4 = scmp.ge.s32.totalorder %s21_s17, 4  }
 0x365   :  { %20 = sbr.rel (!%p18_p4) target bundleno = 1 (0x1), region = 97 }

</bundles_post_ra>
